<compile_context>
chip_gen: v6e
topology: v6e:2x2x1
jax: 0.10.0
libtpu: 0.0.40
codegen_flags: <defaults>
</compile_context>

<pallas_src>
import jax
import jax.numpy as jnp
import numpy as np
from jax.experimental import pallas as pl
from jax.experimental.pallas import tpu as pltpu

BN_EPS = 1e-5


# ---------------- Fused conv3x3+ReLU -> conv3x3+ReLU (+ BN stats) ------------
def double_conv_kernel(x_ref, w1_ref, b1_ref, w2_ref, b2_ref,
                       y_ref, s_ref, ss_ref, xpad_ref, hpad_ref):
    # x_ref   : (1, H, W, Cin)     one batch element, unpadded NHWC
    # w1_ref  : (9, Cin,  Cout)    taps ordered k = kh*3 + kw
    # w2_ref  : (9, Cout, Cout)
    # b*_ref  : (1, Cout)
    # y_ref   : (1, H*W, Cout)     conv2 activation, rows ordered h*W + w
    # s_ref   : (1, 1, Cout)       per-batch channel sum of the activation
    # ss_ref  : (1, 1, Cout)       per-batch channel sum of squares
    # xpad_ref: (H+2, W+2, Cin)    VMEM scratch (in-kernel zero padding)
    # hpad_ref: (H+2, W+2, Cout)   VMEM scratch (fused conv1 output, padded)
    _, H, W, Cin = x_ref.shape
    Cout = w1_ref.shape[2]

    # zero-pad the input inside VMEM (no padded copy in HBM)
    xpad_ref[...] = jnp.zeros_like(xpad_ref)
    xpad_ref[1:H + 1, 1:W + 1, :] = x_ref[0]

    # conv1 (3x3, pad 1) + ReLU -- 9 shifted-tap matmuls accumulated in f32
    acc1 = jnp.zeros((H * W, Cout), jnp.float32)
    for dh in range(3):
        for dw in range(3):
            xs = xpad_ref[dh:dh + H, dw:dw + W, :].reshape(H * W, Cin)
            acc1 = acc1 + jnp.dot(xs, w1_ref[dh * 3 + dw],
                                  preferred_element_type=jnp.float32)
    h1 = jnp.maximum(acc1 + b1_ref[...], 0.0)            # (H*W, Cout)

    # keep conv1 output in VMEM, zero-padded, and run conv2 directly on it
    hpad_ref[...] = jnp.zeros_like(hpad_ref)
    hpad_ref[1:H + 1, 1:W + 1, :] = h1.reshape(H, W, Cout)

    acc2 = jnp.zeros((H * W, Cout), jnp.float32)
    for dh in range(3):
        for dw in range(3):
            hs = hpad_ref[dh:dh + H, dw:dw + W, :].reshape(H * W, Cout)
            acc2 = acc2 + jnp.dot(hs, w2_ref[dh * 3 + dw],
                                  preferred_element_type=jnp.float32)
    h2 = jnp.maximum(acc2 + b2_ref[...], 0.0)            # (H*W, Cout)

    y_ref[0] = h2
    s_ref[0] = jnp.sum(h2, axis=0, keepdims=True)        # (1, Cout)
    ss_ref[0] = jnp.sum(h2 * h2, axis=0, keepdims=True)  # (1, Cout)


def double_conv(x_nhwc, w1_taps, b1, w2_taps, b2):
    N, H, W, Cin = x_nhwc.shape
    Cout = w1_taps.shape[-1]
    return pl.pallas_call(
        double_conv_kernel,
        out_shape=(jax.ShapeDtypeStruct((N, H * W, Cout), jnp.float32),
                   jax.ShapeDtypeStruct((N, 1, Cout), jnp.float32),
                   jax.ShapeDtypeStruct((N, 1, Cout), jnp.float32)),
        grid=(N,),
        in_specs=[
            pl.BlockSpec((1, H, W, Cin), lambda n: (n, 0, 0, 0)),
            pl.BlockSpec((9, Cin, Cout), lambda n: (0, 0, 0)),
            pl.BlockSpec((1, Cout), lambda n: (0, 0)),
            pl.BlockSpec((9, Cout, Cout), lambda n: (0, 0, 0)),
            pl.BlockSpec((1, Cout), lambda n: (0, 0)),
        ],
        out_specs=(
            pl.BlockSpec((1, H * W, Cout), lambda n: (n, 0, 0)),
            pl.BlockSpec((1, 1, Cout), lambda n: (n, 0, 0)),
            pl.BlockSpec((1, 1, Cout), lambda n: (n, 0, 0)),
        ),
        scratch_shapes=[
            pltpu.VMEM((H + 2, W + 2, Cin), jnp.float32),
            pltpu.VMEM((H + 2, W + 2, Cout), jnp.float32),
        ],
        compiler_params=pltpu.CompilerParams(dimension_semantics=("parallel",)),
    )(x_nhwc, w1_taps, b1.reshape(1, Cout), w2_taps, b2.reshape(1, Cout))


# --------------- BatchNorm apply (scale/shift) + H-direction 2:1 pool --------
def bn_rowpool_kernel(y_ref, sc_ref, sh_ref, xn_ref, r_ref):
    # y_ref : (1, H//2, 2, W*C)  lane-dense view of the conv activation
    # sc/sh : (1, 1, W*C)        per-(w, c) BN scale (gamma*rstd) / shift
    # xn_ref: (1, H//2, 2, W*C)  normalized activation (lane-dense stores)
    # r_ref : (1, H//2, W*C)     max over the 2 adjacent rows (H-pooled)
    y = y_ref[0]                                         # (H//2, 2, W*C)
    xn = y * sc_ref[...] + sh_ref[...]
    xn_ref[0] = xn
    r_ref[0] = jnp.max(xn, axis=1)                       # pool row pairs


def bn_rowpool(y_view, scale_w, shift_w):
    N, H2, _, WC = y_view.shape
    return pl.pallas_call(
        bn_rowpool_kernel,
        out_shape=(jax.ShapeDtypeStruct((N, H2, 2, WC), jnp.float32),
                   jax.ShapeDtypeStruct((N, H2, WC), jnp.float32)),
        grid=(N,),
        in_specs=[
            pl.BlockSpec((1, H2, 2, WC), lambda n: (n, 0, 0, 0)),
            pl.BlockSpec((1, 1, WC), lambda n: (0, 0, 0)),
            pl.BlockSpec((1, 1, WC), lambda n: (0, 0, 0)),
        ],
        out_specs=(
            pl.BlockSpec((1, H2, 2, WC), lambda n: (n, 0, 0, 0)),
            pl.BlockSpec((1, H2, WC), lambda n: (n, 0, 0)),
        ),
        compiler_params=pltpu.CompilerParams(dimension_semantics=("parallel",)),
    )(y_view, scale_w, shift_w)


# ------------------------------ Module wrapper -------------------------------
def downsample_forward(x_nchw, params):
    """Pallas implementation of Downsample.forward (training-mode BN). NCHW."""
    N, Cin, H, W = x_nchw.shape
    Cout = params["b1"].shape[0]

    x = jnp.transpose(x_nchw, (0, 2, 3, 1))              # NCHW -> NHWC (glue)

    y, s, ss = double_conv(x, params["w1_taps"], params["b1"],
                           params["w2_taps"], params["b2"])

    # BatchNorm batch statistics (biased variance, training mode) from the
    # per-batch sums emitted by the fused conv kernel (tiny (N, Cout) arrays).
    count = float(N * H * W)
    mean = jnp.sum(s[:, 0, :], axis=0) / count           # (Cout,)
    var = jnp.sum(ss[:, 0, :], axis=0) / count - mean * mean
    rstd = jax.lax.rsqrt(var + BN_EPS)
    scale = params["gamma"] * rstd
    shift = params["beta"] - mean * scale

    WC = W * Cout
    scale_w = jnp.tile(scale, W).reshape(1, 1, WC)       # lane layout w*C + c
    shift_w = jnp.tile(shift, W).reshape(1, 1, WC)

    y_view = y.reshape(N, H // 2, 2, WC)                 # free reshape, no copy
    xn_wide, r = bn_rowpool(y_view, scale_w, shift_w)

    xn = jnp.transpose(xn_wide.reshape(N, H, W, Cout), (0, 3, 1, 2))  # -> NCHW
    # finish the 2x2 pool: tiny 2:1 max over W pairs, fuses with the transpose
    down_nhwc = jnp.max(r.reshape(N, H // 2, W // 2, 2, Cout), axis=3)
    down = jnp.transpose(down_nhwc, (0, 3, 1, 2))                      # -> NCHW
    return down, xn


def to_taps(w_oihw):
    # torch weight (Cout, Cin, 3, 3) -> (9, Cin, Cout), tap k = kh*3 + kw
    cout, cin = w_oihw.shape[0], w_oihw.shape[1]
    return jnp.transpose(w_oihw, (2, 3, 1, 0)).reshape(9, cin, cout)


def init_params(key, cin, cout):
    ks = jax.random.split(key, 6)
    w1 = jax.random.normal(ks[0], (cout, cin, 3, 3), jnp.float32) * 0.2
    b1 = jax.random.normal(ks[1], (cout,), jnp.float32) * 0.1
    w2 = jax.random.normal(ks[2], (cout, cout, 3, 3), jnp.float32) * 0.2
    b2 = jax.random.normal(ks[3], (cout,), jnp.float32) * 0.1
    gamma = 1.0 + 0.1 * jax.random.normal(ks[4], (cout,), jnp.float32)
    beta = 0.1 * jax.random.normal(ks[5], (cout,), jnp.float32)
    return {"w1": w1, "b1": b1, "w2": w2, "b2": b2,
            "gamma": gamma, "beta": beta,
            "w1_taps": to_taps(w1), "w2_taps": to_taps(w2)}


# ------------------------------- Pure-JAX ref --------------------------------
def ref_forward(x, p):
    def conv(h, w, b):
        y = jax.lax.conv_general_dilated(
            h, w, window_strides=(1, 1), padding=((1, 1), (1, 1)),
            dimension_numbers=("NCHW", "OIHW", "NCHW"))
        return jax.nn.relu(y + b[None, :, None, None])
    h = conv(conv(x, p["w1"], p["b1"]), p["w2"], p["b2"])
    mean = h.mean(axis=(0, 2, 3), keepdims=True)
    var = ((h - mean) ** 2).mean(axis=(0, 2, 3), keepdims=True)
    xn = (h - mean) / jnp.sqrt(var + BN_EPS) * p["gamma"][None, :, None, None] \
         + p["beta"][None, :, None, None]
    N, C, H, W = xn.shape
    down = xn.reshape(N, C, H // 2, 2, W // 2, 2).max(axis=(3, 5))
    return down, xn


if __name__ == "__main__":
    key = jax.random.PRNGKey(0)
    kx, kp = jax.random.split(key)
    N, Cin, Cout, H, W = 2, 4, 8, 16, 16
    x = jax.random.normal(kx, (N, Cin, H, W), jnp.float32)
    params = init_params(kp, Cin, Cout)

    down, xout = jax.jit(downsample_forward)(x, params)
    jax.block_until_ready((down, xout))

    down_ref, xout_ref = ref_forward(x, params)
    np.testing.assert_allclose(np.asarray(xout), np.asarray(xout_ref),
                               rtol=1e-3, atol=1e-3)
    np.testing.assert_allclose(np.asarray(down), np.asarray(down_ref),
                               rtol=1e-3, atol=1e-3)
    assert down.shape == (N, Cout, H // 2, W // 2) and xout.shape == (N, Cout, H, W)
    print("KERNEL_OK")
</pallas_src>

<mosaic_0001>
module attributes {stable_mosaic.version = 11 : i64} {
  func.func @double_conv_kernel(%arg0: i32, %arg1: memref<1x16x16x4xf32, #tpu.memory_space<vmem>>, %arg2: memref<9x4x8xf32, #tpu.memory_space<vmem>>, %arg3: memref<1x8xf32, #tpu.memory_space<vmem>>, %arg4: memref<9x8x8xf32, #tpu.memory_space<vmem>>, %arg5: memref<1x8xf32, #tpu.memory_space<vmem>>, %arg6: memref<1x256x8xf32, #tpu.memory_space<vmem>>, %arg7: memref<1x1x8xf32, #tpu.memory_space<vmem>>, %arg8: memref<1x1x8xf32, #tpu.memory_space<vmem>>, %arg9: memref<18x18x4xf32, #tpu.memory_space<vmem>>, %arg10: memref<18x18x8xf32, #tpu.memory_space<vmem>>) attributes {dimension_semantics = [#tpu.dimension_semantics<parallel>], iteration_bounds = array<i64: 2>, scalar_prefetch = 0 : i64, scratch_operands = 2 : i64, tpu.core_type = #tpu.core_type<tc>, window_params = [{transform_indices = @transform_0, window_bounds = array<i64: 1, 16, 16, 4>}, {pipeline_mode = #tpu.pipeline_mode<synchronous>, transform_indices = @transform_1, window_bounds = array<i64: 9, 4, 8>}, {pipeline_mode = #tpu.pipeline_mode<synchronous>, transform_indices = @transform_2, window_bounds = array<i64: 1, 8>}, {pipeline_mode = #tpu.pipeline_mode<synchronous>, transform_indices = @transform_3, window_bounds = array<i64: 9, 8, 8>}, {pipeline_mode = #tpu.pipeline_mode<synchronous>, transform_indices = @transform_4, window_bounds = array<i64: 1, 8>}, {transform_indices = @transform_5, window_bounds = array<i64: 1, 256, 8>}, {transform_indices = @transform_6, window_bounds = array<i64: 1, 1, 8>}, {transform_indices = @transform_7, window_bounds = array<i64: 1, 1, 8>}]} {
    %cst = arith.constant 0.000000e+00 : f32
    %0 = vector.broadcast %cst : f32 to vector<18x18x4xf32>
    %c0 = arith.constant 0 : index
    %c0_0 = arith.constant 0 : index
    %c0_1 = arith.constant 0 : index
    %1 = vector.load %arg9[%c0, %c0_0, %c0_1] : memref<18x18x4xf32, #tpu.memory_space<vmem>>, vector<18x18x4xf32>
    tpu.vector_store %arg9[%c0, %c0_0, %c0_1], %0 {strides = array<i32>} : memref<18x18x4xf32, #tpu.memory_space<vmem>>, vector<18x18x4xf32>,
    %c0_2 = arith.constant 0 : index
    %c0_3 = arith.constant 0 : index
    %c0_4 = arith.constant 0 : index
    %c0_5 = arith.constant 0 : index
    %2 = vector.load %arg1[%c0_2, %c0_3, %c0_4, %c0_5] : memref<1x16x16x4xf32, #tpu.memory_space<vmem>>, vector<1x16x16x4xf32>
    %3 = vector.shape_cast %2 : vector<1x16x16x4xf32> to vector<16x16x4xf32>
    %c1 = arith.constant 1 : index
    %c1_6 = arith.constant 1 : index
    %c0_7 = arith.constant 0 : index
    %4 = vector.load %arg9[%c1, %c1_6, %c0_7] : memref<18x18x4xf32, #tpu.memory_space<vmem>>, vector<16x16x4xf32>
    tpu.vector_store %arg9[%c1, %c1_6, %c0_7], %3 {strides = array<i32>} : memref<18x18x4xf32, #tpu.memory_space<vmem>>, vector<16x16x4xf32>,
    %cst_8 = arith.constant 0.000000e+00 : f32
    %5 = vector.broadcast %cst_8 : f32 to vector<256x8xf32>
    %c0_9 = arith.constant 0 : index
    %c0_10 = arith.constant 0 : index
    %c0_11 = arith.constant 0 : index
    %6 = vector.load %arg9[%c0_9, %c0_10, %c0_11] : memref<18x18x4xf32, #tpu.memory_space<vmem>>, vector<16x16x4xf32>
    %7 = vector.shape_cast %6 : vector<16x16x4xf32> to vector<256x4xf32>
    %c0_12 = arith.constant 0 : index
    %c0_13 = arith.constant 0 : index
    %c0_14 = arith.constant 0 : index
    %8 = vector.load %arg2[%c0_12, %c0_13, %c0_14] : memref<9x4x8xf32, #tpu.memory_space<vmem>>, vector<1x4x8xf32>
    %9 = vector.shape_cast %8 : vector<1x4x8xf32> to vector<4x8xf32>
    %cst_15 = arith.constant dense<0.000000e+00> : vector<256x8xf32>
    %10 = tpu.matmul %7, %9, %cst_15 {dimension_numbers = #tpu.dot_dimension_numbers<[1], [0], [0], [1], [0, 0, 1, 1], [], []>} : vector<256x4xf32>, vector<4x8xf32>, vector<256x8xf32> -> vector<256x8xf32>
    %11 = arith.addf %5, %10 : vector<256x8xf32>
    %c0_16 = arith.constant 0 : index
    %c1_17 = arith.constant 1 : index
    %c0_18 = arith.constant 0 : index
    %12 = vector.load %arg9[%c0_16, %c1_17, %c0_18] : memref<18x18x4xf32, #tpu.memory_space<vmem>>, vector<16x16x4xf32>
    %13 = vector.shape_cast %12 : vector<16x16x4xf32> to vector<256x4xf32>
    %c1_19 = arith.constant 1 : index
    %c0_20 = arith.constant 0 : index
    %c0_21 = arith.constant 0 : index
    %14 = vector.load %arg2[%c1_19, %c0_20, %c0_21] : memref<9x4x8xf32, #tpu.memory_space<vmem>>, vector<1x4x8xf32>
    %15 = vector.shape_cast %14 : vector<1x4x8xf32> to vector<4x8xf32>
    %cst_22 = arith.constant dense<0.000000e+00> : vector<256x8xf32>
    %16 = tpu.matmul %13, %15, %cst_22 {dimension_numbers = #tpu.dot_dimension_numbers<[1], [0], [0], [1], [0, 0, 1, 1], [], []>} : vector<256x4xf32>, vector<4x8xf32>, vector<256x8xf32> -> vector<256x8xf32>
    %17 = arith.addf %11, %16 : vector<256x8xf32>
    %c0_23 = arith.constant 0 : index
    %c2 = arith.constant 2 : index
    %c0_24 = arith.constant 0 : index
    %18 = vector.load %arg9[%c0_23, %c2, %c0_24] : memref<18x18x4xf32, #tpu.memory_space<vmem>>, vector<16x16x4xf32>
    %19 = vector.shape_cast %18 : vector<16x16x4xf32> to vector<256x4xf32>
    %c2_25 = arith.constant 2 : index
    %c0_26 = arith.constant 0 : index
    %c0_27 = arith.constant 0 : index
    %20 = vector.load %arg2[%c2_25, %c0_26, %c0_27] : memref<9x4x8xf32, #tpu.memory_space<vmem>>, vector<1x4x8xf32>
    %21 = vector.shape_cast %20 : vector<1x4x8xf32> to vector<4x8xf32>
    %cst_28 = arith.constant dense<0.000000e+00> : vector<256x8xf32>
    %22 = tpu.matmul %19, %21, %cst_28 {dimension_numbers = #tpu.dot_dimension_numbers<[1], [0], [0], [1], [0, 0, 1, 1], [], []>} : vector<256x4xf32>, vector<4x8xf32>, vector<256x8xf32> -> vector<256x8xf32>
    %23 = arith.addf %17, %22 : vector<256x8xf32>
    %c1_29 = arith.constant 1 : index
    %c0_30 = arith.constant 0 : index
    %c0_31 = arith.constant 0 : index
    %24 = vector.load %arg9[%c1_29, %c0_30, %c0_31] : memref<18x18x4xf32, #tpu.memory_space<vmem>>, vector<16x16x4xf32>
    %25 = vector.shape_cast %24 : vector<16x16x4xf32> to vector<256x4xf32>
    %c3 = arith.constant 3 : index
    %c0_32 = arith.constant 0 : index
    %c0_33 = arith.constant 0 : index
    %26 = vector.load %arg2[%c3, %c0_32, %c0_33] : memref<9x4x8xf32, #tpu.memory_space<vmem>>, vector<1x4x8xf32>
    %27 = vector.shape_cast %26 : vector<1x4x8xf32> to vector<4x8xf32>
    %cst_34 = arith.constant dense<0.000000e+00> : vector<256x8xf32>
    %28 = tpu.matmul %25, %27, %cst_34 {dimension_numbers = #tpu.dot_dimension_numbers<[1], [0], [0], [1], [0, 0, 1, 1], [], []>} : vector<256x4xf32>, vector<4x8xf32>, vector<256x8xf32> -> vector<256x8xf32>
    %29 = arith.addf %23, %28 : vector<256x8xf32>
    %c1_35 = arith.constant 1 : index
    %c1_36 = arith.constant 1 : index
    %c0_37 = arith.constant 0 : index
    %30 = vector.load %arg9[%c1_35, %c1_36, %c0_37] : memref<18x18x4xf32, #tpu.memory_space<vmem>>, vector<16x16x4xf32>
    %31 = vector.shape_cast %30 : vector<16x16x4xf32> to vector<256x4xf32>
    %c4 = arith.constant 4 : index
    %c0_38 = arith.constant 0 : index
    %c0_39 = arith.constant 0 : index
    %32 = vector.load %arg2[%c4, %c0_38, %c0_39] : memref<9x4x8xf32, #tpu.memory_space<vmem>>, vector<1x4x8xf32>
    %33 = vector.shape_cast %32 : vector<1x4x8xf32> to vector<4x8xf32>
    %cst_40 = arith.constant dense<0.000000e+00> : vector<256x8xf32>
    %34 = tpu.matmul %31, %33, %cst_40 {dimension_numbers = #tpu.dot_dimension_numbers<[1], [0], [0], [1], [0, 0, 1, 1], [], []>} : vector<256x4xf32>, vector<4x8xf32>, vector<256x8xf32> -> vector<256x8xf32>
    %35 = arith.addf %29, %34 : vector<256x8xf32>
    %c1_41 = arith.constant 1 : index
    %c2_42 = arith.constant 2 : index
    %c0_43 = arith.constant 0 : index
    %36 = vector.load %arg9[%c1_41, %c2_42, %c0_43] : memref<18x18x4xf32, #tpu.memory_space<vmem>>, vector<16x16x4xf32>
    %37 = vector.shape_cast %36 : vector<16x16x4xf32> to vector<256x4xf32>
    %c5 = arith.constant 5 : index
    %c0_44 = arith.constant 0 : index
    %c0_45 = arith.constant 0 : index
    %38 = vector.load %arg2[%c5, %c0_44, %c0_45] : memref<9x4x8xf32, #tpu.memory_space<vmem>>, vector<1x4x8xf32>
    %39 = vector.shape_cast %38 : vector<1x4x8xf32> to vector<4x8xf32>
    %cst_46 = arith.constant dense<0.000000e+00> : vector<256x8xf32>
    %40 = tpu.matmul %37, %39, %cst_46 {dimension_numbers = #tpu.dot_dimension_numbers<[1], [0], [0], [1], [0, 0, 1, 1], [], []>} : vector<256x4xf32>, vector<4x8xf32>, vector<256x8xf32> -> vector<256x8xf32>
    %41 = arith.addf %35, %40 : vector<256x8xf32>
    %c2_47 = arith.constant 2 : index
    %c0_48 = arith.constant 0 : index
    %c0_49 = arith.constant 0 : index
    %42 = vector.load %arg9[%c2_47, %c0_48, %c0_49] : memref<18x18x4xf32, #tpu.memory_space<vmem>>, vector<16x16x4xf32>
    %43 = vector.shape_cast %42 : vector<16x16x4xf32> to vector<256x4xf32>
    %c6 = arith.constant 6 : index
    %c0_50 = arith.constant 0 : index
    %c0_51 = arith.constant 0 : index
    %44 = vector.load %arg2[%c6, %c0_50, %c0_51] : memref<9x4x8xf32, #tpu.memory_space<vmem>>, vector<1x4x8xf32>
    %45 = vector.shape_cast %44 : vector<1x4x8xf32> to vector<4x8xf32>
    %cst_52 = arith.constant dense<0.000000e+00> : vector<256x8xf32>
    %46 = tpu.matmul %43, %45, %cst_52 {dimension_numbers = #tpu.dot_dimension_numbers<[1], [0], [0], [1], [0, 0, 1, 1], [], []>} : vector<256x4xf32>, vector<4x8xf32>, vector<256x8xf32> -> vector<256x8xf32>
    %47 = arith.addf %41, %46 : vector<256x8xf32>
    %c2_53 = arith.constant 2 : index
    %c1_54 = arith.constant 1 : index
    %c0_55 = arith.constant 0 : index
    %48 = vector.load %arg9[%c2_53, %c1_54, %c0_55] : memref<18x18x4xf32, #tpu.memory_space<vmem>>, vector<16x16x4xf32>
    %49 = vector.shape_cast %48 : vector<16x16x4xf32> to vector<256x4xf32>
    %c7 = arith.constant 7 : index
    %c0_56 = arith.constant 0 : index
    %c0_57 = arith.constant 0 : index
    %50 = vector.load %arg2[%c7, %c0_56, %c0_57] : memref<9x4x8xf32, #tpu.memory_space<vmem>>, vector<1x4x8xf32>
    %51 = vector.shape_cast %50 : vector<1x4x8xf32> to vector<4x8xf32>
    %cst_58 = arith.constant dense<0.000000e+00> : vector<256x8xf32>
    %52 = tpu.matmul %49, %51, %cst_58 {dimension_numbers = #tpu.dot_dimension_numbers<[1], [0], [0], [1], [0, 0, 1, 1], [], []>} : vector<256x4xf32>, vector<4x8xf32>, vector<256x8xf32> -> vector<256x8xf32>
    %53 = arith.addf %47, %52 : vector<256x8xf32>
    %c2_59 = arith.constant 2 : index
    %c2_60 = arith.constant 2 : index
    %c0_61 = arith.constant 0 : index
    %54 = vector.load %arg9[%c2_59, %c2_60, %c0_61] : memref<18x18x4xf32, #tpu.memory_space<vmem>>, vector<16x16x4xf32>
    %55 = vector.shape_cast %54 : vector<16x16x4xf32> to vector<256x4xf32>
    %c8 = arith.constant 8 : index
    %c0_62 = arith.constant 0 : index
    %c0_63 = arith.constant 0 : index
    %56 = vector.load %arg2[%c8, %c0_62, %c0_63] : memref<9x4x8xf32, #tpu.memory_space<vmem>>, vector<1x4x8xf32>
    %57 = vector.shape_cast %56 : vector<1x4x8xf32> to vector<4x8xf32>
    %cst_64 = arith.constant dense<0.000000e+00> : vector<256x8xf32>
    %58 = tpu.matmul %55, %57, %cst_64 {dimension_numbers = #tpu.dot_dimension_numbers<[1], [0], [0], [1], [0, 0, 1, 1], [], []>} : vector<256x4xf32>, vector<4x8xf32>, vector<256x8xf32> -> vector<256x8xf32>
    %59 = arith.addf %53, %58 : vector<256x8xf32>
    %c0_65 = arith.constant 0 : index
    %c0_66 = arith.constant 0 : index
    %60 = vector.load %arg3[%c0_65, %c0_66] : memref<1x8xf32, #tpu.memory_space<vmem>>, vector<1x8xf32>
    %61 = vector.broadcast %60 : vector<1x8xf32> to vector<256x8xf32>
    %62 = arith.addf %59, %61 : vector<256x8xf32>
    %cst_67 = arith.constant 0.000000e+00 : f32
    %63 = vector.broadcast %cst_67 : f32 to vector<256x8xf32>
    %64 = arith.maximumf %62, %63 : vector<256x8xf32>
    %cst_68 = arith.constant 0.000000e+00 : f32
    %65 = vector.broadcast %cst_68 : f32 to vector<18x18x8xf32>
    %c0_69 = arith.constant 0 : index
    %c0_70 = arith.constant 0 : index
    %c0_71 = arith.constant 0 : index
    %66 = vector.load %arg10[%c0_69, %c0_70, %c0_71] : memref<18x18x8xf32, #tpu.memory_space<vmem>>, vector<18x18x8xf32>
    tpu.vector_store %arg10[%c0_69, %c0_70, %c0_71], %65 {strides = array<i32>} : memref<18x18x8xf32, #tpu.memory_space<vmem>>, vector<18x18x8xf32>,
    %67 = vector.shape_cast %64 : vector<256x8xf32> to vector<16x16x8xf32>
    %c1_72 = arith.constant 1 : index
    %c1_73 = arith.constant 1 : index
    %c0_74 = arith.constant 0 : index
    %68 = vector.load %arg10[%c1_72, %c1_73, %c0_74] : memref<18x18x8xf32, #tpu.memory_space<vmem>>, vector<16x16x8xf32>
    tpu.vector_store %arg10[%c1_72, %c1_73, %c0_74], %67 {strides = array<i32>} : memref<18x18x8xf32, #tpu.memory_space<vmem>>, vector<16x16x8xf32>,
    %cst_75 = arith.constant 0.000000e+00 : f32
    %69 = vector.broadcast %cst_75 : f32 to vector<256x8xf32>
    %c0_76 = arith.constant 0 : index
    %c0_77 = arith.constant 0 : index
    %c0_78 = arith.constant 0 : index
    %70 = vector.load %arg10[%c0_76, %c0_77, %c0_78] : memref<18x18x8xf32, #tpu.memory_space<vmem>>, vector<16x16x8xf32>
    %71 = vector.shape_cast %70 : vector<16x16x8xf32> to vector<256x8xf32>
    %c0_79 = arith.constant 0 : index
    %c0_80 = arith.constant 0 : index
    %c0_81 = arith.constant 0 : index
    %72 = vector.load %arg4[%c0_79, %c0_80, %c0_81] : memref<9x8x8xf32, #tpu.memory_space<vmem>>, vector<1x8x8xf32>
    %73 = vector.shape_cast %72 : vector<1x8x8xf32> to vector<8x8xf32>
    %cst_82 = arith.constant dense<0.000000e+00> : vector<256x8xf32>
    %74 = tpu.matmul %71, %73, %cst_82 {dimension_numbers = #tpu.dot_dimension_numbers<[1], [0], [0], [1], [0, 0, 1, 1], [], []>} : vector<256x8xf32>, vector<8x8xf32>, vector<256x8xf32> -> vector<256x8xf32>
    %75 = arith.addf %69, %74 : vector<256x8xf32>
    %c0_83 = arith.constant 0 : index
    %c1_84 = arith.constant 1 : index
    %c0_85 = arith.constant 0 : index
    %76 = vector.load %arg10[%c0_83, %c1_84, %c0_85] : memref<18x18x8xf32, #tpu.memory_space<vmem>>, vector<16x16x8xf32>
    %77 = vector.shape_cast %76 : vector<16x16x8xf32> to vector<256x8xf32>
    %c1_86 = arith.constant 1 : index
    %c0_87 = arith.constant 0 : index
    %c0_88 = arith.constant 0 : index
    %78 = vector.load %arg4[%c1_86, %c0_87, %c0_88] : memref<9x8x8xf32, #tpu.memory_space<vmem>>, vector<1x8x8xf32>
    %79 = vector.shape_cast %78 : vector<1x8x8xf32> to vector<8x8xf32>
    %cst_89 = arith.constant dense<0.000000e+00> : vector<256x8xf32>
    %80 = tpu.matmul %77, %79, %cst_89 {dimension_numbers = #tpu.dot_dimension_numbers<[1], [0], [0], [1], [0, 0, 1, 1], [], []>} : vector<256x8xf32>, vector<8x8xf32>, vector<256x8xf32> -> vector<256x8xf32>
    %81 = arith.addf %75, %80 : vector<256x8xf32>
    %c0_90 = arith.constant 0 : index
    %c2_91 = arith.constant 2 : index
    %c0_92 = arith.constant 0 : index
    %82 = vector.load %arg10[%c0_90, %c2_91, %c0_92] : memref<18x18x8xf32, #tpu.memory_space<vmem>>, vector<16x16x8xf32>
    %83 = vector.shape_cast %82 : vector<16x16x8xf32> to vector<256x8xf32>
    %c2_93 = arith.constant 2 : index
    %c0_94 = arith.constant 0 : index
    %c0_95 = arith.constant 0 : index
    %84 = vector.load %arg4[%c2_93, %c0_94, %c0_95] : memref<9x8x8xf32, #tpu.memory_space<vmem>>, vector<1x8x8xf32>
    %85 = vector.shape_cast %84 : vector<1x8x8xf32> to vector<8x8xf32>
    %cst_96 = arith.constant dense<0.000000e+00> : vector<256x8xf32>
    %86 = tpu.matmul %83, %85, %cst_96 {dimension_numbers = #tpu.dot_dimension_numbers<[1], [0], [0], [1], [0, 0, 1, 1], [], []>} : vector<256x8xf32>, vector<8x8xf32>, vector<256x8xf32> -> vector<256x8xf32>
    %87 = arith.addf %81, %86 : vector<256x8xf32>
    %c1_97 = arith.constant 1 : index
    %c0_98 = arith.constant 0 : index
    %c0_99 = arith.constant 0 : index
    %88 = vector.load %arg10[%c1_97, %c0_98, %c0_99] : memref<18x18x8xf32, #tpu.memory_space<vmem>>, vector<16x16x8xf32>
    %89 = vector.shape_cast %88 : vector<16x16x8xf32> to vector<256x8xf32>
    %c3_100 = arith.constant 3 : index
    %c0_101 = arith.constant 0 : index
    %c0_102 = arith.constant 0 : index
    %90 = vector.load %arg4[%c3_100, %c0_101, %c0_102] : memref<9x8x8xf32, #tpu.memory_space<vmem>>, vector<1x8x8xf32>
    %91 = vector.shape_cast %90 : vector<1x8x8xf32> to vector<8x8xf32>
    %cst_103 = arith.constant dense<0.000000e+00> : vector<256x8xf32>
    %92 = tpu.matmul %89, %91, %cst_103 {dimension_numbers = #tpu.dot_dimension_numbers<[1], [0], [0], [1], [0, 0, 1, 1], [], []>} : vector<256x8xf32>, vector<8x8xf32>, vector<256x8xf32> -> vector<256x8xf32>
    %93 = arith.addf %87, %92 : vector<256x8xf32>
    %c1_104 = arith.constant 1 : index
    %c1_105 = arith.constant 1 : index
    %c0_106 = arith.constant 0 : index
    %94 = vector.load %arg10[%c1_104, %c1_105, %c0_106] : memref<18x18x8xf32, #tpu.memory_space<vmem>>, vector<16x16x8xf32>
    %95 = vector.shape_cast %94 : vector<16x16x8xf32> to vector<256x8xf32>
    %c4_107 = arith.constant 4 : index
    %c0_108 = arith.constant 0 : index
    %c0_109 = arith.constant 0 : index
    %96 = vector.load %arg4[%c4_107, %c0_108, %c0_109] : memref<9x8x8xf32, #tpu.memory_space<vmem>>, vector<1x8x8xf32>
    %97 = vector.shape_cast %96 : vector<1x8x8xf32> to vector<8x8xf32>
    %cst_110 = arith.constant dense<0.000000e+00> : vector<256x8xf32>
    %98 = tpu.matmul %95, %97, %cst_110 {dimension_numbers = #tpu.dot_dimension_numbers<[1], [0], [0], [1], [0, 0, 1, 1], [], []>} : vector<256x8xf32>, vector<8x8xf32>, vector<256x8xf32> -> vector<256x8xf32>
    %99 = arith.addf %93, %98 : vector<256x8xf32>
    %c1_111 = arith.constant 1 : index
    %c2_112 = arith.constant 2 : index
    %c0_113 = arith.constant 0 : index
    %100 = vector.load %arg10[%c1_111, %c2_112, %c0_113] : memref<18x18x8xf32, #tpu.memory_space<vmem>>, vector<16x16x8xf32>
    %101 = vector.shape_cast %100 : vector<16x16x8xf32> to vector<256x8xf32>
    %c5_114 = arith.constant 5 : index
    %c0_115 = arith.constant 0 : index
    %c0_116 = arith.constant 0 : index
    %102 = vector.load %arg4[%c5_114, %c0_115, %c0_116] : memref<9x8x8xf32, #tpu.memory_space<vmem>>, vector<1x8x8xf32>
    %103 = vector.shape_cast %102 : vector<1x8x8xf32> to vector<8x8xf32>
    %cst_117 = arith.constant dense<0.000000e+00> : vector<256x8xf32>
    %104 = tpu.matmul %101, %103, %cst_117 {dimension_numbers = #tpu.dot_dimension_numbers<[1], [0], [0], [1], [0, 0, 1, 1], [], []>} : vector<256x8xf32>, vector<8x8xf32>, vector<256x8xf32> -> vector<256x8xf32>
    %105 = arith.addf %99, %104 : vector<256x8xf32>
    %c2_118 = arith.constant 2 : index
    %c0_119 = arith.constant 0 : index
    %c0_120 = arith.constant 0 : index
    %106 = vector.load %arg10[%c2_118, %c0_119, %c0_120] : memref<18x18x8xf32, #tpu.memory_space<vmem>>, vector<16x16x8xf32>
    %107 = vector.shape_cast %106 : vector<16x16x8xf32> to vector<256x8xf32>
    %c6_121 = arith.constant 6 : index
    %c0_122 = arith.constant 0 : index
    %c0_123 = arith.constant 0 : index
    %108 = vector.load %arg4[%c6_121, %c0_122, %c0_123] : memref<9x8x8xf32, #tpu.memory_space<vmem>>, vector<1x8x8xf32>
    %109 = vector.shape_cast %108 : vector<1x8x8xf32> to vector<8x8xf32>
    %cst_124 = arith.constant dense<0.000000e+00> : vector<256x8xf32>
    %110 = tpu.matmul %107, %109, %cst_124 {dimension_numbers = #tpu.dot_dimension_numbers<[1], [0], [0], [1], [0, 0, 1, 1], [], []>} : vector<256x8xf32>, vector<8x8xf32>, vector<256x8xf32> -> vector<256x8xf32>
    %111 = arith.addf %105, %110 : vector<256x8xf32>
    %c2_125 = arith.constant 2 : index
    %c1_126 = arith.constant 1 : index
    %c0_127 = arith.constant 0 : index
    %112 = vector.load %arg10[%c2_125, %c1_126, %c0_127] : memref<18x18x8xf32, #tpu.memory_space<vmem>>, vector<16x16x8xf32>
    %113 = vector.shape_cast %112 : vector<16x16x8xf32> to vector<256x8xf32>
    %c7_128 = arith.constant 7 : index
    %c0_129 = arith.constant 0 : index
    %c0_130 = arith.constant 0 : index
    %114 = vector.load %arg4[%c7_128, %c0_129, %c0_130] : memref<9x8x8xf32, #tpu.memory_space<vmem>>, vector<1x8x8xf32>
    %115 = vector.shape_cast %114 : vector<1x8x8xf32> to vector<8x8xf32>
    %cst_131 = arith.constant dense<0.000000e+00> : vector<256x8xf32>
    %116 = tpu.matmul %113, %115, %cst_131 {dimension_numbers = #tpu.dot_dimension_numbers<[1], [0], [0], [1], [0, 0, 1, 1], [], []>} : vector<256x8xf32>, vector<8x8xf32>, vector<256x8xf32> -> vector<256x8xf32>
    %117 = arith.addf %111, %116 : vector<256x8xf32>
    %c2_132 = arith.constant 2 : index
    %c2_133 = arith.constant 2 : index
    %c0_134 = arith.constant 0 : index
    %118 = vector.load %arg10[%c2_132, %c2_133, %c0_134] : memref<18x18x8xf32, #tpu.memory_space<vmem>>, vector<16x16x8xf32>
    %119 = vector.shape_cast %118 : vector<16x16x8xf32> to vector<256x8xf32>
    %c8_135 = arith.constant 8 : index
    %c0_136 = arith.constant 0 : index
    %c0_137 = arith.constant 0 : index
    %120 = vector.load %arg4[%c8_135, %c0_136, %c0_137] : memref<9x8x8xf32, #tpu.memory_space<vmem>>, vector<1x8x8xf32>
    %121 = vector.shape_cast %120 : vector<1x8x8xf32> to vector<8x8xf32>
    %cst_138 = arith.constant dense<0.000000e+00> : vector<256x8xf32>
    %122 = tpu.matmul %119, %121, %cst_138 {dimension_numbers = #tpu.dot_dimension_numbers<[1], [0], [0], [1], [0, 0, 1, 1], [], []>} : vector<256x8xf32>, vector<8x8xf32>, vector<256x8xf32> -> vector<256x8xf32>
    %123 = arith.addf %117, %122 : vector<256x8xf32>
    %c0_139 = arith.constant 0 : index
    %c0_140 = arith.constant 0 : index
    %124 = vector.load %arg5[%c0_139, %c0_140] : memref<1x8xf32, #tpu.memory_space<vmem>>, vector<1x8xf32>
    %125 = vector.broadcast %124 : vector<1x8xf32> to vector<256x8xf32>
    %126 = arith.addf %123, %125 : vector<256x8xf32>
    %cst_141 = arith.constant 0.000000e+00 : f32
    %127 = vector.broadcast %cst_141 : f32 to vector<256x8xf32>
    %128 = arith.maximumf %126, %127 : vector<256x8xf32>
    %c0_142 = arith.constant 0 : index
    %c0_143 = arith.constant 0 : index
    %c0_144 = arith.constant 0 : index
    %129 = vector.load %arg6[%c0_142, %c0_143, %c0_144] : memref<1x256x8xf32, #tpu.memory_space<vmem>>, vector<1x256x8xf32>
    %130 = vector.shape_cast %129 : vector<1x256x8xf32> to vector<256x8xf32>
    %131 = vector.shape_cast %128 : vector<256x8xf32> to vector<1x256x8xf32>
    tpu.vector_store %arg6[%c0_142, %c0_143, %c0_144], %131 {strides = array<i32>} : memref<1x256x8xf32, #tpu.memory_space<vmem>>, vector<1x256x8xf32>,
    %cst_145 = arith.constant dense<0.000000e+00> : vector<8xf32>
    %132 = vector.multi_reduction <add>, %128, %cst_145 [0] : vector<256x8xf32> to vector<8xf32>
    %133 = vector.shape_cast %132 : vector<8xf32> to vector<1x8xf32>
    %c0_146 = arith.constant 0 : index
    %c0_147 = arith.constant 0 : index
    %c0_148 = arith.constant 0 : index
    %134 = vector.load %arg7[%c0_146, %c0_147, %c0_148] : memref<1x1x8xf32, #tpu.memory_space<vmem>>, vector<1x1x8xf32>
    %135 = vector.shape_cast %134 : vector<1x1x8xf32> to vector<1x8xf32>
    %136 = vector.shape_cast %133 : vector<1x8xf32> to vector<1x1x8xf32>
    tpu.vector_store %arg7[%c0_146, %c0_147, %c0_148], %136 {strides = array<i32>} : memref<1x1x8xf32, #tpu.memory_space<vmem>>, vector<1x1x8xf32>,
    %137 = arith.mulf %128, %128 : vector<256x8xf32>
    %cst_149 = arith.constant dense<0.000000e+00> : vector<8xf32>
    %138 = vector.multi_reduction <add>, %137, %cst_149 [0] : vector<256x8xf32> to vector<8xf32>
    %139 = vector.shape_cast %138 : vector<8xf32> to vector<1x8xf32>
    %c0_150 = arith.constant 0 : index
    %c0_151 = arith.constant 0 : index
    %c0_152 = arith.constant 0 : index
    %140 = vector.load %arg8[%c0_150, %c0_151, %c0_152] : memref<1x1x8xf32, #tpu.memory_space<vmem>>, vector<1x1x8xf32>
    %141 = vector.shape_cast %140 : vector<1x1x8xf32> to vector<1x8xf32>
    %142 = vector.shape_cast %139 : vector<1x8xf32> to vector<1x1x8xf32>
    tpu.vector_store %arg8[%c0_150, %c0_151, %c0_152], %142 {strides = array<i32>} : memref<1x1x8xf32, #tpu.memory_space<vmem>>, vector<1x1x8xf32>,
    return
  }
  func.func @transform_0(%arg0: i32) -> (i32, i32, i32, i32) {
    %c0_i32 = arith.constant 0 : i32
    %c0_i32_0 = arith.constant 0 : i32
    %c0_i32_1 = arith.constant 0 : i32
    %c0_i32_2 = arith.constant 0 : i32
    return %arg0, %c0_i32, %c0_i32_0, %c0_i32_1 : i32, i32, i32, i32
  }
  func.func @transform_1(%arg0: i32) -> (i32, i32, i32) {
    %c0_i32 = arith.constant 0 : i32
    %c0_i32_0 = arith.constant 0 : i32
    %c0_i32_1 = arith.constant 0 : i32
    %c0_i32_2 = arith.constant 0 : i32
    return %c0_i32, %c0_i32_0, %c0_i32_1 : i32, i32, i32
  }
  func.func @transform_2(%arg0: i32) -> (i32, i32) {
    %c0_i32 = arith.constant 0 : i32
    %c0_i32_0 = arith.constant 0 : i32
    %c0_i32_1 = arith.constant 0 : i32
    return %c0_i32, %c0_i32_0 : i32, i32
  }
  func.func @transform_3(%arg0: i32) -> (i32, i32, i32) {
    %c0_i32 = arith.constant 0 : i32
    %c0_i32_0 = arith.constant 0 : i32
    %c0_i32_1 = arith.constant 0 : i32
    %c0_i32_2 = arith.constant 0 : i32
    return %c0_i32, %c0_i32_0, %c0_i32_1 : i32, i32, i32
  }
  func.func @transform_4(%arg0: i32) -> (i32, i32) {
    %c0_i32 = arith.constant 0 : i32
    %c0_i32_0 = arith.constant 0 : i32
    %c0_i32_1 = arith.constant 0 : i32
    return %c0_i32, %c0_i32_0 : i32, i32
  }
  func.func @transform_5(%arg0: i32) -> (i32, i32, i32) {
    %c0_i32 = arith.constant 0 : i32
    %c0_i32_0 = arith.constant 0 : i32
    %c0_i32_1 = arith.constant 0 : i32
    return %arg0, %c0_i32, %c0_i32_0 : i32, i32, i32
  }
  func.func @transform_6(%arg0: i32) -> (i32, i32, i32) {
    %c0_i32 = arith.constant 0 : i32
    %c0_i32_0 = arith.constant 0 : i32
    %c0_i32_1 = arith.constant 0 : i32
    return %arg0, %c0_i32, %c0_i32_0 : i32, i32, i32
  }
  func.func @transform_7(%arg0: i32) -> (i32, i32, i32) {
    %c0_i32 = arith.constant 0 : i32
    %c0_i32_0 = arith.constant 0 : i32
    %c0_i32_1 = arith.constant 0 : i32
    return %arg0, %c0_i32, %c0_i32_0 : i32, i32, i32
  }
}

module attributes {stable_mosaic.version = 11 : i64} {
  func.func @bn_rowpool_kernel(%arg0: i32, %arg1: memref<1x8x2x128xf32, #tpu.memory_space<vmem>>, %arg2: memref<1x1x128xf32, #tpu.memory_space<vmem>>, %arg3: memref<1x1x128xf32, #tpu.memory_space<vmem>>, %arg4: memref<1x8x2x128xf32, #tpu.memory_space<vmem>>, %arg5: memref<1x8x128xf32, #tpu.memory_space<vmem>>) attributes {dimension_semantics = [#tpu.dimension_semantics<parallel>], iteration_bounds = array<i64: 2>, scalar_prefetch = 0 : i64, scratch_operands = 0 : i64, tpu.core_type = #tpu.core_type<tc>, window_params = [{transform_indices = @transform_0, window_bounds = array<i64: 1, 8, 2, 128>}, {pipeline_mode = #tpu.pipeline_mode<synchronous>, transform_indices = @transform_1, window_bounds = array<i64: 1, 1, 128>}, {pipeline_mode = #tpu.pipeline_mode<synchronous>, transform_indices = @transform_2, window_bounds = array<i64: 1, 1, 128>}, {transform_indices = @transform_3, window_bounds = array<i64: 1, 8, 2, 128>}, {transform_indices = @transform_4, window_bounds = array<i64: 1, 8, 128>}]} {
    %c0 = arith.constant 0 : index
    %c0_0 = arith.constant 0 : index
    %c0_1 = arith.constant 0 : index
    %c0_2 = arith.constant 0 : index
    %0 = vector.load %arg1[%c0, %c0_0, %c0_1, %c0_2] : memref<1x8x2x128xf32, #tpu.memory_space<vmem>>, vector<1x8x2x128xf32>
    %1 = vector.shape_cast %0 : vector<1x8x2x128xf32> to vector<8x2x128xf32>
    %c0_3 = arith.constant 0 : index
    %c0_4 = arith.constant 0 : index
    %c0_5 = arith.constant 0 : index
    %2 = vector.load %arg2[%c0_3, %c0_4, %c0_5] : memref<1x1x128xf32, #tpu.memory_space<vmem>>, vector<1x1x128xf32>
    %3 = vector.broadcast %2 : vector<1x1x128xf32> to vector<8x2x128xf32>
    %4 = arith.mulf %1, %3 : vector<8x2x128xf32>
    %c0_6 = arith.constant 0 : index
    %c0_7 = arith.constant 0 : index
    %c0_8 = arith.constant 0 : index
    %5 = vector.load %arg3[%c0_6, %c0_7, %c0_8] : memref<1x1x128xf32, #tpu.memory_space<vmem>>, vector<1x1x128xf32>
    %6 = vector.broadcast %5 : vector<1x1x128xf32> to vector<8x2x128xf32>
    %7 = arith.addf %4, %6 : vector<8x2x128xf32>
    %c0_9 = arith.constant 0 : index
    %c0_10 = arith.constant 0 : index
    %c0_11 = arith.constant 0 : index
    %c0_12 = arith.constant 0 : index
    %8 = vector.load %arg4[%c0_9, %c0_10, %c0_11, %c0_12] : memref<1x8x2x128xf32, #tpu.memory_space<vmem>>, vector<1x8x2x128xf32>
    %9 = vector.shape_cast %8 : vector<1x8x2x128xf32> to vector<8x2x128xf32>
    %10 = vector.shape_cast %7 : vector<8x2x128xf32> to vector<1x8x2x128xf32>
    tpu.vector_store %arg4[%c0_9, %c0_10, %c0_11, %c0_12], %10 {strides = array<i32>} : memref<1x8x2x128xf32, #tpu.memory_space<vmem>>, vector<1x8x2x128xf32>,
    %cst = arith.constant dense<0xFF800000> : vector<8x128xf32>
    %11 = vector.multi_reduction <maximumf>, %7, %cst [1] : vector<8x2x128xf32> to vector<8x128xf32>
    %c0_13 = arith.constant 0 : index
    %c0_14 = arith.constant 0 : index
    %c0_15 = arith.constant 0 : index
    %12 = vector.load %arg5[%c0_13, %c0_14, %c0_15] : memref<1x8x128xf32, #tpu.memory_space<vmem>>, vector<1x8x128xf32>
    %13 = vector.shape_cast %12 : vector<1x8x128xf32> to vector<8x128xf32>
    %14 = vector.shape_cast %11 : vector<8x128xf32> to vector<1x8x128xf32>
    tpu.vector_store %arg5[%c0_13, %c0_14, %c0_15], %14 {strides = array<i32>} : memref<1x8x128xf32, #tpu.memory_space<vmem>>, vector<1x8x128xf32>,
    return
  }
  func.func @transform_0(%arg0: i32) -> (i32, i32, i32, i32) {
    %c0_i32 = arith.constant 0 : i32
    %c0_i32_0 = arith.constant 0 : i32
    %c0_i32_1 = arith.constant 0 : i32
    %c0_i32_2 = arith.constant 0 : i32
    return %arg0, %c0_i32, %c0_i32_0, %c0_i32_1 : i32, i32, i32, i32
  }
  func.func @transform_1(%arg0: i32) -> (i32, i32, i32) {
    %c0_i32 = arith.constant 0 : i32
    %c0_i32_0 = arith.constant 0 : i32
    %c0_i32_1 = arith.constant 0 : i32
    %c0_i32_2 = arith.constant 0 : i32
    return %c0_i32, %c0_i32_0, %c0_i32_1 : i32, i32, i32
  }
  func.func @transform_2(%arg0: i32) -> (i32, i32, i32) {
    %c0_i32 = arith.constant 0 : i32
    %c0_i32_0 = arith.constant 0 : i32
    %c0_i32_1 = arith.constant 0 : i32
    %c0_i32_2 = arith.constant 0 : i32
    return %c0_i32, %c0_i32_0, %c0_i32_1 : i32, i32, i32
  }
  func.func @transform_3(%arg0: i32) -> (i32, i32, i32, i32) {
    %c0_i32 = arith.constant 0 : i32
    %c0_i32_0 = arith.constant 0 : i32
    %c0_i32_1 = arith.constant 0 : i32
    %c0_i32_2 = arith.constant 0 : i32
    return %arg0, %c0_i32, %c0_i32_0, %c0_i32_1 : i32, i32, i32, i32
  }
  func.func @transform_4(%arg0: i32) -> (i32, i32, i32) {
    %c0_i32 = arith.constant 0 : i32
    %c0_i32_0 = arith.constant 0 : i32
    %c0_i32_1 = arith.constant 0 : i32
    return %arg0, %c0_i32, %c0_i32_0 : i32, i32, i32
  }
}

</mosaic_0001>

<bundles_post_ra>
// kernel: tile.18
= control target key start
LH: loop header
LB: loop body
LE: loop exit
PB: predicated region body
PF: predicated region fallthrough
CT: control target
= control target key end

     0   :  { %s28_s0 = inlined_call_operand.vmem [shape: f32[8], index: 0, kind: input, shape index: {}]   ;;  %s29_s1 = inlined_call_operand.vmem [shape: f32[16,8], index: 1, kind: output, shape index: {}]  }
   0x1   :  { %v4_v0 = vld [vmem:[%s28_s0] ss:$0 sm:$0xff] }
   0x2   :  { %5 = vst [vmem:[%s29_s1] sm:$0xff] %v4_v0  ;;  %8 = vst [vmem:[%s29_s1 + $0x8] sm:$0xff] %v4_v0 }

// kernel: tile.19
= control target key start
LH: loop header
LB: loop body
LE: loop exit
PB: predicated region body
PF: predicated region fallthrough
CT: control target
= control target key end

     0   :  { %s133_s10 = smov 120   ;;  %s134_s11 = smov 104   ;;  %vm3_vm0 = vcmask 64512   ;;  %vm9_vm1 = vcmask 1048512   ;;  %vm15_vm2 = vcmask 982912   ;;  %vm21_vm3 = vcmask 917312   ;;  %s209_s0 = inlined_call_operand.vmem [shape: f32[16,8], index: 0, kind: input, shape index: {}]   ;;  %s210_s1 = inlined_call_operand.vmem [shape: f32[1,1,128], index: 1, kind: output, shape index: {}]  }
   0x1   :  { %v103_v0 = vld [vmem:[%s209_s0 + $0xf] sm:$0x1]   ;;  %v105_v1 = vld [vmem:[%s209_s0 + $0xd] sm:$0x1]   ;;  %v104_v2 = vld [vmem:[%s209_s0 + $0xe] sm:$0x1]  }
   0x2   :  { %7 = vrot.lane.b32.xlu0 %v103_v0, %s133_s10  ;;  %19 = vrot.lane.b32.xlu1 %v105_v1, %s134_s11  ;;  %v106_v3 = vld [vmem:[%s209_s0 + $0xc] sm:$0x1]   ;;  %s135_s16 = smov 112   ;;  %s136_s17 = smov 96   ;;  %v107_v4 = vld [vmem:[%s209_s0 + $0xb] sm:$0x1]  }
   0x3   :  { %v108_v5 = vld [vmem:[%s209_s0 + $0xa] sm:$0x1]   ;;  %v2_v6 = vld [vmem:[%s209_s0] sm:$0x1]   ;;  %s137_s24 = smov 88   ;;  %s138_s25 = smov 80  }
   0x4   :  { %4 = vst.msk [vmem:[#allocation0] sm:$0x1] %vm3_vm0, %v2_v6   ;;  %v109_v7 = vld [vmem:[%s209_s0 + $0x9] sm:$0x1]   ;;  %v110_v8 = vld [vmem:[%s209_s0 + $0x8] sm:$0x1]  }
   0x5   :  { %s139_s30 = smov 72   ;;  %s140_s2 = smov 64   ;;  %v111_v9 = vld [vmem:[%s209_s0 + $0x7] sm:$0x1]   ;;  %v112_v10 = vld [vmem:[%s209_s0 + $0x6] sm:$0x1]  }
   0x6   :  { %13 = vrot.lane.b32.xlu0 %v104_v2, %s135_s16  ;;  %25 = vrot.lane.b32.xlu1 %v106_v3, %s136_s17  ;;  %s141_s7 = smov 56   ;;  %s142_s8 = smov 48   ;;  %v113_v11 = vld [vmem:[%s209_s0 + $0x5] sm:$0x1]   ;;  %v114_v12 = vld [vmem:[%s209_s0 + $0x4] sm:$0x1]  }
   0x7   :  { %s143_s13 = smov 40   ;;  %s144_s14 = smov 32   ;;  %v115_v13 = vld [vmem:[%s209_s0 + $0x3] sm:$0x1]   ;;  %v116_v14 = vld [vmem:[%s209_s0 + $0x2] sm:$0x1]  }
   0x8   :  { %s145_s19 = smov 24   ;;  %s146_s20 = smov 16   ;;  %v117_v15 = vld [vmem:[%s209_s0 + $0x1] sm:$0x1]   ;;  %vm27_vm4 = vcmask 851712   ;;  %vm33_vm5 = vcmask 786112  }
   0x9   :  { %s147_s0 = smov 8   ;;  %vm39_vm6 = vcmask 720512   ;;  %vm45_vm7 = vcmask 654912   ;;  %vm51_vm8 = vcmask 589312   ;;  %vm57_vm9 = vcmask 523712  }
   0xa   :  { %31 = vrot.lane.b32.xlu0 %v107_v4, %s137_s24  ;;  %37 = vrot.lane.b32.xlu1 %v108_v5, %s138_s25  ;;  %vm63_vm10 = vcmask 458112   ;;  %vm69_vm11 = vcmask 392512   ;;  %vm75_vm12 = vcmask 326912   ;;  %vm81_vm13 = vcmask 261312  }
   0xb   :  { %vm87_vm14 = vcmask 195712   ;;  %vm93_vm15 = vcmask 130112  }
   0xe   :  { %43 = vrot.lane.b32.xlu0 %v109_v7, %s139_s30  ;;  %49 = vrot.lane.b32.xlu1 %v110_v8, %s140_s2 }
  0x12   :  { %55 = vrot.lane.b32.xlu0 %v111_v9, %s141_s7  ;;  %61 = vrot.lane.b32.xlu1 %v112_v10, %s142_s8 }
  0x16   :  { %67 = vrot.lane.b32.xlu0 %v113_v11, %s143_s13  ;;  %73 = vrot.lane.b32.xlu1 %v114_v12, %s144_s14 }
  0x1a   :  { %79 = vrot.lane.b32.xlu0 %v115_v13, %s145_s19  ;;  %85 = vrot.lane.b32.xlu1 %v116_v14, %s146_s20 }
  0x1e   :  { %91 = vrot.lane.b32.xlu0 %v117_v15, %s147_s0 }
  0x74   :  { %v8_v16 = vpop.permute.xlu0 %7   ;;  %v20_v17 = vpop.permute.xlu1 %19  }
  0x75   :  { %10 = vst.msk [vmem:[#allocation0] sm:$0x1] %vm9_vm1, %v8_v16  }
  0x78   :  { %v14_v18 = vpop.permute.xlu0 %13   ;;  %v26_v19 = vpop.permute.xlu1 %25  }
  0x79   :  { %16 = vst.msk [vmem:[#allocation0] sm:$0x1] %vm15_vm2, %v14_v18  }
  0x7a   :  { %22 = vst.msk [vmem:[#allocation0] sm:$0x1] %vm21_vm3, %v20_v17  }
  0x7b   :  { %28 = vst.msk [vmem:[#allocation0] sm:$0x1] %vm27_vm4, %v26_v19  }
  0x7c   :  { %v32_v20 = vpop.permute.xlu0 %31   ;;  %v38_v21 = vpop.permute.xlu1 %37  }
  0x7d   :  { %34 = vst.msk [vmem:[#allocation0] sm:$0x1] %vm33_vm5, %v32_v20  }
  0x7e   :  { %40 = vst.msk [vmem:[#allocation0] sm:$0x1] %vm39_vm6, %v38_v21  }
  0x80   :  { %v44_v22 = vpop.permute.xlu0 %43   ;;  %v50_v23 = vpop.permute.xlu1 %49  }
  0x81   :  { %46 = vst.msk [vmem:[#allocation0] sm:$0x1] %vm45_vm7, %v44_v22  }
  0x82   :  { %52 = vst.msk [vmem:[#allocation0] sm:$0x1] %vm51_vm8, %v50_v23  }
  0x84   :  { %v56_v24 = vpop.permute.xlu0 %55   ;;  %v62_v25 = vpop.permute.xlu1 %61  }
  0x85   :  { %58 = vst.msk [vmem:[#allocation0] sm:$0x1] %vm57_vm9, %v56_v24  }
  0x86   :  { %64 = vst.msk [vmem:[#allocation0] sm:$0x1] %vm63_vm10, %v62_v25  }
  0x88   :  { %v68_v26 = vpop.permute.xlu0 %67   ;;  %v74_v27 = vpop.permute.xlu1 %73  }
  0x89   :  { %70 = vst.msk [vmem:[#allocation0] sm:$0x1] %vm69_vm11, %v68_v26  }
  0x8a   :  { %76 = vst.msk [vmem:[#allocation0] sm:$0x1] %vm75_vm12, %v74_v27  }
  0x8c   :  { %v80_v28 = vpop.permute.xlu0 %79   ;;  %v86_v29 = vpop.permute.xlu1 %85  }
  0x8d   :  { %82 = vst.msk [vmem:[#allocation0] sm:$0x1] %vm81_vm13, %v80_v28  }
  0x8e   :  { %88 = vst.msk [vmem:[#allocation0] sm:$0x1] %vm87_vm14, %v86_v29  }
  0x90   :  { %v92_v30 = vpop.permute.xlu0 %91  }
  0x91   :  { %94 = vst.msk [vmem:[#allocation0] sm:$0x1] %vm93_vm15, %v92_v30  }
  0x98   :  { %v99_v31 = vld [vmem:[#allocation0] sm:$0x1] }
  0x99   :  { %102 = vst [vmem:[%s210_s1] sm:$0x1] %v99_v31 }

// kernel: downsample_forward.3
= control target key start
LH: loop header
LB: loop body
LE: loop exit
PB: predicated region body
PF: predicated region fallthrough
CT: control target
= control target key end

     0   :  { %s479_s15 = smov 0   ;;  %s530_s0 = inlined_call_operand.vmem [shape: f32[2,8,2,128], index: 0, kind: input, shape index: {}]   ;;  %s531_s1 = inlined_call_operand.vmem [shape: f32[1,1,128], index: 1, kind: input, shape index: {}]   ;;  %s532_s2 = inlined_call_operand.vmem [shape: f32[1,1,128], index: 2, kind: input, shape index: {}]   ;;  %s533_s3 = inlined_call_operand.vmem [shape: f32[2,8,2,128], index: 3, kind: output, shape index: {0}]   ;;  %s534_s4 = inlined_call_operand.vmem [shape: f32[2,8,128], index: 4, kind: output, shape index: {1}]  }
   0x1 LB: > { %s422_s16 = sadd.s32 4294967295, %s452_s15   ;;  %p426_p0 = scmp.ge.s32.totalorder %s452_s15, 1  ;;  %s452_s15 = sphi %s479_s15, %s15_s15  }
   0x2   : > { %p165_p1 = scmp.lt.s32.totalorder %s452_s15, 3 }
   0x4   : > { %p166_p2 = pnand %p426_p0, %p165_p1 }
   0x5   : > { %p195_p3 = scmp.lt.s32.totalorder (!%p166_p2), %s422_s16, 1 }
   0x6   : > { %169 = sbr.rel (%p166_p2) target bundleno = 40 (0x28), region = 32 }
   0xb   : > { %s536_s16 = smov (!%p195_p3, %s422_s16), 1  ;;  %v432_v0 = vld [vmem:[%s531_s1] ss:$0 sm:$0xff]  ;;  %vm255_vm0 = vcmask 1041408   ;;  %vm320_vm1 = vcmask 1041409   ;;  %vm322_vm2 = vcmask 1042434  }
   0xc   : > { %s436_s17 = sshll.u32 %s536_s16, 4  ;;  %v433_v1 = vld [vmem:[%s532_s2] ss:$0 sm:$0xff]  ;;  %vm324_vm3 = vcmask 1043459   ;;  %vm326_vm4 = vcmask 1044484   ;;  %vm328_vm5 = vcmask 1045509  }
   0xd   : > { %s199_s22 = scalar_lea.vmem %s530_s0, %s436_s17  ;;  %s502_s27 = scalar_lea.vmem %s533_s3, %s436_s17  ;;  %vm330_vm6 = vcmask 1046534   ;;  %vm332_vm7 = vcmask 1047559  }
   0xe   : > { %v209_v2 = vld [vmem:[%s199_s22] sm:$0x3]  ;;  %v210_v3 = vld [vmem:[%s199_s22 + $0x2] sm:$0x3]  ;;  %v211_v4 = vld [vmem:[%s199_s22 + $0x4] sm:$0x3] }
   0xf   : > { %v224_v5 = vmul.f32 %v432_v0, %v209_v2  ;;  %v225_v6 = vmul.f32 %v432_v0, %v210_v3  ;;  %v226_v7 = vmul.f32 %v432_v0, %v211_v4  ;;  %v212_v8 = vld [vmem:[%s199_s22 + $0x6] sm:$0x3]  ;;  %v213_v9 = vld [vmem:[%s199_s22 + $0x8] sm:$0x3]  ;;  %v214_v10 = vld [vmem:[%s199_s22 + $0xa] sm:$0x3] }
  0x10   : > { %v227_v11 = vmul.f32 %v432_v0, %v212_v8  ;;  %v228_v12 = vmul.f32 %v432_v0, %v213_v9  ;;  %v229_v13 = vmul.f32 %v432_v0, %v214_v10  ;;  %v215_v14 = vld [vmem:[%s199_s22 + $0xc] sm:$0x3]  ;;  %v216_v15 = vld [vmem:[%s199_s22 + $0xe] sm:$0x3]  ;;  %s431_s28 = sshll.u32 %s536_s16, 3 }
  0x11   : > { %v239_v16 = vadd.f32 %v433_v1, %v224_v5  ;;  %v240_v17 = vadd.f32 %v433_v1, %v225_v6  ;;  %v241_v18 = vadd.f32 %v433_v1, %v226_v7  ;;  %v230_v19 = vmul.f32 %v432_v0, %v215_v14  ;;  %s208_s5 = scalar_lea.vmem %s534_s4, %s431_s28 }
  0x12   : > { %v242_v20 = vadd.f32 %v433_v1, %v227_v11  ;;  %v243_v21 = vadd.f32 %v433_v1, %v228_v12  ;;  %v244_v22 = vadd.f32 %v433_v1, %v229_v13  ;;  %v231_v23 = vmul.f32 %v432_v0, %v216_v15 }
  0x13   : > { %247 = vst [vmem:[%s502_s27] sm:$0x3] %v239_v16  ;;  %v256_v24 = vsel %vm255_vm0, %v239_v16, -inf  ;;  %248 = vst [vmem:[%s502_s27 + $0x2] sm:$0x3] %v240_v17  ;;  %v263_v25 = vsel %vm255_vm0, %v240_v17, -inf  ;;  %v270_v26 = vsel %vm255_vm0, %v241_v18, -inf  ;;  %v245_v27 = vadd.f32 %v433_v1, %v230_v19 }
  0x14   : > { %249 = vst [vmem:[%s502_s27 + $0x4] sm:$0x3] %v241_v18  ;;  %v257_v28 = vrot.slane %v256_v24, 4  ;;  %v264_v29 = vrot.slane %v263_v25, 4  ;;  %v271_v30 = vrot.slane %v270_v26, 4  ;;  %v277_v31 = vsel %vm255_vm0, %v242_v20, -inf }
  0x15   : > { %250 = vst [vmem:[%s502_s27 + $0x6] sm:$0x3] %v242_v20  ;;  %251 = vst [vmem:[%s502_s27 + $0x8] sm:$0x3] %v243_v21  ;;  %v278_v32 = vrot.slane %v277_v31, 4  ;;  %v284_v33 = vsel %vm255_vm0, %v243_v21, -inf  ;;  %v246_v43 = vadd.f32 %v433_v1, %v231_v23 }
  0x16   : > { %252 = vst [vmem:[%s502_s27 + $0xa] sm:$0x3] %v244_v22  ;;  %v291_v34 = vsel %vm255_vm0, %v244_v22, -inf  ;;  %253 = vst [vmem:[%s502_s27 + $0xc] sm:$0x3] %v245_v27  ;;  %v298_v35 = vsel %vm255_vm0, %v245_v27, -inf  ;;  %v258_v36 = vmax.f32 %v256_v24, %v257_v28  ;;  %v265_v37 = vmax.f32 %v263_v25, %v264_v29 }
  0x17   : > { %v272_v38 = vmax.f32 %v270_v26, %v271_v30  ;;  %v285_v39 = vrot.slane %v284_v33, 4  ;;  %v279_v40 = vmax.f32 %v277_v31, %v278_v32  ;;  %v292_v41 = vrot.slane %v291_v34, 4  ;;  %254 = vst [vmem:[%s502_s27 + $0xe] sm:$0x3] %v246_v43 }
  0x18   : > { %v299_v42 = vrot.slane %v298_v35, 4  ;;  %v259_v44 = vrot.slane %v258_v36, 2  ;;  %v266_v45 = vrot.slane %v265_v37, 2  ;;  %v305_v51 = vsel %vm255_vm0, %v246_v43, -inf }
  0x19   : > { %v273_v46 = vrot.slane %v272_v38, 2  ;;  %v286_v47 = vmax.f32 %v284_v33, %v285_v39  ;;  %v280_v48 = vrot.slane %v279_v40, 2  ;;  %v293_v49 = vmax.f32 %v291_v34, %v292_v41 }
  0x1a   : > { %v300_v50 = vmax.f32 %v298_v35, %v299_v42  ;;  %v260_v52 = vmax.f32 %v258_v36, %v259_v44  ;;  %v267_v53 = vmax.f32 %v265_v37, %v266_v45  ;;  %v306_v59 = vrot.slane %v305_v51, 4 }
  0x1b   : > { %v274_v54 = vmax.f32 %v272_v38, %v273_v46  ;;  %v287_v55 = vrot.slane %v286_v47, 2  ;;  %v281_v56 = vmax.f32 %v279_v40, %v280_v48  ;;  %v294_v57 = vrot.slane %v293_v49, 2 }
  0x1c   : > { %v301_v58 = vrot.slane %v300_v50, 2  ;;  %v261_v60 = vrot.slane %v260_v52, 1  ;;  %v268_v61 = vrot.slane %v267_v53, 1  ;;  %v307_v3 = vmax.f32 %v305_v51, %v306_v59 }
  0x1d   : > { %v275_v62 = vrot.slane %v274_v54, 1  ;;  %v288_v63 = vmax.f32 %v286_v47, %v287_v55  ;;  %v282_v0 = vrot.slane %v281_v56, 1  ;;  %v295_v1 = vmax.f32 %v293_v49, %v294_v57 }
  0x1e   : > { %v302_v2 = vmax.f32 %v300_v50, %v301_v58  ;;  %v262_v4 = vmax.f32 %v260_v52, %v261_v60  ;;  %v269_v5 = vmax.f32 %v267_v53, %v268_v61  ;;  %v308_v11 = vrot.slane %v307_v3, 2 }
  0x1f   : > { %v276_v6 = vmax.f32 %v274_v54, %v275_v62  ;;  %v289_v7 = vrot.slane %v288_v63, 1  ;;  %v283_v8 = vmax.f32 %v281_v56, %v282_v0  ;;  %v296_v9 = vrot.slane %v295_v1, 1 }
  0x20   : > { %v303_v10 = vrot.slane %v302_v2, 1  ;;  %v321_v12 = vsel %vm320_vm1, %v269_v5, %v262_v4  ;;  %v309_v15 = vmax.f32 %v307_v3, %v308_v11 }
  0x21   : > { %v290_v13 = vmax.f32 %v288_v63, %v289_v7  ;;  %v297_v14 = vmax.f32 %v295_v1, %v296_v9  ;;  %v323_v17 = vsel %vm322_vm2, %v276_v6, %v321_v12 }
  0x22   : > { %v304_v16 = vmax.f32 %v302_v2, %v303_v10  ;;  %v325_v18 = vsel %vm324_vm3, %v283_v8, %v323_v17  ;;  %v310_v19 = vrot.slane %v309_v15, 1 }
  0x23   : > { %v327_v20 = vsel %vm326_vm4, %v290_v13, %v325_v18 }
  0x24   : > { %v329_v21 = vsel %vm328_vm5, %v297_v14, %v327_v20  ;;  %v311_v22 = vmax.f32 %v309_v15, %v310_v19 }
  0x25   : > { %v331_v23 = vsel %vm330_vm6, %v304_v16, %v329_v21 }
  0x26   : > { %v333_v24 = vsel %vm332_vm7, %v311_v22, %v331_v23 }
  0x27   : > { %335 = vst [vmem:[%s208_s5] sm:$0xff] %v333_v24 }
  0x28 PF: > { %s15_s15 = sadd.s32 1, %s452_s15  }
  0x29   : > { %p12_p4 = scmp.ge.s32.totalorder %s15_s15, 4  }
  0x2b   :  { %14 = sbr.rel (!%p12_p4) target bundleno = 1 (0x1), region = 74 }

// kernel: downsample_forward.2
= control target key start
LH: loop header
LB: loop body
LE: loop exit
PB: predicated region body
PF: predicated region fallthrough
CT: control target
= control target key end

     0   :  { %s9992_s24 = smov 0   ;;  %s13475_s0 = inlined_call_operand.vmem [shape: f32[2,16,16,4], index: 0, kind: input, shape index: {}]   ;;  %s13476_s1 = inlined_call_operand.vmem [shape: f32[9,4,8], index: 1, kind: input, shape index: {}]   ;;  %s13477_s2 = inlined_call_operand.vmem [shape: f32[1,8], index: 2, kind: input, shape index: {}]   ;;  %s13478_s3 = inlined_call_operand.vmem [shape: f32[9,8,8], index: 3, kind: input, shape index: {}]   ;;  %s13479_s4 = inlined_call_operand.vmem [shape: f32[1,8], index: 4, kind: input, shape index: {}]   ;;  %s13480_s5 = inlined_call_operand.vmem [shape: f32[2,256,8], index: 5, kind: output, shape index: {0}]   ;;  %s13481_s6 = inlined_call_operand.vmem [shape: f32[2,1,8], index: 6, kind: output, shape index: {1}]   ;;  %s13482_s7 = inlined_call_operand.vmem [shape: f32[2,1,8], index: 7, kind: output, shape index: {2}]  }
   0x1 LB: > { %s7824_s25 = sadd.s32 4294967295, %s9949_s24   ;;  %p7828_p0 = scmp.ge.s32.totalorder %s9949_s24, 1  ;;  %s9949_s24 = sphi %s9992_s24, %s18_s24  }
   0x2   : > { %p242_p1 = scmp.lt.s32.totalorder %s9949_s24, 3 }
   0x4   : > { %p243_p2 = pnand %p7828_p0, %p242_p1 }
   0x6   : > { %246 = sbr.rel (%p243_p2) target bundleno = 1054 (0x41e), region = 40 }
   0xb   : > { %v7833_v0 = vld [vmem:[%s13476_s1 + $0x4] sm:$0xf]  ;;  %vm580_vm0 = vcmask 1043456   ;;  %v449_v1 = vld [vmem:[%s13476_s1] sm:$0xf]  ;;  %vm296_vm1 = vcmask 31744  }
   0xc   : > { %9034 = vmatprep.subr.msk.mxu0 %vm580_vm0, %v7833_v0  ;;  %9084 = vmatprep.subr.msk.mxu1 %vm580_vm0, %v449_v1  ;;  %vm299_vm2 = vcmask 25600   ;;  %v10011_v2 = vld [vmem:[%s13476_s1 + $0x8] sm:$0xf]  ;;  %p10015_p3 = scmp.lt.s32.totalorder %s7824_s25, 1  ;;  %v13483_v3 = vmov 0.0   ;;  %vm3935_vm3 = vcmask 64512  }
   0xd   : > { %9035 = vmatpush3.msk.msra.mxu0 %vm580_vm0, %v7833_v0  ;;  %297 = vst.msk [vmem:[#allocation2] sm:$0xff] %vm296_vm1, %v13483_v3  ;;  %298 = vst.msk [vmem:[#allocation2 + $0x8] sm:$0xff] %vm296_vm1, %v13483_v3  ;;  %9085 = vmatpush3.msk.msra.mxu1 %vm580_vm0, %v449_v1  ;;  %v7934_v4 = vld [vmem:[%s13476_s1 + $0xc] sm:$0xf]  ;;  %v10161_v11 = vld [vmem:[%s13476_s1 + $0x10] sm:$0xf] }
   0xe   : > { %301 = vst.msk [vmem:[#allocation2 + $0x18] sm:$0xff] %vm296_vm1, %v13483_v3  ;;  %302 = vst.msk [vmem:[#allocation2 + $0x20] sm:$0xff] %vm296_vm1, %v13483_v3  ;;  %9134 = vmatprep.subr.msk.mxu0 %vm580_vm0, %v10011_v2  ;;  %s13981_s25 = smov (!%p10015_p3, %s7824_s25), 1  ;;  %9184 = vmatprep.subr.msk.mxu1 %vm580_vm0, %v7934_v4  ;;  %vm3938_vm4 = vcmask 58368   ;;  %vm7615_vm5 = vcmask 57344  }
   0xf   : > { %304 = vst.msk [vmem:[#allocation2 + $0x30] sm:$0xff] %vm296_vm1, %v13483_v3  ;;  %305 = vst.msk [vmem:[#allocation2 + $0x38] sm:$0xff] %vm296_vm1, %v13483_v3  ;;  %s8438_s12 = sshll.u32 %s13981_s25, 8  ;;  %s292_s11 = scalar_lea.vmem %s13481_s6, %s13981_s25 }
  0x10   : > { %307 = vst.msk [vmem:[#allocation2 + $0x48] sm:$0xff] %vm296_vm1, %v13483_v3  ;;  %308 = vst.msk [vmem:[#allocation2 + $0x50] sm:$0xff] %vm296_vm1, %v13483_v3  ;;  %s10147_s15 = scalar_lea.vmem %s13475_s0, %s8438_s12  ;;  %s13241_s9 = scalar_lea.vmem %s13480_s5, %s8438_s12 }
  0x11   : > { %310 = vst.msk [vmem:[#allocation2 + $0x60] sm:$0xff] %vm296_vm1, %v13483_v3  ;;  %311 = vst.msk [vmem:[#allocation2 + $0x68] sm:$0xff] %vm296_vm1, %v13483_v3  ;;  %v352_v5 = vld [vmem:[%s10147_s15] sm:$0xff]  ;;  %v353_v6 = vld [vmem:[%s10147_s15 + $0x8] sm:$0xff] }
  0x12   : > { %313 = vst.msk [vmem:[#allocation2 + $0x78] sm:$0xff] %vm296_vm1, %v13483_v3  ;;  %314 = vst.msk [vmem:[#allocation2 + $0x80] sm:$0xff] %vm296_vm1, %v13483_v3  ;;  %v354_v7 = vld [vmem:[%s10147_s15 + $0x10] sm:$0xff]  ;;  %v355_v8 = vld [vmem:[%s10147_s15 + $0x18] sm:$0xff] }
  0x13   : > { %316 = vst.msk [vmem:[#allocation2 + $0x90] sm:$0xff] %vm296_vm1, %v13483_v3  ;;  %317 = vst.msk [vmem:[#allocation2 + $0x98] sm:$0xff] %vm296_vm1, %v13483_v3  ;;  %v356_v9 = vld [vmem:[%s10147_s15 + $0x20] sm:$0xff]  ;;  %v357_v10 = vld [vmem:[%s10147_s15 + $0x28] sm:$0xff] }
  0x14   : > { %319 = vst.msk [vmem:[#allocation2 + $0xa8] sm:$0xff] %vm296_vm1, %v13483_v3  ;;  %320 = vst.msk [vmem:[#allocation2 + $0xb0] sm:$0xff] %vm296_vm1, %v13483_v3  ;;  %v450_v12 = vld [vmem:[#allocation2 + $0x1] sm:$0xff]  ;;  %v358_v16 = vld [vmem:[%s10147_s15 + $0x30] sm:$0xff] }
  0x15   : > { %322 = vst.msk [vmem:[#allocation2 + $0xc0] sm:$0xff] %vm296_vm1, %v13483_v3  ;;  %323 = vst.msk [vmem:[#allocation2 + $0xc8] sm:$0xff] %vm296_vm1, %v13483_v3  ;;  %v417_v13 = vld [vmem:[#allocation2] sm:$0xff]  ;;  %9036 = vmatprep.mubr.msk.f32.mxu0 %vm296_vm1, %v450_v12  ;;  %v418_v15 = vld [vmem:[#allocation2 + $0x8] sm:$0xff] }
  0x16   : > { %325 = vst.msk [vmem:[#allocation2 + $0xd8] sm:$0xff] %vm296_vm1, %v13483_v3  ;;  %326 = vst.msk [vmem:[#allocation2 + $0xe0] sm:$0xff] %vm296_vm1, %v13483_v3  ;;  %9086 = vmatprep.mubr.msk.f32.mxu1 %vm296_vm1, %v417_v13  ;;  %v359_v17 = vld [vmem:[%s10147_s15 + $0x38] sm:$0xff]  ;;  %v360_v18 = vld [vmem:[%s10147_s15 + $0x40] sm:$0xff] }
  0x17   : > { %328 = vst.msk [vmem:[#allocation2 + $0xf0] sm:$0xff] %vm296_vm1, %v13483_v3  ;;  %329 = vst.msk [vmem:[#allocation2 + $0xf8] sm:$0xff] %vm296_vm1, %v13483_v3  ;;  %9087 = vmatmul.mubr.msk.f32.vlgmr.msra.gmra.mxu1 %vm296_vm1, %v418_v15  ;;  %v361_v19 = vld [vmem:[%s10147_s15 + $0x48] sm:$0xff]  ;;  %v362_v20 = vld [vmem:[%s10147_s15 + $0x50] sm:$0xff] }
  0x18   : > { %331 = vst.msk [vmem:[#allocation2 + $0x108] sm:$0xff] %vm296_vm1, %v13483_v3  ;;  %332 = vst.msk [vmem:[#allocation2 + $0x110] sm:$0xff] %vm296_vm1, %v13483_v3  ;;  %v363_v21 = vld [vmem:[%s10147_s15 + $0x58] sm:$0xff]  ;;  %v364_v22 = vld [vmem:[%s10147_s15 + $0x60] sm:$0xff]  ;;  %9185 = vmatpush3.msk.msra.mxu1 %vm580_vm0, %v7934_v4 }
  0x19   : > { %334 = vst.msk [vmem:[#allocation2 + $0x120] sm:$0xff] %vm296_vm1, %v13483_v3  ;;  %335 = vst.msk [vmem:[#allocation2 + $0x128] sm:$0xff] %vm296_vm1, %v13483_v3  ;;  %v365_v23 = vld [vmem:[%s10147_s15 + $0x68] sm:$0xff]  ;;  %v366_v24 = vld [vmem:[%s10147_s15 + $0x70] sm:$0xff] }
  0x1a   : > { %337 = vst.msk [vmem:[#allocation2 + $0x138] sm:$0xff] %vm296_vm1, %v13483_v3  ;;  %338 = vst.msk [vmem:[#allocation2 + $0x140] sm:$0xff] %vm296_vm1, %v13483_v3  ;;  %v367_v25 = vld [vmem:[%s10147_s15 + $0x78] sm:$0xff]  ;;  %v368_v26 = vld [vmem:[%s10147_s15 + $0x80] sm:$0xff] }
  0x1b   : > { %340 = vst.msk [vmem:[#allocation2 + $0x150] sm:$0xff] %vm296_vm1, %v13483_v3  ;;  %341 = vst.msk [vmem:[#allocation2 + $0x158] sm:$0xff] %vm296_vm1, %v13483_v3  ;;  %v369_v27 = vld [vmem:[%s10147_s15 + $0x88] sm:$0xff]  ;;  %v370_v28 = vld [vmem:[%s10147_s15 + $0x90] sm:$0xff] }
  0x1c   : > { %343 = vst.msk [vmem:[#allocation2 + $0x168] sm:$0xff] %vm296_vm1, %v13483_v3  ;;  %344 = vst.msk [vmem:[#allocation2 + $0x170] sm:$0xff] %vm296_vm1, %v13483_v3  ;;  %v371_v29 = vld [vmem:[%s10147_s15 + $0x98] sm:$0xff]  ;;  %v372_v50 = vld [vmem:[%s10147_s15 + $0xa0] sm:$0xff] }
  0x1d   : > { %346 = vst.msk [vmem:[#allocation2 + $0x180] sm:$0xff] %vm296_vm1, %v13483_v3  ;;  %347 = vst.msk [vmem:[#allocation2 + $0x188] sm:$0xff] %vm296_vm1, %v13483_v3  ;;  %v373_v51 = vld [vmem:[%s10147_s15 + $0xa8] sm:$0xff]  ;;  %v374_v53 = vld [vmem:[%s10147_s15 + $0xb0] sm:$0xff] }
  0x1e   : > { %349 = vst.msk [vmem:[#allocation2 + $0x198] sm:$0xff] %vm296_vm1, %v13483_v3  ;;  %350 = vst.msk [vmem:[#allocation2 + $0x1a0] sm:$0xff] %vm296_vm1, %v13483_v3  ;;  %v375_v54 = vld [vmem:[%s10147_s15 + $0xb8] sm:$0xff]  ;;  %v376_v55 = vld [vmem:[%s10147_s15 + $0xc0] sm:$0xff] }
  0x1f   : > { %300 = vst.msk [vmem:[#allocation2 + $0x10] sm:$0x3] %vm299_vm2, %v13483_v3  ;;  %303 = vst.msk [vmem:[#allocation2 + $0x28] sm:$0x3] %vm299_vm2, %v13483_v3  ;;  %v377_v56 = vld [vmem:[%s10147_s15 + $0xc8] sm:$0xff]  ;;  %v378_v57 = vld [vmem:[%s10147_s15 + $0xd0] sm:$0xff] }
  0x20   : > { %306 = vst.msk [vmem:[#allocation2 + $0x40] sm:$0x3] %vm299_vm2, %v13483_v3  ;;  %309 = vst.msk [vmem:[#allocation2 + $0x58] sm:$0x3] %vm299_vm2, %v13483_v3  ;;  %v379_v58 = vld [vmem:[%s10147_s15 + $0xd8] sm:$0xff]  ;;  %v380_v60 = vld [vmem:[%s10147_s15 + $0xe0] sm:$0xff] }
  0x21   : > { %312 = vst.msk [vmem:[#allocation2 + $0x70] sm:$0x3] %vm299_vm2, %v13483_v3  ;;  %315 = vst.msk [vmem:[#allocation2 + $0x88] sm:$0x3] %vm299_vm2, %v13483_v3  ;;  %v381_v61 = vld [vmem:[%s10147_s15 + $0xe8] sm:$0xff] }
  0x22   : > { %318 = vst.msk [vmem:[#allocation2 + $0xa0] sm:$0x3] %vm299_vm2, %v13483_v3  ;;  %321 = vst.msk [vmem:[#allocation2 + $0xb8] sm:$0x3] %vm299_vm2, %v13483_v3 }
  0x23   : > { %324 = vst.msk [vmem:[#allocation2 + $0xd0] sm:$0x3] %vm299_vm2, %v13483_v3  ;;  %327 = vst.msk [vmem:[#allocation2 + $0xe8] sm:$0x3] %vm299_vm2, %v13483_v3 }
  0x24   : > { %330 = vst.msk [vmem:[#allocation2 + $0x100] sm:$0x3] %vm299_vm2, %v13483_v3  ;;  %333 = vst.msk [vmem:[#allocation2 + $0x118] sm:$0x3] %vm299_vm2, %v13483_v3 }
  0x25   : > { %336 = vst.msk [vmem:[#allocation2 + $0x130] sm:$0x3] %vm299_vm2, %v13483_v3  ;;  %339 = vst.msk [vmem:[#allocation2 + $0x148] sm:$0x3] %vm299_vm2, %v13483_v3 }
  0x26   : > { %342 = vst.msk [vmem:[#allocation2 + $0x160] sm:$0x3] %vm299_vm2, %v13483_v3  ;;  %345 = vst.msk [vmem:[#allocation2 + $0x178] sm:$0x3] %vm299_vm2, %v13483_v3  ;;  %v451_v14 = vld [vmem:[#allocation2 + $0x9] sm:$0xff] }
  0x27   : > { %348 = vst.msk [vmem:[#allocation2 + $0x190] sm:$0x3] %vm299_vm2, %v13483_v3  ;;  %351 = vst.msk [vmem:[#allocation2 + $0x1a8] sm:$0x3] %vm299_vm2, %v13483_v3  ;;  %9037 = vmatmul.mubr.msk.f32.vlgmr.msra.gmra.mxu0 %vm296_vm1, %v451_v14  ;;  %v1134_v3 = vld [vmem:[#allocation2 + $0xa] sm:$0xff] }
  0x28   : > { %385 = vst.msk [vmem:[#allocation2 + $0x19] sm:$0xff] %vm296_vm1, %v352_v5  ;;  %386 = vst.msk [vmem:[#allocation2 + $0x21] sm:$0xff] %vm296_vm1, %v353_v6  ;;  %9135 = vmatpush3.msk.msra.mxu0 %vm580_vm0, %v10011_v2 }
  0x29   : > { %387 = vst.msk [vmem:[#allocation2 + $0x31] sm:$0xff] %vm296_vm1, %v354_v7  ;;  %388 = vst.msk [vmem:[#allocation2 + $0x39] sm:$0xff] %vm296_vm1, %v355_v8  ;;  %9234 = vmatprep.subr.msk.mxu0 %vm580_vm0, %v10161_v11 }
  0x2a   : > { %389 = vst.msk [vmem:[#allocation2 + $0x49] sm:$0xff] %vm296_vm1, %v356_v9  ;;  %390 = vst.msk [vmem:[#allocation2 + $0x51] sm:$0xff] %vm296_vm1, %v357_v10 }
  0x2b   : > { %391 = vst.msk [vmem:[#allocation2 + $0x61] sm:$0xff] %vm296_vm1, %v358_v16  ;;  %392 = vst.msk [vmem:[#allocation2 + $0x69] sm:$0xff] %vm296_vm1, %v359_v17  ;;  %v382_v16 = vld [vmem:[%s10147_s15 + $0xf0] sm:$0xff] }
  0x2c   : > { %393 = vst.msk [vmem:[#allocation2 + $0x79] sm:$0xff] %vm296_vm1, %v360_v18  ;;  %394 = vst.msk [vmem:[#allocation2 + $0x81] sm:$0xff] %vm296_vm1, %v361_v19  ;;  %v10375_v17 = vld [vmem:[%s13476_s1 + $0x14] sm:$0xf]  ;;  %v383_v18 = vld [vmem:[%s10147_s15 + $0xf8] sm:$0xff]  ;;  %s295_s15 = scalar_lea.vmem %s13482_s7, %s13981_s25 }
  0x2d   : > { %395 = vst.msk [vmem:[#allocation2 + $0x91] sm:$0xff] %vm296_vm1, %v362_v20  ;;  %396 = vst.msk [vmem:[#allocation2 + $0x99] sm:$0xff] %vm296_vm1, %v363_v21  ;;  %9284 = vmatprep.subr.msk.mxu1 %vm580_vm0, %v10375_v17 }
  0x2e   : > { %397 = vst.msk [vmem:[#allocation2 + $0xa9] sm:$0xff] %vm296_vm1, %v364_v22  ;;  %398 = vst.msk [vmem:[#allocation2 + $0xb1] sm:$0xff] %vm296_vm1, %v365_v23 }
  0x2f   : > { %399 = vst.msk [vmem:[#allocation2 + $0xc1] sm:$0xff] %vm296_vm1, %v366_v24  ;;  %400 = vst.msk [vmem:[#allocation2 + $0xc9] sm:$0xff] %vm296_vm1, %v367_v25  ;;  %v10200_v30 = vld [vmem:[#allocation2 + $0x19] sm:$0xff]  ;;  %v10204_v32 = vld [vmem:[#allocation2 + $0x21] sm:$0xff] }
  0x30   : > { %401 = vst.msk [vmem:[#allocation2 + $0xd9] sm:$0xff] %vm296_vm1, %v368_v26  ;;  %v10202_v31 = vld [vmem:[#allocation2 + $0x18] sm:$0xff]  ;;  %402 = vst.msk [vmem:[#allocation2 + $0xe1] sm:$0xff] %vm296_vm1, %v369_v27  ;;  %9039 = vmatprep.mubr.msk.f32.mxu0 %vm296_vm1, %v10200_v30  ;;  %v10213_v33 = vld [vmem:[#allocation2 + $0x20] sm:$0xff] }
  0x31   : > { %403 = vst.msk [vmem:[#allocation2 + $0xf1] sm:$0xff] %vm296_vm1, %v370_v28  ;;  %404 = vst.msk [vmem:[#allocation2 + $0xf9] sm:$0xff] %vm296_vm1, %v371_v29  ;;  %9089 = vmatprep.mubr.msk.f32.mxu1 %vm296_vm1, %v10202_v31  ;;  %v10215_v34 = vld [vmem:[#allocation2 + $0x31] sm:$0xff]  ;;  %9040 = vmatmul.mubr.msk.f32.gmra.mxu0 %vm296_vm1, %v10204_v32  ;;  %v10227_v36 = vld [vmem:[#allocation2 + $0x39] sm:$0xff] }
  0x32   : > { %v10217_v35 = vld [vmem:[#allocation2 + $0x30] sm:$0xff]  ;;  %9090 = vmatmul.mubr.msk.f32.gmra.mxu1 %vm296_vm1, %v10213_v33  ;;  %9042 = vmatprep.mubr.msk.f32.mxu0 %vm296_vm1, %v10215_v34  ;;  %v10229_v37 = vld [vmem:[#allocation2 + $0x38] sm:$0xff]  ;;  %v10233_v39 = vld [vmem:[#allocation2 + $0x48] sm:$0xff]  ;;  %405 = vst.msk [vmem:[#allocation2 + $0x109] sm:$0xff] %vm296_vm1, %v372_v50 }
  0x33   : > { %13551 = vst [vmem:[#allocation4_spill] sm:$0xff] %v10217_v35  ;;  %9092 = vmatprep.mubr.msk.f32.mxu1 %vm296_vm1, %v10217_v35  ;;  %13552 = vst [vmem:[#allocation5_spill] sm:$0xff] %v10229_v37  ;;  %v10231_v38 = vld [vmem:[#allocation2 + $0x49] sm:$0xff]  ;;  %v10243_v40 = vld [vmem:[#allocation2 + $0x51] sm:$0xff] }
  0x34   : > { %13553 = vst [vmem:[#allocation6_spill] sm:$0xff] %v10233_v39  ;;  %v10245_v41 = vld [vmem:[#allocation2 + $0x50] sm:$0xff]  ;;  %v10247_v42 = vld [vmem:[#allocation2 + $0x61] sm:$0xff]  ;;  %v10263_v46 = vld [vmem:[#allocation2 + $0x79] sm:$0xff] }
  0x35   : > { %9043 = vmatmul.mubr.msk.f32.gmra.mxu0 %vm296_vm1, %v10227_v36  ;;  %13554 = vst [vmem:[#allocation7_spill] sm:$0xff] %v10245_v41  ;;  %v10249_v43 = vld [vmem:[#allocation2 + $0x60] sm:$0xff]  ;;  %v10259_v44 = vld [vmem:[#allocation2 + $0x69] sm:$0xff]  ;;  %v10265_v47 = vld [vmem:[#allocation2 + $0x78] sm:$0xff] }
  0x36   : > { %9093 = vmatmul.mubr.msk.f32.gmra.mxu1 %vm296_vm1, %v10229_v37  ;;  %9045 = vmatprep.mubr.msk.f32.mxu0 %vm296_vm1, %v10231_v38  ;;  %13555 = vst [vmem:[#allocation8_spill] sm:$0xff] %v10249_v43  ;;  %v10261_v45 = vld [vmem:[#allocation2 + $0x68] sm:$0xff]  ;;  %13557 = vst [vmem:[#allocation10_spill] sm:$0xff] %v10265_v47  ;;  %v10269_v49 = vld [vmem:[#allocation2 + $0x80] sm:$0xff] }
  0x37   : > { %9095 = vmatprep.mubr.msk.f32.mxu1 %vm296_vm1, %v10233_v39  ;;  %13556 = vst [vmem:[#allocation9_spill] sm:$0xff] %v10261_v45  ;;  %v10267_v48 = vld [vmem:[#allocation2 + $0x81] sm:$0xff]  ;;  %13558 = vst [vmem:[#allocation11_spill] sm:$0xff] %v10269_v49  ;;  %v10277_v52 = vld [vmem:[#allocation2 + $0x91] sm:$0xff] }
  0x38   : > { %406 = vst.msk [vmem:[#allocation2 + $0x111] sm:$0xff] %vm296_vm1, %v373_v51  ;;  %407 = vst.msk [vmem:[#allocation2 + $0x121] sm:$0xff] %vm296_vm1, %v374_v53  ;;  %v10294_v59 = vld [vmem:[#allocation2 + $0x90] sm:$0xff]  ;;  %v10311_v62 = vld [vmem:[#allocation2 + $0x99] sm:$0xff] }
  0x39   : > { %9046 = vmatmul.mubr.msk.f32.gmra.mxu0 %vm296_vm1, %v10243_v40  ;;  %408 = vst.msk [vmem:[#allocation2 + $0x129] sm:$0xff] %vm296_vm1, %v375_v54  ;;  %409 = vst.msk [vmem:[#allocation2 + $0x139] sm:$0xff] %vm296_vm1, %v376_v55  ;;  %v10313_v63 = vld [vmem:[#allocation2 + $0x98] sm:$0xff]  ;;  %v10315_v0 = vld [vmem:[#allocation2 + $0xa9] sm:$0xff] }
  0x3a   : > { %9096 = vmatmul.mubr.msk.f32.gmra.mxu1 %vm296_vm1, %v10245_v41  ;;  %9048 = vmatprep.mubr.msk.f32.mxu0 %vm296_vm1, %v10247_v42  ;;  %13559 = vst [vmem:[#allocation12_spill] sm:$0xff] %v10294_v59  ;;  %410 = vst.msk [vmem:[#allocation2 + $0x141] sm:$0xff] %vm296_vm1, %v377_v56  ;;  %v10317_v1 = vld [vmem:[#allocation2 + $0xa8] sm:$0xff]  ;;  %v10327_v2 = vld [vmem:[#allocation2 + $0xb1] sm:$0xff] }
  0x3b   : > { %9098 = vmatprep.mubr.msk.f32.mxu1 %vm296_vm1, %v10249_v43  ;;  %411 = vst.msk [vmem:[#allocation2 + $0x151] sm:$0xff] %vm296_vm1, %v378_v57  ;;  %412 = vst.msk [vmem:[#allocation2 + $0x159] sm:$0xff] %vm296_vm1, %v379_v58  ;;  %v10329_v4 = vld [vmem:[#allocation2 + $0xb0] sm:$0xff]  ;;  %v10331_v5 = vld [vmem:[#allocation2 + $0xc1] sm:$0xff] }
  0x3c   : > { %413 = vst.msk [vmem:[#allocation2 + $0x169] sm:$0xff] %vm296_vm1, %v380_v60  ;;  %414 = vst.msk [vmem:[#allocation2 + $0x171] sm:$0xff] %vm296_vm1, %v381_v61  ;;  %v10333_v6 = vld [vmem:[#allocation2 + $0xc0] sm:$0xff]  ;;  %v10343_v7 = vld [vmem:[#allocation2 + $0xc9] sm:$0xff] }
  0x3d   : > { %9049 = vmatmul.mubr.msk.f32.gmra.mxu0 %vm296_vm1, %v10259_v44  ;;  %13560 = vst [vmem:[#allocation13_spill] sm:$0xff] %v10313_v63  ;;  %13561 = vst [vmem:[#allocation14_spill] sm:$0xff] %v10317_v1  ;;  %v10345_v8 = vld [vmem:[#allocation2 + $0xc8] sm:$0xff]  ;;  %v10347_v9 = vld [vmem:[#allocation2 + $0xd9] sm:$0xff] }
  0x3e   : > { %9099 = vmatmul.mubr.msk.f32.gmra.mxu1 %vm296_vm1, %v10261_v45  ;;  %9051 = vmatprep.mubr.msk.f32.mxu0 %vm296_vm1, %v10263_v46  ;;  %13562 = vst [vmem:[#allocation15_spill] sm:$0xff] %v10329_v4  ;;  %13563 = vst [vmem:[#allocation16_spill] sm:$0xff] %v10333_v6  ;;  %v10349_v10 = vld [vmem:[#allocation2 + $0xd8] sm:$0xff]  ;;  %v10359_v12 = vld [vmem:[#allocation2 + $0xe1] sm:$0xff] }
  0x3f   : > { %9101 = vmatprep.mubr.msk.f32.mxu1 %vm296_vm1, %v10265_v47  ;;  %13564 = vst [vmem:[#allocation17_spill] sm:$0xff] %v10345_v8  ;;  %13565 = vst [vmem:[#allocation18_spill] sm:$0xff] %v10349_v10  ;;  %v10361_v13 = vld [vmem:[#allocation2 + $0xe0] sm:$0xff]  ;;  %v10363_v14 = vld [vmem:[#allocation2 + $0xf1] sm:$0xff] }
  0x40   : > { %13566 = vst [vmem:[#allocation19_spill] sm:$0xff] %v10361_v13  ;;  %v10365_v15 = vld [vmem:[#allocation2 + $0xf0] sm:$0xff]  ;;  %v10382_v19 = vld [vmem:[#allocation2 + $0xf9] sm:$0xff]  ;;  %415 = vst.msk [vmem:[#allocation2 + $0x181] sm:$0xff] %vm296_vm1, %v382_v16 }
  0x41   : > { %9052 = vmatmul.mubr.msk.f32.gmra.mxu0 %vm296_vm1, %v10267_v48  ;;  %13567 = vst [vmem:[#allocation20_spill] sm:$0xff] %v10365_v15  ;;  %v10384_v20 = vld [vmem:[#allocation2 + $0xf8] sm:$0xff]  ;;  %416 = vst.msk [vmem:[#allocation2 + $0x189] sm:$0xff] %vm296_vm1, %v383_v18  ;;  %v10388_v21 = vld [vmem:[#allocation2 + $0x109] sm:$0xff] }
  0x42   : > { %9102 = vmatmul.mubr.msk.f32.gmra.mxu1 %vm296_vm1, %v10269_v49  ;;  %9054 = vmatprep.mubr.msk.f32.mxu0 %vm296_vm1, %v10277_v52  ;;  %13568 = vst [vmem:[#allocation21_spill] sm:$0xff] %v10384_v20  ;;  %v10390_v22 = vld [vmem:[#allocation2 + $0x108] sm:$0xff]  ;;  %v10402_v23 = vld [vmem:[#allocation2 + $0x111] sm:$0xff]  ;;  %v10408_v26 = vld [vmem:[#allocation2 + $0x120] sm:$0xff] }
  0x43   : > { %9104 = vmatprep.mubr.msk.f32.mxu1 %vm296_vm1, %v10294_v59  ;;  %13569 = vst [vmem:[#allocation22_spill] sm:$0xff] %v10390_v22  ;;  %v10404_v24 = vld [vmem:[#allocation2 + $0x110] sm:$0xff]  ;;  %v10406_v25 = vld [vmem:[#allocation2 + $0x121] sm:$0xff]  ;;  %13571 = vst [vmem:[#allocation24_spill] sm:$0xff] %v10408_v26 }
  0x44   : > { %13570 = vst [vmem:[#allocation23_spill] sm:$0xff] %v10404_v24  ;;  %v10418_v27 = vld [vmem:[#allocation2 + $0x129] sm:$0xff]  ;;  %v10422_v29 = vld [vmem:[#allocation2 + $0x139] sm:$0xff]  ;;  %v10434_v51 = vld [vmem:[#allocation2 + $0x141] sm:$0xff] }
  0x45   : > { %9055 = vmatmul.mubr.msk.f32.gmra.mxu0 %vm296_vm1, %v10311_v62  ;;  %v10420_v28 = vld [vmem:[#allocation2 + $0x128] sm:$0xff]  ;;  %v10424_v50 = vld [vmem:[#allocation2 + $0x138] sm:$0xff]  ;;  %v10436_v53 = vld [vmem:[#allocation2 + $0x140] sm:$0xff] }
  0x46   : > { %9105 = vmatmul.mubr.msk.f32.gmra.mxu1 %vm296_vm1, %v10313_v63  ;;  %9057 = vmatprep.mubr.msk.f32.mxu0 %vm296_vm1, %v10315_v0  ;;  %13572 = vst [vmem:[#allocation25_spill] sm:$0xff] %v10420_v28  ;;  %13573 = vst [vmem:[#allocation26_spill] sm:$0xff] %v10424_v50  ;;  %v10438_v54 = vld [vmem:[#allocation2 + $0x151] sm:$0xff]  ;;  %v10450_v56 = vld [vmem:[#allocation2 + $0x159] sm:$0xff] }
  0x47   : > { %9107 = vmatprep.mubr.msk.f32.mxu1 %vm296_vm1, %v10317_v1  ;;  %13574 = vst [vmem:[#allocation27_spill] sm:$0xff] %v10436_v53  ;;  %v10440_v55 = vld [vmem:[#allocation2 + $0x150] sm:$0xff]  ;;  %v10452_v57 = vld [vmem:[#allocation2 + $0x158] sm:$0xff]  ;;  %v10456_v60 = vld [vmem:[#allocation2 + $0x168] sm:$0xff] }
  0x48   : > { %13575 = vst [vmem:[#allocation28_spill] sm:$0xff] %v10440_v55  ;;  %13576 = vst [vmem:[#allocation29_spill] sm:$0xff] %v10452_v57  ;;  %v10454_v58 = vld [vmem:[#allocation2 + $0x169] sm:$0xff]  ;;  %v10466_v61 = vld [vmem:[#allocation2 + $0x171] sm:$0xff] }
  0x49   : > { %9058 = vmatmul.mubr.msk.f32.gmra.mxu0 %vm296_vm1, %v10327_v2  ;;  %13577 = vst [vmem:[#allocation30_spill] sm:$0xff] %v10454_v58  ;;  %13578 = vst [vmem:[#allocation31_spill] sm:$0xff] %v10466_v61  ;;  %v10468_v16 = vld [vmem:[#allocation2 + $0x170] sm:$0xff]  ;;  %v1133_v18 = vld [vmem:[#allocation2 + $0x2] sm:$0xff] }
  0x4a   : > { %9108 = vmatmul.mubr.msk.f32.gmra.mxu1 %vm296_vm1, %v10329_v4  ;;  %9060 = vmatprep.mubr.msk.f32.mxu0 %vm296_vm1, %v10331_v5 }
  0x4b   : > { %9110 = vmatprep.mubr.msk.f32.mxu1 %vm296_vm1, %v10333_v6 }
  0x4d   : > { %9061 = vmatmul.mubr.msk.f32.gmra.mxu0 %vm296_vm1, %v10343_v7 }
  0x4e   : > { %9111 = vmatmul.mubr.msk.f32.gmra.mxu1 %vm296_vm1, %v10345_v8  ;;  %9063 = vmatprep.mubr.msk.f32.mxu0 %vm296_vm1, %v10347_v9 }
  0x4f   : > { %9113 = vmatprep.mubr.msk.f32.mxu1 %vm296_vm1, %v10349_v10 }
  0x51   : > { %9064 = vmatmul.mubr.msk.f32.gmra.mxu0 %vm296_vm1, %v10359_v12 }
  0x52   : > { %9114 = vmatmul.mubr.msk.f32.gmra.mxu1 %vm296_vm1, %v10361_v13  ;;  %9066 = vmatprep.mubr.msk.f32.mxu0 %vm296_vm1, %v10363_v14 }
  0x53   : > { %9116 = vmatprep.mubr.msk.f32.mxu1 %vm296_vm1, %v10365_v15 }
  0x55   : > { %9067 = vmatmul.mubr.msk.f32.gmra.mxu0 %vm296_vm1, %v10382_v19 }
  0x56   : > { %9117 = vmatmul.mubr.msk.f32.gmra.mxu1 %vm296_vm1, %v10384_v20  ;;  %9069 = vmatprep.mubr.msk.f32.mxu0 %vm296_vm1, %v10388_v21 }
  0x57   : > { %9119 = vmatprep.mubr.msk.f32.mxu1 %vm296_vm1, %v10390_v22 }
  0x59   : > { %9070 = vmatmul.mubr.msk.f32.gmra.mxu0 %vm296_vm1, %v10402_v23 }
  0x5a   : > { %9120 = vmatmul.mubr.msk.f32.gmra.mxu1 %vm296_vm1, %v10404_v24  ;;  %9072 = vmatprep.mubr.msk.f32.mxu0 %vm296_vm1, %v10406_v25 }
  0x5b   : > { %9122 = vmatprep.mubr.msk.f32.mxu1 %vm296_vm1, %v10408_v26 }
  0x5d   : > { %9073 = vmatmul.mubr.msk.f32.gmra.mxu0 %vm296_vm1, %v10418_v27 }
  0x5e   : > { %9123 = vmatmul.mubr.msk.f32.gmra.mxu1 %vm296_vm1, %v10420_v28  ;;  %9075 = vmatprep.mubr.msk.f32.mxu0 %vm296_vm1, %v10422_v29 }
  0x5f   : > { %9125 = vmatprep.mubr.msk.f32.mxu1 %vm296_vm1, %v10424_v50 }
  0x61   : > { %9076 = vmatmul.mubr.msk.f32.gmra.mxu0 %vm296_vm1, %v10434_v51 }
  0x62   : > { %9126 = vmatmul.mubr.msk.f32.gmra.mxu1 %vm296_vm1, %v10436_v53  ;;  %9078 = vmatprep.mubr.msk.f32.mxu0 %vm296_vm1, %v10438_v54 }
  0x63   : > { %9128 = vmatprep.mubr.msk.f32.mxu1 %vm296_vm1, %v10440_v55 }
  0x65   : > { %9079 = vmatmul.mubr.msk.f32.gmra.mxu0 %vm296_vm1, %v10450_v56 }
  0x66   : > { %9129 = vmatmul.mubr.msk.f32.gmra.mxu1 %vm296_vm1, %v10452_v57  ;;  %9081 = vmatprep.mubr.msk.f32.mxu0 %vm296_vm1, %v10454_v58  ;;  %v10477_v58 = vld [vmem:[#allocation2 + $0x1a] sm:$0xff] }
  0x67   : > { %9131 = vmatprep.mubr.msk.f32.mxu1 %vm296_vm1, %v10456_v60 }
  0x69   : > { %9082 = vmatmul.mubr.msk.f32.gmra.mxu0 %vm296_vm1, %v10466_v61  ;;  %v10485_v61 = vld [vmem:[%s13476_s1 + $0x18] sm:$0xf] }
  0x6a   : > { %9132 = vmatmul.mubr.msk.f32.gmra.mxu1 %vm296_vm1, %v10468_v16  ;;  %9136 = vmatprep.mubr.msk.f32.mxu0 %vm296_vm1, %v1133_v18  ;;  %v10490_v18 = vld [vmem:[%s13476_s1 + $0x1c] sm:$0xf] }
  0x6b   : > { %9186 = vmatprep.mubr.msk.f32.mxu1 %vm296_vm1, %v10202_v31  ;;  %v10500_v31 = vld [vmem:[#allocation2 + $0x32] sm:$0xff] }
  0x6d   : > { %9137 = vmatmul.mubr.msk.f32.vlgmr.msra.gmra.mxu0 %vm296_vm1, %v1134_v3  ;;  %v10496_v3 = vld [vmem:[#allocation2 + $0x22] sm:$0xff] }
  0x6e   : > { %9187 = vmatmul.mubr.msk.f32.vlgmr.msra.gmra.mxu1 %vm296_vm1, %v10213_v33  ;;  %9235 = vmatpush3.msk.msra.mxu0 %vm580_vm0, %v10161_v11  ;;  %v10514_v11 = vld [vmem:[#allocation2 + $0x3a] sm:$0xff]  ;;  %v10518_v33 = vld [vmem:[#allocation2 + $0x4a] sm:$0xff] }
  0x6f   : > { %9139 = vmatprep.mubr.msk.f32.mxu0 %vm296_vm1, %v10477_v58  ;;  %9189 = vmatprep.mubr.msk.f32.mxu1 %vm296_vm1, %v10217_v35  ;;  %v10664_v35 = vld [vmem:[#allocation2 + $0x180] sm:$0xff] }
  0x70   : > { %9285 = vmatpush3.msk.msra.mxu1 %vm580_vm0, %v10375_v17  ;;  %9334 = vmatprep.subr.msk.mxu0 %vm580_vm0, %v10485_v61  ;;  %v10526_v17 = vld [vmem:[#allocation2 + $0x52] sm:$0xff]  ;;  %13579 = vst [vmem:[#allocation32_spill] sm:$0xff] %v10664_v35 }
  0x71   : > { %9384 = vmatprep.subr.msk.mxu1 %vm580_vm0, %v10490_v18  ;;  %9140 = vmatmul.mubr.msk.f32.gmra.mxu0 %vm296_vm1, %v10496_v3 }
  0x72   : > { %9190 = vmatmul.mubr.msk.f32.gmra.mxu1 %vm296_vm1, %v10229_v37  ;;  %9142 = vmatprep.mubr.msk.f32.mxu0 %vm296_vm1, %v10500_v31  ;;  %v10530_v37 = vld [vmem:[#allocation2 + $0x62] sm:$0xff] }
  0x73   : > { %9192 = vmatprep.mubr.msk.f32.mxu1 %vm296_vm1, %v10233_v39  ;;  %v10542_v39 = vld [vmem:[#allocation2 + $0x7a] sm:$0xff] }
  0x75   : > { %9143 = vmatmul.mubr.msk.f32.gmra.mxu0 %vm296_vm1, %v10514_v11 }
  0x76   : > { %9193 = vmatmul.mubr.msk.f32.gmra.mxu1 %vm296_vm1, %v10245_v41  ;;  %9145 = vmatprep.mubr.msk.f32.mxu0 %vm296_vm1, %v10518_v33  ;;  %v10538_v41 = vld [vmem:[#allocation2 + $0x6a] sm:$0xff] }
  0x77   : > { %9195 = vmatprep.mubr.msk.f32.mxu1 %vm296_vm1, %v10249_v43  ;;  %v10554_v43 = vld [vmem:[#allocation2 + $0x92] sm:$0xff] }
  0x79   : > { %9146 = vmatmul.mubr.msk.f32.gmra.mxu0 %vm296_vm1, %v10526_v17 }
  0x7a   : > { %9196 = vmatmul.mubr.msk.f32.gmra.mxu1 %vm296_vm1, %v10261_v45  ;;  %9148 = vmatprep.mubr.msk.f32.mxu0 %vm296_vm1, %v10530_v37  ;;  %v10550_v45 = vld [vmem:[#allocation2 + $0x82] sm:$0xff] }
  0x7b   : > { %9198 = vmatprep.mubr.msk.f32.mxu1 %vm296_vm1, %v10265_v47  ;;  %v10566_v47 = vld [vmem:[#allocation2 + $0xaa] sm:$0xff] }
  0x7d   : > { %9149 = vmatmul.mubr.msk.f32.gmra.mxu0 %vm296_vm1, %v10538_v41 }
  0x7e   : > { %9199 = vmatmul.mubr.msk.f32.gmra.mxu1 %vm296_vm1, %v10269_v49  ;;  %9151 = vmatprep.mubr.msk.f32.mxu0 %vm296_vm1, %v10542_v39  ;;  %v10562_v49 = vld [vmem:[#allocation2 + $0x9a] sm:$0xff] }
  0x7f   : > { %9201 = vmatprep.mubr.msk.f32.mxu1 %vm296_vm1, %v10294_v59  ;;  %v10578_v59 = vld [vmem:[#allocation2 + $0xc2] sm:$0xff] }
  0x81   : > { %9152 = vmatmul.mubr.msk.f32.gmra.mxu0 %vm296_vm1, %v10550_v45 }
  0x82   : > { %9202 = vmatmul.mubr.msk.f32.gmra.mxu1 %vm296_vm1, %v10313_v63  ;;  %9154 = vmatprep.mubr.msk.f32.mxu0 %vm296_vm1, %v10554_v43  ;;  %v10574_v63 = vld [vmem:[#allocation2 + $0xb2] sm:$0xff] }
  0x83   : > { %9204 = vmatprep.mubr.msk.f32.mxu1 %vm296_vm1, %v10317_v1  ;;  %v10590_v1 = vld [vmem:[#allocation2 + $0xda] sm:$0xff] }
  0x85   : > { %9155 = vmatmul.mubr.msk.f32.gmra.mxu0 %vm296_vm1, %v10562_v49 }
  0x86   : > { %9205 = vmatmul.mubr.msk.f32.gmra.mxu1 %vm296_vm1, %v10329_v4  ;;  %9157 = vmatprep.mubr.msk.f32.mxu0 %vm296_vm1, %v10566_v47  ;;  %v10586_v4 = vld [vmem:[#allocation2 + $0xca] sm:$0xff] }
  0x87   : > { %9207 = vmatprep.mubr.msk.f32.mxu1 %vm296_vm1, %v10333_v6  ;;  %v10602_v6 = vld [vmem:[#allocation2 + $0xf2] sm:$0xff] }
  0x89   : > { %9158 = vmatmul.mubr.msk.f32.gmra.mxu0 %vm296_vm1, %v10574_v63 }
  0x8a   : > { %9208 = vmatmul.mubr.msk.f32.gmra.mxu1 %vm296_vm1, %v10345_v8  ;;  %9160 = vmatprep.mubr.msk.f32.mxu0 %vm296_vm1, %v10578_v59  ;;  %v10598_v8 = vld [vmem:[#allocation2 + $0xe2] sm:$0xff] }
  0x8b   : > { %9210 = vmatprep.mubr.msk.f32.mxu1 %vm296_vm1, %v10349_v10  ;;  %v10614_v10 = vld [vmem:[#allocation2 + $0x10a] sm:$0xff] }
  0x8d   : > { %9161 = vmatmul.mubr.msk.f32.gmra.mxu0 %vm296_vm1, %v10586_v4 }
  0x8e   : > { %9211 = vmatmul.mubr.msk.f32.gmra.mxu1 %vm296_vm1, %v10361_v13  ;;  %9163 = vmatprep.mubr.msk.f32.mxu0 %vm296_vm1, %v10590_v1  ;;  %v10610_v13 = vld [vmem:[#allocation2 + $0xfa] sm:$0xff] }
  0x8f   : > { %9213 = vmatprep.mubr.msk.f32.mxu1 %vm296_vm1, %v10365_v15  ;;  %v10626_v15 = vld [vmem:[#allocation2 + $0x122] sm:$0xff] }
  0x91   : > { %9164 = vmatmul.mubr.msk.f32.gmra.mxu0 %vm296_vm1, %v10598_v8 }
  0x92   : > { %9214 = vmatmul.mubr.msk.f32.gmra.mxu1 %vm296_vm1, %v10384_v20  ;;  %9166 = vmatprep.mubr.msk.f32.mxu0 %vm296_vm1, %v10602_v6  ;;  %v10622_v20 = vld [vmem:[#allocation2 + $0x112] sm:$0xff] }
  0x93   : > { %9216 = vmatprep.mubr.msk.f32.mxu1 %vm296_vm1, %v10390_v22  ;;  %v10638_v22 = vld [vmem:[#allocation2 + $0x13a] sm:$0xff] }
  0x95   : > { %9167 = vmatmul.mubr.msk.f32.gmra.mxu0 %vm296_vm1, %v10610_v13 }
  0x96   : > { %9217 = vmatmul.mubr.msk.f32.gmra.mxu1 %vm296_vm1, %v10404_v24  ;;  %9169 = vmatprep.mubr.msk.f32.mxu0 %vm296_vm1, %v10614_v10  ;;  %v10634_v24 = vld [vmem:[#allocation2 + $0x12a] sm:$0xff] }
  0x97   : > { %9219 = vmatprep.mubr.msk.f32.mxu1 %vm296_vm1, %v10408_v26  ;;  %v10650_v26 = vld [vmem:[#allocation2 + $0x152] sm:$0xff] }
  0x99   : > { %9170 = vmatmul.mubr.msk.f32.gmra.mxu0 %vm296_vm1, %v10622_v20 }
  0x9a   : > { %9220 = vmatmul.mubr.msk.f32.gmra.mxu1 %vm296_vm1, %v10420_v28  ;;  %9172 = vmatprep.mubr.msk.f32.mxu0 %vm296_vm1, %v10626_v15  ;;  %v10646_v28 = vld [vmem:[#allocation2 + $0x142] sm:$0xff] }
  0x9b   : > { %9222 = vmatprep.mubr.msk.f32.mxu1 %vm296_vm1, %v10424_v50  ;;  %v10662_v50 = vld [vmem:[#allocation2 + $0x16a] sm:$0xff] }
  0x9d   : > { %9173 = vmatmul.mubr.msk.f32.gmra.mxu0 %vm296_vm1, %v10634_v24 }
  0x9e   : > { %9223 = vmatmul.mubr.msk.f32.gmra.mxu1 %vm296_vm1, %v10436_v53  ;;  %9175 = vmatprep.mubr.msk.f32.mxu0 %vm296_vm1, %v10638_v22  ;;  %v10658_v53 = vld [vmem:[#allocation2 + $0x15a] sm:$0xff] }
  0x9f   : > { %9225 = vmatprep.mubr.msk.f32.mxu1 %vm296_vm1, %v10440_v55  ;;  %v10676_v55 = vld [vmem:[#allocation2 + $0x188] sm:$0xff] }
  0xa1   : > { %9176 = vmatmul.mubr.msk.f32.gmra.mxu0 %vm296_vm1, %v10646_v28 }
  0xa2   : > { %9226 = vmatmul.mubr.msk.f32.gmra.mxu1 %vm296_vm1, %v10452_v57  ;;  %9178 = vmatprep.mubr.msk.f32.mxu0 %vm296_vm1, %v10650_v26  ;;  %v10672_v57 = vld [vmem:[#allocation2 + $0x172] sm:$0xff] }
  0xa3   : > { %9228 = vmatprep.mubr.msk.f32.mxu1 %vm296_vm1, %v10456_v60 }
  0xa5   : > { %9179 = vmatmul.mubr.msk.f32.gmra.mxu0 %vm296_vm1, %v10658_v53 }
  0xa6   : > { %9229 = vmatmul.mubr.msk.f32.gmra.mxu1 %vm296_vm1, %v10468_v16  ;;  %9181 = vmatprep.mubr.msk.f32.mxu0 %vm296_vm1, %v10662_v50 }
  0xa7   : > { %9231 = vmatprep.mubr.msk.f32.mxu1 %vm296_vm1, %v10664_v35  ;;  %v10693_v35 = vld [vmem:[%s13476_s1 + $0x20] sm:$0xf] }
  0xa9   : > { %9182 = vmatmul.mubr.msk.f32.gmra.mxu0 %vm296_vm1, %v10672_v57 }
  0xaa   : > { %9232 = vmatmul.mubr.msk.f32.gmra.mxu1 %vm296_vm1, %v10676_v55  ;;  %9236 = vmatprep.mubr.msk.f32.mxu0 %vm296_vm1, %v10200_v30  ;;  %v13580_v30 = vld [vmem:[#allocation30_spill] sm:$0xff] }
  0xab   : > { %9286 = vmatprep.mubr.msk.f32.mxu1 %vm296_vm1, %v10477_v58 }
  0xad   : > { %9237 = vmatmul.mubr.msk.f32.vlgmr.msra.gmra.mxu0 %vm296_vm1, %v10204_v32  ;;  %v10809_v32 = vld [vmem:[#allocation2 + $0x181] sm:$0xff] }
  0xae   : > { %9287 = vmatmul.mubr.msk.f32.vlgmr.msra.gmra.mxu1 %vm296_vm1, %v10496_v3  ;;  %9335 = vmatpush3.msk.msra.mxu0 %vm580_vm0, %v10485_v61  ;;  %v13584_v61 = vld [vmem:[#allocation6_spill] sm:$0xff]  ;;  %v13585_v3 = vld [vmem:[#allocation7_spill] sm:$0xff] }
  0xaf   : > { %9239 = vmatprep.mubr.msk.f32.mxu0 %vm296_vm1, %v10215_v34  ;;  %9289 = vmatprep.mubr.msk.f32.mxu1 %vm296_vm1, %v10500_v31 }
  0xb0   : > { %9385 = vmatpush3.msk.msra.mxu1 %vm580_vm0, %v10490_v18  ;;  %9434 = vmatprep.subr.msk.mxu0 %vm580_vm0, %v10693_v35 }
  0xb1   : > { %9240 = vmatmul.mubr.msk.f32.gmra.mxu0 %vm296_vm1, %v10227_v36 }
  0xb2   : > { %9290 = vmatmul.mubr.msk.f32.gmra.mxu1 %vm296_vm1, %v10514_v11  ;;  %9242 = vmatprep.mubr.msk.f32.mxu0 %vm296_vm1, %v10231_v38 }
  0xb3   : > { %9292 = vmatprep.mubr.msk.f32.mxu1 %vm296_vm1, %v10518_v33 }
  0xb5   : > { %9243 = vmatmul.mubr.msk.f32.gmra.mxu0 %vm296_vm1, %v10243_v40 }
  0xb6   : > { %9293 = vmatmul.mubr.msk.f32.gmra.mxu1 %vm296_vm1, %v10526_v17  ;;  %9245 = vmatprep.mubr.msk.f32.mxu0 %vm296_vm1, %v10247_v42 }
  0xb7   : > { %9295 = vmatprep.mubr.msk.f32.mxu1 %vm296_vm1, %v10530_v37 }
  0xb9   : > { %9246 = vmatmul.mubr.msk.f32.gmra.mxu0 %vm296_vm1, %v10259_v44 }
  0xba   : > { %9296 = vmatmul.mubr.msk.f32.gmra.mxu1 %vm296_vm1, %v10538_v41  ;;  %9248 = vmatprep.mubr.msk.f32.mxu0 %vm296_vm1, %v10263_v46 }
  0xbb   : > { %9298 = vmatprep.mubr.msk.f32.mxu1 %vm296_vm1, %v10542_v39 }
  0xbd   : > { %9249 = vmatmul.mubr.msk.f32.gmra.mxu0 %vm296_vm1, %v10267_v48 }
  0xbe   : > { %9299 = vmatmul.mubr.msk.f32.gmra.mxu1 %vm296_vm1, %v10550_v45  ;;  %9251 = vmatprep.mubr.msk.f32.mxu0 %vm296_vm1, %v10277_v52 }
  0xbf   : > { %9301 = vmatprep.mubr.msk.f32.mxu1 %vm296_vm1, %v10554_v43 }
  0xc1   : > { %9252 = vmatmul.mubr.msk.f32.gmra.mxu0 %vm296_vm1, %v10311_v62 }
  0xc2   : > { %9302 = vmatmul.mubr.msk.f32.gmra.mxu1 %vm296_vm1, %v10562_v49  ;;  %9254 = vmatprep.mubr.msk.f32.mxu0 %vm296_vm1, %v10315_v0 }
  0xc3   : > { %9304 = vmatprep.mubr.msk.f32.mxu1 %vm296_vm1, %v10566_v47 }
  0xc5   : > { %9255 = vmatmul.mubr.msk.f32.gmra.mxu0 %vm296_vm1, %v10327_v2 }
  0xc6   : > { %9305 = vmatmul.mubr.msk.f32.gmra.mxu1 %vm296_vm1, %v10574_v63  ;;  %9257 = vmatprep.mubr.msk.f32.mxu0 %vm296_vm1, %v10331_v5 }
  0xc7   : > { %9307 = vmatprep.mubr.msk.f32.mxu1 %vm296_vm1, %v10578_v59 }
  0xc9   : > { %9258 = vmatmul.mubr.msk.f32.gmra.mxu0 %vm296_vm1, %v10343_v7 }
  0xca   : > { %9308 = vmatmul.mubr.msk.f32.gmra.mxu1 %vm296_vm1, %v10586_v4  ;;  %9260 = vmatprep.mubr.msk.f32.mxu0 %vm296_vm1, %v10347_v9 }
  0xcb   : > { %9310 = vmatprep.mubr.msk.f32.mxu1 %vm296_vm1, %v10590_v1 }
  0xcd   : > { %9261 = vmatmul.mubr.msk.f32.gmra.mxu0 %vm296_vm1, %v10359_v12 }
  0xce   : > { %9311 = vmatmul.mubr.msk.f32.gmra.mxu1 %vm296_vm1, %v10598_v8  ;;  %9263 = vmatprep.mubr.msk.f32.mxu0 %vm296_vm1, %v10363_v14 }
  0xcf   : > { %9313 = vmatprep.mubr.msk.f32.mxu1 %vm296_vm1, %v10602_v6 }
  0xd1   : > { %9264 = vmatmul.mubr.msk.f32.gmra.mxu0 %vm296_vm1, %v10382_v19 }
  0xd2   : > { %9314 = vmatmul.mubr.msk.f32.gmra.mxu1 %vm296_vm1, %v10610_v13  ;;  %9266 = vmatprep.mubr.msk.f32.mxu0 %vm296_vm1, %v10388_v21  ;;  %v13581_v13 = vld [vmem:[#allocation31_spill] sm:$0xff] }
  0xd3   : > { %9316 = vmatprep.mubr.msk.f32.mxu1 %vm296_vm1, %v10614_v10  ;;  %v10811_v10 = vld [vmem:[#allocation2 + $0x182] sm:$0xff] }
  0xd5   : > { %9267 = vmatmul.mubr.msk.f32.gmra.mxu0 %vm296_vm1, %v10402_v23 }
  0xd6   : > { %9317 = vmatmul.mubr.msk.f32.gmra.mxu1 %vm296_vm1, %v10622_v20  ;;  %9269 = vmatprep.mubr.msk.f32.mxu0 %vm296_vm1, %v10406_v25  ;;  %v10823_v20 = vld [vmem:[#allocation2 + $0x18a] sm:$0xff] }
  0xd7   : > { %9319 = vmatprep.mubr.msk.f32.mxu1 %vm296_vm1, %v10626_v15  ;;  %v10819_v15 = vld [vmem:[#allocation2 + $0x189] sm:$0xff] }
  0xd9   : > { %9270 = vmatmul.mubr.msk.f32.gmra.mxu0 %vm296_vm1, %v10418_v27 }
  0xda   : > { %9320 = vmatmul.mubr.msk.f32.gmra.mxu1 %vm296_vm1, %v10634_v24  ;;  %9272 = vmatprep.mubr.msk.f32.mxu0 %vm296_vm1, %v10422_v29 }
  0xdb   : > { %9322 = vmatprep.mubr.msk.f32.mxu1 %vm296_vm1, %v10638_v22  ;;  %v13582_v22 = vld [vmem:[#allocation4_spill] sm:$0xff] }
  0xdd   : > { %9273 = vmatmul.mubr.msk.f32.gmra.mxu0 %vm296_vm1, %v10434_v51 }
  0xde   : > { %9323 = vmatmul.mubr.msk.f32.gmra.mxu1 %vm296_vm1, %v10646_v28  ;;  %9275 = vmatprep.mubr.msk.f32.mxu0 %vm296_vm1, %v10438_v54 }
  0xdf   : > { %9325 = vmatprep.mubr.msk.f32.mxu1 %vm296_vm1, %v10650_v26  ;;  %v9088_v26 = vpop.f32.mrf.mxu1 }
  0xe1   : > { %9276 = vmatmul.mubr.msk.f32.gmra.mxu0 %vm296_vm1, %v10450_v56 }
  0xe2   : > { %9326 = vmatmul.mubr.msk.f32.gmra.mxu1 %vm296_vm1, %v10658_v53  ;;  %9278 = vmatprep.mubr.msk.f32.mxu0 %vm296_vm1, %v13580_v30  ;;  %v974_v53 = vpop.f32.mrf.mxu1 }
  0xe3   : > { %9328 = vmatprep.mubr.msk.f32.mxu1 %vm296_vm1, %v10662_v50 }
  0xe5   : > { %9279 = vmatmul.mubr.msk.f32.gmra.mxu0 %vm296_vm1, %v13581_v13 }
  0xe6   : > { %9329 = vmatmul.mubr.msk.f32.gmra.mxu1 %vm296_vm1, %v10672_v57  ;;  %9281 = vmatprep.mubr.msk.f32.mxu0 %vm296_vm1, %v10809_v32  ;;  %v13583_v57 = vld [vmem:[#allocation5_spill] sm:$0xff] }
  0xe7   : > { %9331 = vmatprep.mubr.msk.f32.mxu1 %vm296_vm1, %v10811_v10  ;;  %v9038_v24 = vpop.f32.mrf.mxu0 }
  0xe8   : > { %v10833_v28 = vadd.f32 %v9088_v26, %v9038_v24 }
  0xe9   : > { %9282 = vmatmul.mubr.msk.f32.gmra.mxu0 %vm296_vm1, %v10819_v15  ;;  %v650_v50 = vpop.f32.mrf.mxu0 }
  0xea   : > { %9332 = vmatmul.mubr.msk.f32.gmra.mxu1 %vm296_vm1, %v10823_v20  ;;  %9336 = vmatprep.mubr.msk.f32.mxu0 %vm296_vm1, %v13582_v22  ;;  %v10839_v58 = vadd.f32 %v974_v53, %v650_v50  ;;  %v13586_v22 = vld [vmem:[#allocation8_spill] sm:$0xff]  ;;  %v13587_v53 = vld [vmem:[#allocation9_spill] sm:$0xff] }
  0xeb   : > { %9386 = vmatprep.mubr.msk.f32.mxu1 %vm296_vm1, %v10215_v34 }
  0xed   : > { %9337 = vmatmul.mubr.msk.f32.vlgmr.msra.gmra.mxu0 %vm296_vm1, %v13583_v57  ;;  %v13588_v57 = vld [vmem:[#allocation10_spill] sm:$0xff] }
  0xee   : > { %9387 = vmatmul.mubr.msk.f32.vlgmr.msra.gmra.mxu1 %vm296_vm1, %v10227_v36  ;;  %9435 = vmatpush3.msk.msra.mxu0 %vm580_vm0, %v10693_v35 }
  0xef   : > { %9339 = vmatprep.mubr.msk.f32.mxu0 %vm296_vm1, %v13584_v61  ;;  %9389 = vmatprep.mubr.msk.f32.mxu1 %vm296_vm1, %v10231_v38 }
  0xf1   : > { %v9041_v34 = vpop.f32.mrf.mxu0  ;;  %9340 = vmatmul.mubr.msk.f32.gmra.mxu0 %vm296_vm1, %v13585_v3 }
  0xf2   : > { %v9091_v18 = vpop.f32.mrf.mxu1  ;;  %9390 = vmatmul.mubr.msk.f32.gmra.mxu1 %vm296_vm1, %v10243_v40  ;;  %9342 = vmatprep.mubr.msk.f32.mxu0 %vm296_vm1, %v13586_v22  ;;  %v13589_v22 = vld [vmem:[#allocation11_spill] sm:$0xff] }
  0xf3   : > { %v10851_v36 = vadd.f32 %v9091_v18, %v9041_v34  ;;  %9392 = vmatprep.mubr.msk.f32.mxu1 %vm296_vm1, %v10247_v42  ;;  %v660_v35 = vpop.f32.mrf.mxu0 }
  0xf4   : > { %v984_v24 = vpop.f32.mrf.mxu1 }
  0xf5   : > { %v10857_v26 = vadd.f32 %v984_v24, %v660_v35  ;;  %v9044_v38 = vpop.f32.mrf.mxu0  ;;  %9343 = vmatmul.mubr.msk.f32.gmra.mxu0 %vm296_vm1, %v13587_v53  ;;  %v13590_v35 = vld [vmem:[#allocation12_spill] sm:$0xff] }
  0xf6   : > { %v9094_v50 = vpop.f32.mrf.mxu1  ;;  %9393 = vmatmul.mubr.msk.f32.gmra.mxu1 %vm296_vm1, %v10259_v44  ;;  %9345 = vmatprep.mubr.msk.f32.mxu0 %vm296_vm1, %v13588_v57  ;;  %v13591_v57 = vld [vmem:[#allocation13_spill] sm:$0xff] }
  0xf7   : > { %v10863_v40 = vadd.f32 %v9094_v50, %v9044_v38  ;;  %9395 = vmatprep.mubr.msk.f32.mxu1 %vm296_vm1, %v10263_v46  ;;  %v670_v42 = vpop.f32.mrf.mxu0 }
  0xf8   : > { %v994_v61 = vpop.f32.mrf.mxu1 }
  0xf9   : > { %v10869_v34 = vadd.f32 %v994_v61, %v670_v42  ;;  %v9047_v18 = vpop.f32.mrf.mxu0  ;;  %9346 = vmatmul.mubr.msk.f32.gmra.mxu0 %vm296_vm1, %v13589_v22  ;;  %v13592_v42 = vld [vmem:[#allocation14_spill] sm:$0xff] }
  0xfa   : > { %v9097_v3 = vpop.f32.mrf.mxu1  ;;  %9396 = vmatmul.mubr.msk.f32.gmra.mxu1 %vm296_vm1, %v10267_v48  ;;  %9348 = vmatprep.mubr.msk.f32.mxu0 %vm296_vm1, %v13590_v35  ;;  %v13593_v35 = vld [vmem:[#allocation15_spill] sm:$0xff] }
  0xfb   : > { %v10875_v44 = vadd.f32 %v9097_v3, %v9047_v18  ;;  %9398 = vmatprep.mubr.msk.f32.mxu1 %vm296_vm1, %v10277_v52  ;;  %v680_v46 = vpop.f32.mrf.mxu0 }
  0xfc   : > { %v1004_v24 = vpop.f32.mrf.mxu1 }
  0xfd   : > { %v10881_v38 = vadd.f32 %v1004_v24, %v680_v46  ;;  %v9050_v50 = vpop.f32.mrf.mxu0  ;;  %9349 = vmatmul.mubr.msk.f32.gmra.mxu0 %vm296_vm1, %v13591_v57  ;;  %v13594_v46 = vld [vmem:[#allocation16_spill] sm:$0xff] }
  0xfe   : > { %v9100_v53 = vpop.f32.mrf.mxu1  ;;  %9399 = vmatmul.mubr.msk.f32.gmra.mxu1 %vm296_vm1, %v10311_v62  ;;  %9351 = vmatprep.mubr.msk.f32.mxu0 %vm296_vm1, %v13592_v42  ;;  %v13595_v42 = vld [vmem:[#allocation17_spill] sm:$0xff] }
  0xff   : > { %v10887_v48 = vadd.f32 %v9100_v53, %v9050_v50  ;;  %9401 = vmatprep.mubr.msk.f32.mxu1 %vm296_vm1, %v10315_v0  ;;  %v690_v52 = vpop.f32.mrf.mxu0 }
 0x100   : > { %v1014_v61 = vpop.f32.mrf.mxu1 }
 0x101   : > { %v10893_v18 = vadd.f32 %v1014_v61, %v690_v52  ;;  %v9053_v3 = vpop.f32.mrf.mxu0  ;;  %9352 = vmatmul.mubr.msk.f32.gmra.mxu0 %vm296_vm1, %v13593_v35  ;;  %v13596_v52 = vld [vmem:[#allocation18_spill] sm:$0xff] }
 0x102   : > { %v9103_v22 = vpop.f32.mrf.mxu1  ;;  %9402 = vmatmul.mubr.msk.f32.gmra.mxu1 %vm296_vm1, %v10327_v2  ;;  %9354 = vmatprep.mubr.msk.f32.mxu0 %vm296_vm1, %v13594_v46  ;;  %v13597_v46 = vld [vmem:[#allocation19_spill] sm:$0xff] }
 0x103   : > { %v10899_v62 = vadd.f32 %v9103_v22, %v9053_v3  ;;  %9404 = vmatprep.mubr.msk.f32.mxu1 %vm296_vm1, %v10331_v5  ;;  %v700_v0 = vpop.f32.mrf.mxu0 }
 0x104   : > { %v1024_v24 = vpop.f32.mrf.mxu1 }
 0x105   : > { %v10905_v50 = vadd.f32 %v1024_v24, %v700_v0  ;;  %v9056_v53 = vpop.f32.mrf.mxu0  ;;  %9355 = vmatmul.mubr.msk.f32.gmra.mxu0 %vm296_vm1, %v13595_v42  ;;  %v13598_v0 = vld [vmem:[#allocation20_spill] sm:$0xff] }
 0x106   : > { %v9106_v57 = vpop.f32.mrf.mxu1  ;;  %9405 = vmatmul.mubr.msk.f32.gmra.mxu1 %vm296_vm1, %v10343_v7  ;;  %9357 = vmatprep.mubr.msk.f32.mxu0 %vm296_vm1, %v13596_v52  ;;  %v13599_v52 = vld [vmem:[#allocation21_spill] sm:$0xff] }
 0x107   : > { %v10911_v2 = vadd.f32 %v9106_v57, %v9056_v53  ;;  %9407 = vmatprep.mubr.msk.f32.mxu1 %vm296_vm1, %v10347_v9  ;;  %v710_v5 = vpop.f32.mrf.mxu0 }
 0x108   : > { %v1034_v61 = vpop.f32.mrf.mxu1 }
 0x109   : > { %v10917_v3 = vadd.f32 %v1034_v61, %v710_v5  ;;  %v9059_v22 = vpop.f32.mrf.mxu0  ;;  %9358 = vmatmul.mubr.msk.f32.gmra.mxu0 %vm296_vm1, %v13597_v46  ;;  %v13600_v5 = vld [vmem:[#allocation22_spill] sm:$0xff]  ;;  %v13601_v46 = vld [vmem:[#allocation23_spill] sm:$0xff] }
 0x10a   : > { %v9109_v35 = vpop.f32.mrf.mxu1  ;;  %9408 = vmatmul.mubr.msk.f32.gmra.mxu1 %vm296_vm1, %v10359_v12  ;;  %9360 = vmatprep.mubr.msk.f32.mxu0 %vm296_vm1, %v13598_v0  ;;  %v13602_v0 = vld [vmem:[#allocation24_spill] sm:$0xff] }
 0x10b   : > { %v10923_v7 = vadd.f32 %v9109_v35, %v9059_v22  ;;  %9410 = vmatprep.mubr.msk.f32.mxu1 %vm296_vm1, %v10363_v14  ;;  %v720_v9 = vpop.f32.mrf.mxu0 }
 0x10c   : > { %v1044_v24 = vpop.f32.mrf.mxu1 }
 0x10d   : > { %v10929_v53 = vadd.f32 %v1044_v24, %v720_v9  ;;  %v9062_v57 = vpop.f32.mrf.mxu0  ;;  %9361 = vmatmul.mubr.msk.f32.gmra.mxu0 %vm296_vm1, %v13599_v52  ;;  %v13604_v52 = vld [vmem:[#allocation26_spill] sm:$0xff] }
 0x10e   : > { %v9112_v42 = vpop.f32.mrf.mxu1  ;;  %9411 = vmatmul.mubr.msk.f32.gmra.mxu1 %vm296_vm1, %v10382_v19  ;;  %9363 = vmatprep.mubr.msk.f32.mxu0 %vm296_vm1, %v13600_v5 }
 0x10f   : > { %v10935_v12 = vadd.f32 %v9112_v42, %v9062_v57  ;;  %9413 = vmatprep.mubr.msk.f32.mxu1 %vm296_vm1, %v10388_v21  ;;  %v10941_v14 = vpop.f32.mrf.mxu0  ;;  %v13603_v42 = vld [vmem:[#allocation25_spill] sm:$0xff] }
 0x110   : > { %v10943_v61 = vpop.f32.mrf.mxu1 }
 0x111   : > { %v9065_v22 = vpop.f32.mrf.mxu0  ;;  %9364 = vmatmul.mubr.msk.f32.gmra.mxu0 %vm296_vm1, %v13601_v46  ;;  %v13605_v46 = vld [vmem:[#allocation27_spill] sm:$0xff] }
 0x112   : > { %v9115_v35 = vpop.f32.mrf.mxu1  ;;  %9414 = vmatmul.mubr.msk.f32.gmra.mxu1 %vm296_vm1, %v10402_v23  ;;  %9366 = vmatprep.mubr.msk.f32.mxu0 %vm296_vm1, %v13602_v0  ;;  %v13606_v0 = vld [vmem:[#allocation28_spill] sm:$0xff] }
 0x113   : > { %v10949_v19 = vadd.f32 %v9115_v35, %v9065_v22  ;;  %9416 = vmatprep.mubr.msk.f32.mxu1 %vm296_vm1, %v10406_v25  ;;  %v10955_v21 = vpop.f32.mrf.mxu0 }
 0x114   : > { %v10957_v9 = vpop.f32.mrf.mxu1 }
 0x115   : > { %v9068_v24 = vpop.f32.mrf.mxu0  ;;  %9367 = vmatmul.mubr.msk.f32.gmra.mxu0 %vm296_vm1, %v13603_v42 }
 0x116   : > { %v9118_v57 = vpop.f32.mrf.mxu1  ;;  %9417 = vmatmul.mubr.msk.f32.gmra.mxu1 %vm296_vm1, %v10418_v27  ;;  %9369 = vmatprep.mubr.msk.f32.mxu0 %vm296_vm1, %v13604_v52  ;;  %v13607_v52 = vld [vmem:[#allocation29_spill] sm:$0xff] }
 0x117   : > { %v10963_v23 = vadd.f32 %v9118_v57, %v9068_v24  ;;  %9419 = vmatprep.mubr.msk.f32.mxu1 %vm296_vm1, %v10422_v29  ;;  %v10969_v25 = vpop.f32.mrf.mxu0 }
 0x118   : > { %v10971_v5 = vpop.f32.mrf.mxu1 }
 0x119   : > { %v9071_v22 = vpop.f32.mrf.mxu0  ;;  %9370 = vmatmul.mubr.msk.f32.gmra.mxu0 %vm296_vm1, %v13605_v46 }
 0x11a   : > { %v9121_v35 = vpop.f32.mrf.mxu1  ;;  %9420 = vmatmul.mubr.msk.f32.gmra.mxu1 %vm296_vm1, %v10434_v51  ;;  %9372 = vmatprep.mubr.msk.f32.mxu0 %vm296_vm1, %v13606_v0  ;;  %v13609_v0 = vld [vmem:[#allocation32_spill] sm:$0xff] }
 0x11b   : > { %v10977_v27 = vadd.f32 %v9121_v35, %v9071_v22  ;;  %9422 = vmatprep.mubr.msk.f32.mxu1 %vm296_vm1, %v10438_v54  ;;  %v10983_v29 = vpop.f32.mrf.mxu0 }
 0x11c   : > { %v10985_v24 = vpop.f32.mrf.mxu1 }
 0x11d   : > { %v9074_v57 = vpop.f32.mrf.mxu0  ;;  %9373 = vmatmul.mubr.msk.f32.gmra.mxu0 %vm296_vm1, %v13607_v52 }
 0x11e   : > { %v9124_v42 = vpop.f32.mrf.mxu1  ;;  %9423 = vmatmul.mubr.msk.f32.gmra.mxu1 %vm296_vm1, %v10450_v56  ;;  %9375 = vmatprep.mubr.msk.f32.mxu0 %vm296_vm1, %v10456_v60 }
 0x11f   : > { %v10991_v51 = vadd.f32 %v9124_v42, %v9074_v57  ;;  %9425 = vmatprep.mubr.msk.f32.mxu1 %vm296_vm1, %v13580_v30  ;;  %v10997_v54 = vpop.f32.mrf.mxu0  ;;  %v2724_v57 = vld [vmem:[#allocation2 + $0x198] sm:$0xff] }
 0x120   : > { %v10999_v22 = vpop.f32.mrf.mxu1  ;;  %v3114_v42 = vld [vmem:[#allocation2 + $0x199] sm:$0xff] }
 0x121   : > { %13608 = vst [vmem:[#allocation30_spill] sm:$0xff] %v10999_v22  ;;  %v9077_v35 = vpop.f32.mrf.mxu0  ;;  %9376 = vmatmul.mubr.msk.f32.gmra.mxu0 %vm296_vm1, %v10468_v16 }
 0x122   : > { %v9127_v46 = vpop.f32.mrf.mxu1  ;;  %9426 = vmatmul.mubr.msk.f32.gmra.mxu1 %vm296_vm1, %v13581_v13  ;;  %9378 = vmatprep.mubr.msk.f32.mxu0 %vm296_vm1, %v13609_v0  ;;  %v2725_v13 = vld [vmem:[#allocation2 + $0x1a0] sm:$0xff] }
 0x123   : > { %v11005_v56 = vadd.f32 %v9127_v46, %v9077_v35  ;;  %9428 = vmatprep.mubr.msk.f32.mxu1 %vm296_vm1, %v10809_v32  ;;  %v11011_v60 = vpop.f32.mrf.mxu0  ;;  %v3115_v32 = vld [vmem:[#allocation2 + $0x1a1] sm:$0xff] }
 0x124   : > { %13610 = vst [vmem:[#allocation31_spill] sm:$0xff] %v11011_v60  ;;  %v11013_v30 = vpop.f32.mrf.mxu1 }
 0x125   : > { %13611 = vst [vmem:[#allocation4_spill] sm:$0xff] %v11013_v30  ;;  %v9080_v52 = vpop.f32.mrf.mxu0  ;;  %9379 = vmatmul.mubr.msk.f32.gmra.mxu0 %vm296_vm1, %v10676_v55 }
 0x126   : > { %v9130_v22 = vpop.f32.mrf.mxu1  ;;  %9429 = vmatmul.mubr.msk.f32.gmra.mxu1 %vm296_vm1, %v10819_v15  ;;  %9381 = vmatprep.mubr.msk.f32.mxu0 %vm296_vm1, %v2724_v57 }
 0x127   : > { %v11019_v16 = vadd.f32 %v9130_v22, %v9080_v52  ;;  %9431 = vmatprep.mubr.msk.f32.mxu1 %vm296_vm1, %v3114_v42  ;;  %v11023_v35 = vpop.f32.mrf.mxu0 }
 0x128   : > { %13612 = vst [vmem:[#allocation5_spill] sm:$0xff] %v11023_v35  ;;  %v11025_v46 = vpop.f32.mrf.mxu1 }
 0x129   : > { %13613 = vst [vmem:[#allocation6_spill] sm:$0xff] %v11025_v46  ;;  %v9083_v0 = vpop.f32.mrf.mxu0  ;;  %9382 = vmatmul.mubr.msk.f32.gmra.mxu0 %vm296_vm1, %v2725_v13 }
 0x12a   : > { %v9133_v30 = vpop.f32.mrf.mxu1  ;;  %9432 = vmatmul.mubr.msk.f32.gmra.mxu1 %vm296_vm1, %v3115_v32  ;;  %9436 = vmatprep.mubr.msk.f32.mxu0 %vm296_vm1, %v10500_v31 }
 0x12b   : > { %v11029_v55 = vadd.f32 %v9133_v30, %v9083_v0  ;;  %v11033_v15 = vpop.f32.mrf.mxu0 }
 0x12c   : > { %13614 = vst [vmem:[#allocation7_spill] sm:$0xff] %v11033_v15  ;;  %v11035_v22 = vpop.f32.mrf.mxu1 }
 0x12d   : > { %13615 = vst [vmem:[#allocation8_spill] sm:$0xff] %v11035_v22  ;;  %v9138_v57 = vpop.f32.mrf.mxu0  ;;  %9437 = vmatmul.mubr.msk.f32.vlgmr.msra.gmra.mxu0 %vm296_vm1, %v10514_v11 }
 0x12e   : > { %v9188_v42 = vpop.f32.mrf.mxu1  ;;  %v1492_v52 = vadd.f32 %v9138_v57, %v10833_v28  ;;  %9439 = vmatprep.mubr.msk.f32.mxu0 %vm296_vm1, %v10518_v33 }
 0x12f   : > { %v1332_v13 = vpop.f32.mrf.mxu0 }
 0x130   : > { %v11042_v30 = vpop.f32.mrf.mxu1  ;;  %v11045_v32 = vadd.f32 %v1332_v13, %v10839_v58  ;;  %v11047_v31 = vadd.f32 %v9188_v42, %v1492_v52 }
 0x131   : > { %v9141_v0 = vpop.f32.mrf.mxu0  ;;  %9440 = vmatmul.mubr.msk.f32.gmra.mxu0 %vm296_vm1, %v10526_v17 }
 0x132   : > { %v9191_v22 = vpop.f32.mrf.mxu1  ;;  %v1494_v11 = vadd.f32 %v9141_v0, %v10851_v36  ;;  %9442 = vmatprep.mubr.msk.f32.mxu0 %vm296_vm1, %v10530_v37 }
 0x133   : > { %v1342_v28 = vpop.f32.mrf.mxu0 }
 0x134   : > { %v11054_v33 = vpop.f32.mrf.mxu1  ;;  %v11057_v57 = vadd.f32 %v1342_v28, %v10857_v26  ;;  %v11059_v58 = vadd.f32 %v9191_v22, %v1494_v11 }
 0x135   : > { %v9144_v42 = vpop.f32.mrf.mxu0  ;;  %9443 = vmatmul.mubr.msk.f32.gmra.mxu0 %vm296_vm1, %v10538_v41 }
 0x136   : > { %v9194_v52 = vpop.f32.mrf.mxu1  ;;  %v1496_v17 = vadd.f32 %v9144_v42, %v10863_v40  ;;  %9445 = vmatprep.mubr.msk.f32.mxu0 %vm296_vm1, %v10542_v39  ;;  %v8139_v39 = vld [vmem:[%s13478_s3 + $0x8] sm:$0xff] }
 0x137   : > { %v1352_v36 = vpop.f32.mrf.mxu0  ;;  %9484 = vmatprep.subr.mxu1 %v8139_v39 }
 0x138   : > { %v11066_v37 = vpop.f32.mrf.mxu1  ;;  %v11069_v13 = vadd.f32 %v1352_v36, %v10869_v34  ;;  %v11071_v26 = vadd.f32 %v9194_v52, %v1496_v17  ;;  %9485 = vmatpush3.msra.mxu1 %v8139_v39 }
 0x139   : > { %v9147_v22 = vpop.f32.mrf.mxu0  ;;  %9446 = vmatmul.mubr.msk.f32.gmra.mxu0 %vm296_vm1, %v10550_v45 }
 0x13a   : > { %v9197_v0 = vpop.f32.mrf.mxu1  ;;  %v1498_v41 = vadd.f32 %v9147_v22, %v10875_v44  ;;  %9448 = vmatprep.mubr.msk.f32.mxu0 %vm296_vm1, %v10554_v43 }
 0x13b   : > { %v1362_v40 = vpop.f32.mrf.mxu0 }
 0x13c   : > { %v11081_v11 = vpop.f32.mrf.mxu1  ;;  %v11084_v34 = vadd.f32 %v1362_v40, %v10881_v38  ;;  %v11086_v28 = vadd.f32 %v9197_v0, %v1498_v41 }
 0x13d   : > { %v9150_v45 = vpop.f32.mrf.mxu0  ;;  %9449 = vmatmul.mubr.msk.f32.gmra.mxu0 %vm296_vm1, %v10562_v49 }
 0x13e   : > { %v9200_v44 = vpop.f32.mrf.mxu1  ;;  %v1500_v43 = vadd.f32 %v9150_v45, %v10887_v48  ;;  %9451 = vmatprep.mubr.msk.f32.mxu0 %vm296_vm1, %v10566_v47 }
 0x13f   : > { %v1372_v42 = vpop.f32.mrf.mxu0 }
 0x140   : > { %v11093_v52 = vpop.f32.mrf.mxu1  ;;  %v11096_v17 = vadd.f32 %v1372_v42, %v10893_v18  ;;  %v11098_v38 = vadd.f32 %v9200_v44, %v1500_v43  ;;  %v3492_v42 = vld [vmem:[#allocation2 + $0x10a] sm:$0xff] }
 0x141   : > { %v9153_v36 = vpop.f32.mrf.mxu0  ;;  %9452 = vmatmul.mubr.msk.f32.gmra.mxu0 %vm296_vm1, %v10574_v63 }
 0x142   : > { %v9203_v22 = vpop.f32.mrf.mxu1  ;;  %v1502_v49 = vadd.f32 %v9153_v36, %v10899_v62  ;;  %9454 = vmatprep.mubr.msk.f32.mxu0 %vm296_vm1, %v10578_v59 }
 0x143   : > { %v1382_v48 = vpop.f32.mrf.mxu0 }
 0x144   : > { %v11105_v47 = vpop.f32.mrf.mxu1  ;;  %v11108_v0 = vadd.f32 %v1382_v48, %v10905_v50  ;;  %v11110_v18 = vadd.f32 %v9203_v22, %v1502_v49 }
 0x145   : > { %v9156_v41 = vpop.f32.mrf.mxu0  ;;  %9455 = vmatmul.mubr.msk.f32.gmra.mxu0 %vm296_vm1, %v10586_v4 }
 0x146   : > { %v9206_v39 = vpop.f32.mrf.mxu1  ;;  %v1504_v63 = vadd.f32 %v9156_v41, %v10911_v2  ;;  %9457 = vmatprep.mubr.msk.f32.mxu0 %vm296_vm1, %v10590_v1  ;;  %v3491_v2 = vld [vmem:[#allocation2 + $0xfa] sm:$0xff] }
 0x147   : > { %v1392_v62 = vpop.f32.mrf.mxu0 }
 0x148   : > { %v11117_v59 = vpop.f32.mrf.mxu1  ;;  %v11120_v40 = vadd.f32 %v1392_v62, %v10917_v3  ;;  %v11122_v50 = vadd.f32 %v9206_v39, %v1504_v63  ;;  %v3494_v39 = vld [vmem:[#allocation2 + $0x122] sm:$0xff] }
 0x149   : > { %13616 = vst [vmem:[#allocation9_spill] sm:$0xff] %v11117_v59  ;;  %v9159_v45 = vpop.f32.mrf.mxu0  ;;  %9458 = vmatmul.mubr.msk.f32.gmra.mxu0 %vm296_vm1, %v10598_v8 }
 0x14a   : > { %13617 = vst [vmem:[#allocation10_spill] sm:$0xff] %v11120_v40  ;;  %v9209_v44 = vpop.f32.mrf.mxu1  ;;  %v1506_v4 = vadd.f32 %v9159_v45, %v10923_v7  ;;  %9460 = vmatprep.mubr.msk.f32.mxu0 %vm296_vm1, %v10602_v6  ;;  %v1055_v7 = vadd.f32 %v10943_v61, %v10941_v14  ;;  %v3493_v6 = vld [vmem:[#allocation2 + $0x112] sm:$0xff] }
 0x14b   : > { %v1402_v1 = vpop.f32.mrf.mxu0 }
 0x14c   : > { %v11129_v43 = vpop.f32.mrf.mxu1  ;;  %v11132_v3 = vadd.f32 %v1402_v1, %v10929_v53  ;;  %v11134_v36 = vadd.f32 %v9209_v44, %v1506_v4  ;;  %v3496_v4 = vld [vmem:[#allocation2 + $0x13a] sm:$0xff] }
 0x14d   : > { %13618 = vst [vmem:[#allocation11_spill] sm:$0xff] %v11129_v43  ;;  %v9162_v22 = vpop.f32.mrf.mxu0  ;;  %9461 = vmatmul.mubr.msk.f32.gmra.mxu0 %vm296_vm1, %v3491_v2 }
 0x14e   : > { %13619 = vst [vmem:[#allocation12_spill] sm:$0xff] %v11132_v3  ;;  %v9212_v8 = vpop.f32.mrf.mxu1  ;;  %v1508_v49 = vadd.f32 %v9162_v22, %v10935_v12  ;;  %9463 = vmatprep.mubr.msk.f32.mxu0 %vm296_vm1, %v3492_v42  ;;  %v3495_v12 = vld [vmem:[#allocation2 + $0x12a] sm:$0xff] }
 0x14f   : > { %v1412_v48 = vpop.f32.mrf.mxu0 }
 0x150   : > { %v11141_v41 = vpop.f32.mrf.mxu1  ;;  %v11143_v53 = vadd.f32 %v1412_v48, %v1055_v7  ;;  %v11145_v63 = vadd.f32 %v9212_v8, %v1508_v49  ;;  %v3497_v8 = vld [vmem:[#allocation2 + $0x142] sm:$0xff]  ;;  %v3498_v49 = vld [vmem:[#allocation2 + $0x152] sm:$0xff] }
 0x151   : > { %13620 = vst [vmem:[#allocation13_spill] sm:$0xff] %v11141_v41  ;;  %v9165_v62 = vpop.f32.mrf.mxu0  ;;  %9464 = vmatmul.mubr.msk.f32.gmra.mxu0 %vm296_vm1, %v3493_v6 }
 0x152   : > { %13621 = vst [vmem:[#allocation14_spill] sm:$0xff] %v11143_v53  ;;  %v9215_v45 = vpop.f32.mrf.mxu1  ;;  %v1510_v44 = vadd.f32 %v9165_v62, %v10949_v19  ;;  %9466 = vmatprep.mubr.msk.f32.mxu0 %vm296_vm1, %v3494_v39 }
 0x153   : > { %v11150_v14 = vpop.f32.mrf.mxu0 }
 0x154   : > { %13622 = vst [vmem:[#allocation15_spill] sm:$0xff] %v11150_v14  ;;  %v11152_v61 = vpop.f32.mrf.mxu1  ;;  %v11154_v2 = vadd.f32 %v9215_v45, %v1510_v44  ;;  %v3499_v45 = vld [vmem:[#allocation2 + $0x15a] sm:$0xff] }
 0x155   : > { %13623 = vst [vmem:[#allocation16_spill] sm:$0xff] %v11152_v61  ;;  %v9168_v1 = vpop.f32.mrf.mxu0  ;;  %9467 = vmatmul.mubr.msk.f32.gmra.mxu0 %vm296_vm1, %v3495_v12  ;;  %v3500_v12 = vld [vmem:[#allocation2 + $0x16a] sm:$0xff] }
 0x156   : > { %v9218_v42 = vpop.f32.mrf.mxu1  ;;  %v1512_v22 = vadd.f32 %v9168_v1, %v10963_v23  ;;  %9469 = vmatprep.mubr.msk.f32.mxu0 %vm296_vm1, %v3496_v4 }
 0x157   : > { %v11159_v19 = vpop.f32.mrf.mxu0 }
 0x158   : > { %13624 = vst [vmem:[#allocation17_spill] sm:$0xff] %v11159_v19  ;;  %v11161_v7 = vpop.f32.mrf.mxu1  ;;  %v11163_v6 = vadd.f32 %v9218_v42, %v1512_v22 }
 0x159   : > { %13625 = vst [vmem:[#allocation18_spill] sm:$0xff] %v11161_v7  ;;  %v9171_v48 = vpop.f32.mrf.mxu0  ;;  %9470 = vmatmul.mubr.msk.f32.gmra.mxu0 %vm296_vm1, %v3497_v8  ;;  %v3501_v8 = vld [vmem:[#allocation2 + $0x172] sm:$0xff] }
 0x15a   : > { %v9221_v39 = vpop.f32.mrf.mxu1  ;;  %v1514_v62 = vadd.f32 %v9171_v48, %v10977_v27  ;;  %9472 = vmatprep.mubr.msk.f32.mxu0 %vm296_vm1, %v3498_v49 }
 0x15b   : > { %v11168_v23 = vpop.f32.mrf.mxu0 }
 0x15c   : > { %13626 = vst [vmem:[#allocation19_spill] sm:$0xff] %v11168_v23  ;;  %v11170_v44 = vpop.f32.mrf.mxu1  ;;  %v11172_v4 = vadd.f32 %v9221_v39, %v1514_v62 }
 0x15d   : > { %13627 = vst [vmem:[#allocation20_spill] sm:$0xff] %v11170_v44  ;;  %v9174_v1 = vpop.f32.mrf.mxu0  ;;  %9473 = vmatmul.mubr.msk.f32.gmra.mxu0 %vm296_vm1, %v3499_v45 }
 0x15e   : > { %v9224_v42 = vpop.f32.mrf.mxu1  ;;  %v1516_v22 = vadd.f32 %v9174_v1, %v10991_v51  ;;  %9475 = vmatprep.mubr.msk.f32.mxu0 %vm296_vm1, %v3500_v12  ;;  %v3504_v12 = vld [vmem:[#allocation2 + $0x19a] sm:$0xff] }
 0x15f   : > { %v11177_v27 = vpop.f32.mrf.mxu0 }
 0x160   : > { %13628 = vst [vmem:[#allocation21_spill] sm:$0xff] %v11177_v27  ;;  %v11179_v49 = vpop.f32.mrf.mxu1  ;;  %v11181_v48 = vadd.f32 %v9224_v42, %v1516_v22 }
 0x161   : > { %13629 = vst [vmem:[#allocation22_spill] sm:$0xff] %v11179_v49  ;;  %v9177_v23 = vpop.f32.mrf.mxu0  ;;  %9476 = vmatmul.mubr.msk.f32.gmra.mxu0 %vm296_vm1, %v3501_v8 }
 0x162   : > { %v9227_v39 = vpop.f32.mrf.mxu1  ;;  %v1518_v62 = vadd.f32 %v9177_v23, %v11005_v56  ;;  %9478 = vmatprep.mubr.msk.f32.mxu0 %vm296_vm1, %v10811_v10  ;;  %v3505_v56 = vld [vmem:[#allocation2 + $0x1a2] sm:$0xff] }
 0x163   : > { %v11187_v45 = vpop.f32.mrf.mxu0 }
 0x164   : > { %13630 = vst [vmem:[#allocation23_spill] sm:$0xff] %v11187_v45  ;;  %v11189_v51 = vpop.f32.mrf.mxu1  ;;  %v11191_v1 = vadd.f32 %v9227_v39, %v1518_v62 }
 0x165   : > { %13631 = vst [vmem:[#allocation24_spill] sm:$0xff] %v11189_v51  ;;  %v9180_v27 = vpop.f32.mrf.mxu0  ;;  %9479 = vmatmul.mubr.msk.f32.gmra.mxu0 %vm296_vm1, %v10823_v20 }
 0x166   : > { %v9230_v42 = vpop.f32.mrf.mxu1  ;;  %v1520_v22 = vadd.f32 %v9180_v27, %v11019_v16  ;;  %9481 = vmatprep.mubr.msk.f32.mxu0 %vm296_vm1, %v3504_v12 }
 0x167   : > { %v11197_v23 = vpop.f32.mrf.mxu0 }
 0x168   : > { %13632 = vst [vmem:[#allocation25_spill] sm:$0xff] %v11197_v23  ;;  %v11199_v10 = vpop.f32.mrf.mxu1  ;;  %v11201_v8 = vadd.f32 %v9230_v42, %v1520_v22 }
 0x169   : > { %13633 = vst [vmem:[#allocation26_spill] sm:$0xff] %v11199_v10  ;;  %v9183_v51 = vpop.f32.mrf.mxu0  ;;  %9482 = vmatmul.mubr.msk.f32.gmra.mxu0 %vm296_vm1, %v3505_v56  ;;  %v13636_v56 = vmov 0.0   ;;  %v4056_v10 = vld [vmem:[%s13478_s3] sm:$0xff] }
 0x16a   : > { %v9233_v39 = vpop.f32.mrf.mxu1  ;;  %v1522_v62 = vadd.f32 %v9183_v51, %v11029_v55  ;;  %3941 = vst.msk [vmem:[#allocation3 + $0x20] sm:$0xff] %vm3935_vm3, %v13636_v56  ;;  %3936 = vst.msk [vmem:[#allocation3] sm:$0xff] %vm3935_vm3, %v13636_v56  ;;  %9534 = vmatprep.subr.mxu0 %v4056_v10 }
 0x16b   : > { %v11205_v45 = vpop.f32.mrf.mxu0  ;;  %3937 = vst.msk [vmem:[#allocation3 + $0x8] sm:$0xff] %vm3935_vm3, %v13636_v56  ;;  %3940 = vst.msk [vmem:[#allocation3 + $0x18] sm:$0xff] %vm3935_vm3, %v13636_v56  ;;  %9535 = vmatpush3.msra.mxu0 %v4056_v10 }
 0x16c   : > { %13634 = vst [vmem:[#allocation27_spill] sm:$0xff] %v11205_v45  ;;  %v11207_v20 = vpop.f32.mrf.mxu1  ;;  %v11209_v16 = vadd.f32 %v9233_v39, %v1522_v62  ;;  %3943 = vst.msk [vmem:[#allocation3 + $0x30] sm:$0xff] %vm3935_vm3, %v13636_v56 }
 0x16d   : > { %13635 = vst [vmem:[#allocation28_spill] sm:$0xff] %v11207_v20  ;;  %v9238_v27 = vpop.f32.mrf.mxu0  ;;  %3944 = vst.msk [vmem:[#allocation3 + $0x38] sm:$0xff] %vm3935_vm3, %v13636_v56 }
 0x16e   : > { %v11211_v12 = vpop.f32.mrf.mxu1  ;;  %v11214_v23 = vadd.f32 %v9238_v27, %v11047_v31  ;;  %3946 = vst.msk [vmem:[#allocation3 + $0x48] sm:$0xff] %vm3935_vm3, %v13636_v56  ;;  %3947 = vst.msk [vmem:[#allocation3 + $0x50] sm:$0xff] %vm3935_vm3, %v13636_v56 }
 0x16f   : > { %v11216_v42 = vpop.f32.mrf.mxu0  ;;  %3949 = vst.msk [vmem:[#allocation3 + $0x60] sm:$0xff] %vm3935_vm3, %v13636_v56  ;;  %3950 = vst.msk [vmem:[#allocation3 + $0x68] sm:$0xff] %vm3935_vm3, %v13636_v56 }
 0x170   : > { %v11218_v22 = vpop.f32.mrf.mxu1  ;;  %3952 = vst.msk [vmem:[#allocation3 + $0x78] sm:$0xff] %vm3935_vm3, %v13636_v56  ;;  %3953 = vst.msk [vmem:[#allocation3 + $0x80] sm:$0xff] %vm3935_vm3, %v13636_v56 }
 0x171   : > { %3955 = vst.msk [vmem:[#allocation3 + $0x90] sm:$0xff] %vm3935_vm3, %v13636_v56  ;;  %3956 = vst.msk [vmem:[#allocation3 + $0x98] sm:$0xff] %vm3935_vm3, %v13636_v56  ;;  %v9241_v55 = vpop.f32.mrf.mxu0 }
 0x172   : > { %3958 = vst.msk [vmem:[#allocation3 + $0xa8] sm:$0xff] %vm3935_vm3, %v13636_v56  ;;  %3959 = vst.msk [vmem:[#allocation3 + $0xb0] sm:$0xff] %vm3935_vm3, %v13636_v56  ;;  %v11292_v31 = vpop.f32.mrf.mxu1  ;;  %v11331_v51 = vadd.f32 %v9241_v55, %v11059_v58  ;;  %v4057_v58 = vld [vmem:[#allocation3 + $0x1] sm:$0xff] }
 0x173   : > { %3961 = vst.msk [vmem:[#allocation3 + $0xc0] sm:$0xff] %vm3935_vm3, %v13636_v56  ;;  %3962 = vst.msk [vmem:[#allocation3 + $0xc8] sm:$0xff] %vm3935_vm3, %v13636_v56  ;;  %v11333_v39 = vpop.f32.mrf.mxu0  ;;  %v4024_v55 = vld [vmem:[#allocation3] sm:$0xff]  ;;  %9486 = vmatprep.mubr.msk.f32.mxu1 %vm3935_vm3, %v4057_v58  ;;  %v4025_v7 = vld [vmem:[#allocation3 + $0x8] sm:$0xff] }
 0x174   : > { %3964 = vst.msk [vmem:[#allocation3 + $0xd8] sm:$0xff] %vm3935_vm3, %v13636_v56  ;;  %3965 = vst.msk [vmem:[#allocation3 + $0xe0] sm:$0xff] %vm3935_vm3, %v13636_v56  ;;  %v11335_v62 = vpop.f32.mrf.mxu1  ;;  %9536 = vmatprep.mubr.msk.f32.mxu0 %vm3935_vm3, %v4024_v55 }
 0x175   : > { %3967 = vst.msk [vmem:[#allocation3 + $0xf0] sm:$0xff] %vm3935_vm3, %v13636_v56  ;;  %3968 = vst.msk [vmem:[#allocation3 + $0xf8] sm:$0xff] %vm3935_vm3, %v13636_v56  ;;  %v9244_v27 = vpop.f32.mrf.mxu0  ;;  %9537 = vmatmul.mubr.msk.f32.vlgmr.msra.gmra.mxu0 %vm3935_vm3, %v4025_v7 }
 0x176   : > { %3970 = vst.msk [vmem:[#allocation3 + $0x108] sm:$0xff] %vm3935_vm3, %v13636_v56  ;;  %3971 = vst.msk [vmem:[#allocation3 + $0x110] sm:$0xff] %vm3935_vm3, %v13636_v56  ;;  %v11337_v20 = vpop.f32.mrf.mxu1  ;;  %v11340_v45 = vadd.f32 %v9244_v27, %v11071_v26 }
 0x177   : > { %3973 = vst.msk [vmem:[#allocation3 + $0x120] sm:$0xff] %vm3935_vm3, %v13636_v56  ;;  %3974 = vst.msk [vmem:[#allocation3 + $0x128] sm:$0xff] %vm3935_vm3, %v13636_v56  ;;  %v11345_v49 = vpop.f32.mrf.mxu0 }
 0x178   : > { %3976 = vst.msk [vmem:[#allocation3 + $0x138] sm:$0xff] %vm3935_vm3, %v13636_v56  ;;  %3977 = vst.msk [vmem:[#allocation3 + $0x140] sm:$0xff] %vm3935_vm3, %v13636_v56 }
 0x179   : > { %3979 = vst.msk [vmem:[#allocation3 + $0x150] sm:$0xff] %vm3935_vm3, %v13636_v56  ;;  %3980 = vst.msk [vmem:[#allocation3 + $0x158] sm:$0xff] %vm3935_vm3, %v13636_v56  ;;  %v9247_v19 = vpop.f32.mrf.mxu0 }
 0x17a   : > { %3982 = vst.msk [vmem:[#allocation3 + $0x168] sm:$0xff] %vm3935_vm3, %v13636_v56  ;;  %3983 = vst.msk [vmem:[#allocation3 + $0x170] sm:$0xff] %vm3935_vm3, %v13636_v56  ;;  %v11355_v26 = vadd.f32 %v9247_v19, %v11086_v28  ;;  %v8204_v28 = vld [vmem:[%s13478_s3 + $0x10] sm:$0xff] }
 0x17b   : > { %3985 = vst.msk [vmem:[#allocation3 + $0x180] sm:$0xff] %vm3935_vm3, %v13636_v56  ;;  %3986 = vst.msk [vmem:[#allocation3 + $0x188] sm:$0xff] %vm3935_vm3, %v13636_v56  ;;  %v11358_v27 = vpop.f32.mrf.mxu0  ;;  %9584 = vmatprep.subr.mxu1 %v8204_v28 }
 0x17c   : > { %3988 = vst.msk [vmem:[#allocation3 + $0x198] sm:$0xff] %vm3935_vm3, %v13636_v56  ;;  %3989 = vst.msk [vmem:[#allocation3 + $0x1a0] sm:$0xff] %vm3935_vm3, %v13636_v56 }
 0x17d   : > { %3942 = vst.msk [vmem:[#allocation3 + $0x28] sm:$0x3] %vm3938_vm4, %v13636_v56  ;;  %3939 = vst.msk [vmem:[#allocation3 + $0x10] sm:$0x3] %vm3938_vm4, %v13636_v56  ;;  %v9250_v58 = vpop.f32.mrf.mxu0 }
 0x17e   : > { %3945 = vst.msk [vmem:[#allocation3 + $0x40] sm:$0x3] %vm3938_vm4, %v13636_v56  ;;  %3948 = vst.msk [vmem:[#allocation3 + $0x58] sm:$0x3] %vm3938_vm4, %v13636_v56  ;;  %v11365_v41 = vadd.f32 %v9250_v58, %v11098_v38 }
 0x17f   : > { %3951 = vst.msk [vmem:[#allocation3 + $0x70] sm:$0x3] %vm3938_vm4, %v13636_v56  ;;  %3954 = vst.msk [vmem:[#allocation3 + $0x88] sm:$0x3] %vm3938_vm4, %v13636_v56  ;;  %v11367_v53 = vpop.f32.mrf.mxu0 }
 0x180   : > { %3957 = vst.msk [vmem:[#allocation3 + $0xa0] sm:$0x3] %vm3938_vm4, %v13636_v56  ;;  %3960 = vst.msk [vmem:[#allocation3 + $0xb8] sm:$0x3] %vm3938_vm4, %v13636_v56 }
 0x181   : > { %3963 = vst.msk [vmem:[#allocation3 + $0xd0] sm:$0x3] %vm3938_vm4, %v13636_v56  ;;  %3966 = vst.msk [vmem:[#allocation3 + $0xe8] sm:$0x3] %vm3938_vm4, %v13636_v56  ;;  %v9253_v19 = vpop.f32.mrf.mxu0 }
 0x182   : > { %3969 = vst.msk [vmem:[#allocation3 + $0x100] sm:$0x3] %vm3938_vm4, %v13636_v56  ;;  %3972 = vst.msk [vmem:[#allocation3 + $0x118] sm:$0x3] %vm3938_vm4, %v13636_v56 }
 0x183   : > { %3975 = vst.msk [vmem:[#allocation3 + $0x130] sm:$0x3] %vm3938_vm4, %v13636_v56  ;;  %3978 = vst.msk [vmem:[#allocation3 + $0x148] sm:$0x3] %vm3938_vm4, %v13636_v56  ;;  %v11379_v43 = vpop.f32.mrf.mxu0 }
 0x184   : > { %3981 = vst.msk [vmem:[#allocation3 + $0x160] sm:$0x3] %vm3938_vm4, %v13636_v56  ;;  %3984 = vst.msk [vmem:[#allocation3 + $0x178] sm:$0x3] %vm3938_vm4, %v13636_v56  ;;  %v4058_v44 = vld [vmem:[#allocation3 + $0x9] sm:$0xff] }
 0x185   : > { %3987 = vst.msk [vmem:[#allocation3 + $0x190] sm:$0x3] %vm3938_vm4, %v13636_v56  ;;  %3990 = vst.msk [vmem:[#allocation3 + $0x1a8] sm:$0x3] %vm3938_vm4, %v13636_v56  ;;  %v11347_v56 = vpop.f32.mrf.mxu1  ;;  %9487 = vmatmul.mubr.msk.f32.vlgmr.msra.gmra.mxu1 %vm3935_vm3, %v4058_v44  ;;  %v11377_v44 = vadd.f32 %v9253_v19, %v11110_v18  ;;  %v9256_v58 = vpop.f32.mrf.mxu0 }
 0x186   : > { %9585 = vmatpush3.msra.mxu1 %v8204_v28  ;;  %13639 = vst [vmem:[#allocation33_spill] sm:$0xff] %v11379_v43  ;;  %v11386_v15 = vadd.f32 %v9256_v58, %v11122_v50 }
 0x187   : > { %v11350_v61 = vpop.f32.mrf.mxu1  ;;  %13638 = vst [vmem:[#allocation32_spill] sm:$0xff] %v11377_v44  ;;  %v11388_v46 = vpop.f32.mrf.mxu0 }
 0x188   : > { %13642 = vst [vmem:[#allocation36_spill] sm:$0xff] %v11386_v15  ;;  %13643 = vst [vmem:[#allocation37_spill] sm:$0xff] %v11388_v46 }
 0x189   : > { %v11360_v14 = vpop.f32.mrf.mxu1 }
 0x18b   : > { %v11362_v10 = vpop.f32.mrf.mxu1 }
 0x18d   : > { %v11369_v55 = vpop.f32.mrf.mxu1 }
 0x18f   : > { %v11374_v7 = vpop.f32.mrf.mxu1 }
 0x190   : > { %13637 = vst [vmem:[#allocation29_spill] sm:$0xff] %v11374_v7  ;;  %v9259_v7 = vpop.f32.mrf.mxu0 }
 0x191   : > { %v11381_v38 = vpop.f32.mrf.mxu1  ;;  %v11395_v18 = vadd.f32 %v9259_v7, %v11134_v36 }
 0x192   : > { %13640 = vst [vmem:[#allocation34_spill] sm:$0xff] %v11381_v38  ;;  %v11397_v28 = vpop.f32.mrf.mxu0 }
 0x193   : > { %v11383_v3 = vpop.f32.mrf.mxu1  ;;  %13646 = vst [vmem:[#allocation40_spill] sm:$0xff] %v11395_v18  ;;  %13647 = vst [vmem:[#allocation41_spill] sm:$0xff] %v11397_v28 }
 0x194   : > { %13641 = vst [vmem:[#allocation35_spill] sm:$0xff] %v11383_v3  ;;  %v9262_v38 = vpop.f32.mrf.mxu0 }
 0x195   : > { %v11390_v35 = vpop.f32.mrf.mxu1  ;;  %v11404_v50 = vadd.f32 %v9262_v38, %v11145_v63 }
 0x196   : > { %13644 = vst [vmem:[#allocation38_spill] sm:$0xff] %v11390_v35  ;;  %v11406_v58 = vpop.f32.mrf.mxu0 }
 0x197   : > { %v11392_v59 = vpop.f32.mrf.mxu1  ;;  %13650 = vst [vmem:[#allocation44_spill] sm:$0xff] %v11404_v50  ;;  %13651 = vst [vmem:[#allocation45_spill] sm:$0xff] %v11406_v58 }
 0x198   : > { %13645 = vst [vmem:[#allocation39_spill] sm:$0xff] %v11392_v59  ;;  %v9265_v35 = vpop.f32.mrf.mxu0 }
 0x199   : > { %v11399_v19 = vpop.f32.mrf.mxu1  ;;  %v11413_v36 = vadd.f32 %v9265_v35, %v11154_v2 }
 0x19a   : > { %13648 = vst [vmem:[#allocation42_spill] sm:$0xff] %v11399_v19  ;;  %v11415_v7 = vpop.f32.mrf.mxu0 }
 0x19b   : > { %v11401_v44 = vpop.f32.mrf.mxu1  ;;  %13654 = vst [vmem:[#allocation48_spill] sm:$0xff] %v11413_v36  ;;  %13655 = vst [vmem:[#allocation49_spill] sm:$0xff] %v11415_v7 }
 0x19c   : > { %13649 = vst [vmem:[#allocation43_spill] sm:$0xff] %v11401_v44  ;;  %v9268_v19 = vpop.f32.mrf.mxu0 }
 0x19d   : > { %v11408_v3 = vpop.f32.mrf.mxu1  ;;  %v11422_v63 = vadd.f32 %v9268_v19, %v11163_v6 }
 0x19e   : > { %13652 = vst [vmem:[#allocation46_spill] sm:$0xff] %v11408_v3  ;;  %v11424_v38 = vpop.f32.mrf.mxu0 }
 0x19f   : > { %v11410_v15 = vpop.f32.mrf.mxu1  ;;  %13658 = vst [vmem:[#allocation52_spill] sm:$0xff] %v11422_v63  ;;  %13659 = vst [vmem:[#allocation53_spill] sm:$0xff] %v11424_v38 }
 0x1a0   : > { %13653 = vst [vmem:[#allocation47_spill] sm:$0xff] %v11410_v15  ;;  %v9271_v3 = vpop.f32.mrf.mxu0 }
 0x1a1   : > { %v11417_v59 = vpop.f32.mrf.mxu1  ;;  %v11431_v35 = vadd.f32 %v9271_v3, %v11172_v4 }
 0x1a2   : > { %13656 = vst [vmem:[#allocation50_spill] sm:$0xff] %v11417_v59  ;;  %v11433_v2 = vpop.f32.mrf.mxu0 }
 0x1a3   : > { %v11419_v18 = vpop.f32.mrf.mxu1  ;;  %13662 = vst [vmem:[#allocation56_spill] sm:$0xff] %v11431_v35  ;;  %13663 = vst [vmem:[#allocation57_spill] sm:$0xff] %v11433_v2 }
 0x1a4   : > { %13657 = vst [vmem:[#allocation51_spill] sm:$0xff] %v11419_v18  ;;  %v9274_v59 = vpop.f32.mrf.mxu0 }
 0x1a5   : > { %v11426_v44 = vpop.f32.mrf.mxu1  ;;  %v11440_v6 = vadd.f32 %v9274_v59, %v11181_v48 }
 0x1a6   : > { %13660 = vst [vmem:[#allocation54_spill] sm:$0xff] %v11426_v44  ;;  %v11442_v19 = vpop.f32.mrf.mxu0 }
 0x1a7   : > { %v11428_v50 = vpop.f32.mrf.mxu1  ;;  %13666 = vst [vmem:[#allocation60_spill] sm:$0xff] %v11440_v6  ;;  %13667 = vst [vmem:[#allocation61_spill] sm:$0xff] %v11442_v19 }
 0x1a8   : > { %13661 = vst [vmem:[#allocation55_spill] sm:$0xff] %v11428_v50  ;;  %v9277_v44 = vpop.f32.mrf.mxu0 }
 0x1a9   : > { %v11435_v15 = vpop.f32.mrf.mxu1  ;;  %v11449_v3 = vadd.f32 %v9277_v44, %v11191_v1 }
 0x1aa   : > { %13664 = vst [vmem:[#allocation58_spill] sm:$0xff] %v11435_v15  ;;  %v11451_v4 = vpop.f32.mrf.mxu0 }
 0x1ab   : > { %v11437_v36 = vpop.f32.mrf.mxu1  ;;  %13670 = vst [vmem:[#allocation64_spill] sm:$0xff] %v11449_v3  ;;  %13671 = vst [vmem:[#allocation65_spill] sm:$0xff] %v11451_v4 }
 0x1ac   : > { %13665 = vst [vmem:[#allocation59_spill] sm:$0xff] %v11437_v36  ;;  %v9280_v15 = vpop.f32.mrf.mxu0 }
 0x1ad   : > { %v11444_v18 = vpop.f32.mrf.mxu1  ;;  %v11458_v59 = vadd.f32 %v9280_v15, %v11201_v8 }
 0x1ae   : > { %13668 = vst [vmem:[#allocation62_spill] sm:$0xff] %v11444_v18  ;;  %v11460_v48 = vpop.f32.mrf.mxu0 }
 0x1af   : > { %v11446_v63 = vpop.f32.mrf.mxu1  ;;  %13674 = vst [vmem:[#allocation68_spill] sm:$0xff] %v11458_v59  ;;  %13675 = vst [vmem:[#allocation69_spill] sm:$0xff] %v11460_v48 }
 0x1b0   : > { %13669 = vst [vmem:[#allocation63_spill] sm:$0xff] %v11446_v63  ;;  %v9283_v18 = vpop.f32.mrf.mxu0 }
 0x1b1   : > { %v11453_v50 = vpop.f32.mrf.mxu1  ;;  %v11467_v1 = vadd.f32 %v9283_v18, %v11209_v16 }
 0x1b2   : > { %13672 = vst [vmem:[#allocation66_spill] sm:$0xff] %v11453_v50  ;;  %v11469_v44 = vpop.f32.mrf.mxu0 }
 0x1b3   : > { %v11455_v35 = vpop.f32.mrf.mxu1  ;;  %13678 = vst [vmem:[#allocation72_spill] sm:$0xff] %v11467_v1  ;;  %13679 = vst [vmem:[#allocation73_spill] sm:$0xff] %v11469_v44  ;;  %v11495_v1 = vld [vmem:[%s13478_s3 + $0x20] sm:$0xff] }
 0x1b4   : > { %13673 = vst [vmem:[#allocation67_spill] sm:$0xff] %v11455_v35  ;;  %v9338_v50 = vpop.f32.mrf.mxu0  ;;  %13681 = vst [vmem:[#allocation75_spill] sm:$0xff] %v11495_v1  ;;  %9684 = vmatprep.subr.mxu1 %v11495_v1 }
 0x1b5   : > { %v11462_v36 = vpop.f32.mrf.mxu1 }
 0x1b6   : > { %13676 = vst [vmem:[#allocation70_spill] sm:$0xff] %v11462_v36  ;;  %v2893_v35 = vpop.f32.mrf.mxu0 }
 0x1b7   : > { %v11464_v6 = vpop.f32.mrf.mxu1 }
 0x1b8   : > { %13677 = vst [vmem:[#allocation71_spill] sm:$0xff] %v11464_v6  ;;  %v11477_v8 = vpop.f32.mrf.mxu0 }
 0x1b9   : > { %v11471_v63 = vpop.f32.mrf.mxu1 }
 0x1ba   : > { %13680 = vst [vmem:[#allocation74_spill] sm:$0xff] %v11471_v63  ;;  %v11479_v59 = vpop.f32.mrf.mxu0  ;;  %v8237_v63 = vld [vmem:[%s13478_s3 + $0x18] sm:$0xff] }
 0x1bb   : > { %v11473_v3 = vpop.f32.mrf.mxu1  ;;  %9634 = vmatprep.subr.mxu0 %v8237_v63 }
 0x1bc   : > { %v11483_v6 = vpop.f32.mrf.mxu0  ;;  %9635 = vmatpush3.msra.mxu0 %v8237_v63 }
 0x1bd   : > { %v11475_v15 = vpop.f32.mrf.mxu1 }
 0x1be   : > { %v11487_v18 = vpop.f32.mrf.mxu0 }
 0x1bf   : > { %v11481_v36 = vpop.f32.mrf.mxu1 }
 0x1c0   : > { %v11497_v44 = vpop.f32.mrf.mxu0 }
 0x1c1   : > { %v11485_v16 = vpop.f32.mrf.mxu1 }
 0x1c2   : > { %v11502_v4 = vpop.f32.mrf.mxu0 }
 0x1c3   : > { %v11500_v48 = vpop.f32.mrf.mxu1 }
 0x1c4   : > { %v11504_v19 = vpop.f32.mrf.mxu0 }
 0x1c5   : > { %13682 = vst [vmem:[#allocation76_spill] sm:$0xff] %v11504_v19  ;;  %v11506_v2 = vpop.f32.mrf.mxu1 }
 0x1c6   : > { %v11508_v38 = vpop.f32.mrf.mxu0 }
 0x1c7   : > { %13683 = vst [vmem:[#allocation77_spill] sm:$0xff] %v11508_v38  ;;  %v11512_v58 = vpop.f32.mrf.mxu1 }
 0x1c8   : > { %v11510_v7 = vpop.f32.mrf.mxu0  ;;  %13685 = vst [vmem:[#allocation79_spill] sm:$0xff] %v11512_v58 }
 0x1c9   : > { %13684 = vst [vmem:[#allocation78_spill] sm:$0xff] %v11510_v7  ;;  %v11518_v63 = vpop.f32.mrf.mxu1 }
 0x1ca   : > { %v11514_v28 = vpop.f32.mrf.mxu0  ;;  %13688 = vst [vmem:[#allocation82_spill] sm:$0xff] %v11518_v63 }
 0x1cb   : > { %13686 = vst [vmem:[#allocation80_spill] sm:$0xff] %v11514_v28  ;;  %v11524_v60 = vpop.f32.mrf.mxu1 }
 0x1cc   : > { %v11516_v46 = vpop.f32.mrf.mxu0  ;;  %13691 = vst [vmem:[#allocation85_spill] sm:$0xff] %v11524_v60 }
 0x1cd   : > { %13687 = vst [vmem:[#allocation81_spill] sm:$0xff] %v11516_v46  ;;  %v11530_v38 = vpop.f32.mrf.mxu1 }
 0x1ce   : > { %v11520_v1 = vpop.f32.mrf.mxu0  ;;  %13694 = vst [vmem:[#allocation88_spill] sm:$0xff] %v11530_v38 }
 0x1cf   : > { %13689 = vst [vmem:[#allocation83_spill] sm:$0xff] %v11520_v1  ;;  %v11536_v28 = vpop.f32.mrf.mxu1 }
 0x1d0   : > { %v11522_v40 = vpop.f32.mrf.mxu0  ;;  %13697 = vst [vmem:[#allocation91_spill] sm:$0xff] %v11536_v28 }
 0x1d1   : > { %13690 = vst [vmem:[#allocation84_spill] sm:$0xff] %v11522_v40  ;;  %v11542_v1 = vpop.f32.mrf.mxu1 }
 0x1d2   : > { %v11526_v19 = vpop.f32.mrf.mxu0 }
 0x1d3   : > { %13692 = vst [vmem:[#allocation86_spill] sm:$0xff] %v11526_v19  ;;  %v11548_v19 = vpop.f32.mrf.mxu1 }
 0x1d4   : > { %v11528_v43 = vpop.f32.mrf.mxu0  ;;  %13702 = vst [vmem:[#allocation96_spill] sm:$0xff] %v11548_v19 }
 0x1d5   : > { %13693 = vst [vmem:[#allocation87_spill] sm:$0xff] %v11528_v43 }
 0x1d6   : > { %v11532_v7 = vpop.f32.mrf.mxu0 }
 0x1d7   : > { %13695 = vst [vmem:[#allocation89_spill] sm:$0xff] %v11532_v7  ;;  %v11554_v7 = vpop.f32.mrf.mxu1 }
 0x1d8   : > { %v11534_v58 = vpop.f32.mrf.mxu0 }
 0x1d9   : > { %13696 = vst [vmem:[#allocation90_spill] sm:$0xff] %v11534_v58 }
 0x1da   : > { %v11538_v46 = vpop.f32.mrf.mxu0 }
 0x1db   : > { %13698 = vst [vmem:[#allocation92_spill] sm:$0xff] %v11538_v46  ;;  %v11562_v46 = vpop.f32.mrf.mxu1 }
 0x1dc   : > { %v11540_v63 = vpop.f32.mrf.mxu0  ;;  %13707 = vst [vmem:[#allocation101_spill] sm:$0xff] %v11562_v46 }
 0x1dd   : > { %13699 = vst [vmem:[#allocation93_spill] sm:$0xff] %v11540_v63  ;;  %v1881_v63 = vadd.f32 %v11042_v30, %v11045_v32 }
 0x1de   : > { %v11544_v40 = vpop.f32.mrf.mxu0 }
 0x1df   : > { %13700 = vst [vmem:[#allocation94_spill] sm:$0xff] %v11544_v40 }
 0x1e0   : > { %v11546_v60 = vpop.f32.mrf.mxu0 }
 0x1e1   : > { %13701 = vst [vmem:[#allocation95_spill] sm:$0xff] %v11546_v60  ;;  %v2271_v60 = vadd.f32 %v11216_v42, %v1881_v63  ;;  %v1885_v42 = vadd.f32 %v11066_v37, %v11069_v13  ;;  %v1887_v37 = vadd.f32 %v11081_v11, %v11084_v34  ;;  %v2666_v13 = vadd.f32 %v11337_v20, %v11340_v45 }
 0x1e2   : > { %v11550_v43 = vpop.f32.mrf.mxu0 }
 0x1e3   : > { %13703 = vst [vmem:[#allocation97_spill] sm:$0xff] %v11550_v43  ;;  %v2662_v43 = vadd.f32 %v11211_v12, %v11214_v23  ;;  %v2661_v30 = vadd.f32 %v11218_v22, %v2271_v60  ;;  %v2275_v23 = vadd.f32 %v11345_v49, %v1885_v42  ;;  %v11600_v49 = vld [vmem:[%s13477_s2] ss:$0 sm:$0xff]  ;;  %v3057_v11 = vadd.f32 %v11483_v6, %v2666_v13 }
 0x1e4   : > { %v11552_v38 = vpop.f32.mrf.mxu0 }
 0x1e5   : > { %13704 = vst [vmem:[#allocation98_spill] sm:$0xff] %v11552_v38  ;;  %v1883_v38 = vadd.f32 %v11054_v33, %v11057_v57  ;;  %v3053_v46 = vadd.f32 %v9338_v50, %v2662_v43  ;;  %v2664_v33 = vadd.f32 %v11292_v31, %v11331_v51  ;;  %v3052_v57 = vadd.f32 %v2893_v35, %v2661_v30 }
 0x1e6   : > { %v11556_v58 = vpop.f32.mrf.mxu0  ;;  %v2277_v50 = vadd.f32 %v11358_v27, %v1887_v37 }
 0x1e7   : > { %13705 = vst [vmem:[#allocation99_spill] sm:$0xff] %v11556_v58  ;;  %v11573_v58 = vpop.f32.mrf.mxu1  ;;  %v2273_v32 = vadd.f32 %v11333_v39, %v1883_v38  ;;  %v3443_v22 = vadd.f32 %v11473_v3, %v3053_v46  ;;  %v3055_v43 = vadd.f32 %v11477_v8, %v2664_v33  ;;  %v3442_v51 = vadd.f32 %v11475_v15, %v3052_v57 }
 0x1e8   : > { %v11558_v28 = vpop.f32.mrf.mxu0  ;;  %v2665_v46 = vadd.f32 %v11347_v56, %v2275_v23  ;;  %v11613_v3 = vadd.f32 %v10957_v9, %v10955_v21  ;;  %v2668_v56 = vadd.f32 %v11350_v61, %v11355_v26  ;;  %v2667_v21 = vadd.f32 %v11360_v14, %v2277_v50 }
 0x1e9   : > { %13706 = vst [vmem:[#allocation100_spill] sm:$0xff] %v11558_v28  ;;  %v11586_v12 = vpop.f32.mrf.mxu1  ;;  %v2663_v60 = vadd.f32 %v11335_v62, %v2273_v32  ;;  %v3445_v20 = vadd.f32 %v11481_v36, %v3055_v43  ;;  %v11624_v32 = vadd.f32 %v10971_v5, %v10969_v25  ;;  %v11636_v25 = vadd.f32 %v10985_v24, %v10983_v29  ;;  %v13709_v29 = vld [vmem:[#allocation30_spill] sm:$0xff] }
 0x1ea   : > { %v11564_v40 = vpop.f32.mrf.mxu0  ;;  %v3056_v27 = vadd.f32 %v11487_v18, %v2665_v46  ;;  %v3059_v26 = vadd.f32 %v11497_v44, %v2668_v56  ;;  %v1891_v5 = vadd.f32 %v11105_v47, %v11108_v0  ;;  %v3058_v44 = vadd.f32 %v11502_v4, %v2667_v21  ;;  %v13710_v0 = vld [vmem:[#allocation33_spill] sm:$0xff]  ;;  %v13712_v4 = vld [vmem:[#allocation79_spill] sm:$0xff]  ;;  %v13720_v56 = vld [vmem:[#allocation82_spill] sm:$0xff] }
 0x1eb   : > { %v3054_v39 = vadd.f32 %v11479_v59, %v2663_v60  ;;  %v11607_v34 = vpop.f32.mrf.mxu1  ;;  %v1889_v59 = vadd.f32 %v11093_v52, %v11096_v17  ;;  %v3447_v52 = vadd.f32 %v11500_v48, %v3057_v11  ;;  %v11648_v24 = vadd.f32 %v13709_v29, %v10997_v54  ;;  %v11661_v54 = vld [vmem:[%s13478_s3 + $0x28] sm:$0xff]  ;;  %v13717_v11 = vld [vmem:[#allocation32_spill] sm:$0xff] }
 0x1ec   : > { %v11567_v19 = vpop.f32.mrf.mxu0  ;;  %v3446_v14 = vadd.f32 %v11506_v2, %v3056_v27  ;;  %v2281_v60 = vadd.f32 %v13710_v0, %v1891_v5  ;;  %v3449_v43 = vadd.f32 %v13712_v4, %v3059_v26  ;;  %v13716_v46 = vld [vmem:[#allocation9_spill] sm:$0xff]  ;;  %9734 = vmatprep.subr.mxu0 %v11661_v54  ;;  %v3448_v27 = vadd.f32 %v13720_v56, %v3058_v44  ;;  %v13730_v0 = vld [vmem:[#allocation11_spill] sm:$0xff]  ;;  %v13733_v4 = vld [vmem:[#allocation88_spill] sm:$0xff] }
 0x1ed   : > { %13708 = vst [vmem:[#allocation102_spill] sm:$0xff] %v11567_v19  ;;  %v3444_v15 = vadd.f32 %v11485_v16, %v3054_v39  ;;  %v2279_v9 = vadd.f32 %v11367_v53, %v1889_v59  ;;  %v11629_v17 = vpop.f32.mrf.mxu1  ;;  %v2670_v53 = vadd.f32 %v11362_v10, %v11365_v41  ;;  %v13711_v41 = vld [vmem:[#allocation76_spill] sm:$0xff]  ;;  %v13737_v56 = vld [vmem:[#allocation81_spill] sm:$0xff] }
 0x1ee   : > { %v11575_v28 = vpop.f32.mrf.mxu0 }
 0x1ef   : > { %v2669_v47 = vadd.f32 %v11369_v55, %v2279_v9  ;;  %v3061_v10 = vadd.f32 %v13711_v41, %v2670_v53  ;;  %v11653_v2 = vpop.f32.mrf.mxu1  ;;  %v13713_v55 = vld [vmem:[#allocation31_spill] sm:$0xff]  ;;  %v13723_v9 = vld [vmem:[#allocation34_spill] sm:$0xff]  ;;  %v13731_v41 = vld [vmem:[#allocation36_spill] sm:$0xff] }
 0x1f0   : > { %v11581_v63 = vpop.f32.mrf.mxu0  ;;  %v13726_v53 = vld [vmem:[#allocation78_spill] sm:$0xff] }
 0x1f2   : > { %v11588_v19 = vpop.f32.mrf.mxu0 }
 0x1f4   : > { %v9438_v31 = vpop.f32.mrf.mxu0 }
 0x1f5   : > { %v3833_v62 = vadd.f32 %v9438_v31, %v3443_v22 }
 0x1f6   : > { %v3673_v45 = vpop.f32.mrf.mxu0 }
 0x1f7   : > { %v3872_v38 = vadd.f32 %v11600_v49, %v3833_v62  ;;  %v3832_v35 = vadd.f32 %v3673_v45, %v3442_v51  ;;  %v13714_v51 = vld [vmem:[#allocation4_spill] sm:$0xff]  ;;  %v13715_v62 = vld [vmem:[#allocation10_spill] sm:$0xff]  ;;  %v13718_v45 = vld [vmem:[#allocation29_spill] sm:$0xff] }
 0x1f8   : > { %v9441_v6 = vpop.f32.mrf.mxu0  ;;  %v11665_v39 = vadd.f32 %v13714_v51, %v13713_v55  ;;  %v1893_v50 = vadd.f32 %v13716_v46, %v13715_v62  ;;  %v13734_v51 = vld [vmem:[#allocation80_spill] sm:$0xff] }
 0x1f9   : > { %v3904_v8 = vmax.f32 %v3872_v38, 0.0  ;;  %v3871_v36 = vadd.f32 %v11600_v49, %v3832_v35  ;;  %v3835_v30 = vadd.f32 %v9441_v6, %v3445_v20  ;;  %v2672_v20 = vadd.f32 %v13718_v45, %v13717_v11  ;;  %v13719_v38 = vld [vmem:[#allocation77_spill] sm:$0xff] }
 0x1fa   : > { %v3683_v61 = vpop.f32.mrf.mxu0  ;;  %v3060_v35 = vadd.f32 %v13719_v38, %v2669_v47  ;;  %v13729_v47 = vld [vmem:[#allocation12_spill] sm:$0xff] }
 0x1fb   : > { %3993 = vst.msk [vmem:[#allocation3 + $0x21] sm:$0xff] %vm3935_vm3, %v3904_v8  ;;  %v3903_v16 = vmax.f32 %v3871_v36, 0.0  ;;  %v3874_v18 = vadd.f32 %v11600_v49, %v3835_v30  ;;  %v3834_v42 = vadd.f32 %v3683_v61, %v3444_v15  ;;  %v13721_v36 = vld [vmem:[#allocation5_spill] sm:$0xff]  ;;  %v13722_v30 = vld [vmem:[#allocation6_spill] sm:$0xff] }
 0x1fc   : > { %v9444_v48 = vpop.f32.mrf.mxu0  ;;  %v11678_v21 = vadd.f32 %v13722_v30, %v13721_v36  ;;  %v13724_v61 = vld [vmem:[#allocation37_spill] sm:$0xff] }
 0x1fd   : > { %3992 = vst.msk [vmem:[#allocation3 + $0x19] sm:$0xff] %vm3935_vm3, %v3903_v16  ;;  %v3906_v33 = vmax.f32 %v3874_v18, 0.0  ;;  %v3873_v57 = vadd.f32 %v11600_v49, %v3834_v42  ;;  %v3837_v23 = vadd.f32 %v9444_v48, %v3447_v52  ;;  %v2671_v52 = vadd.f32 %v13723_v9, %v2281_v60  ;;  %v13725_v16 = vld [vmem:[#allocation85_spill] sm:$0xff]  ;;  %v11683_v42 = vpop.f32.mrf.mxu1 }
 0x1fe   : > { %v3693_v22 = vpop.f32.mrf.mxu0  ;;  %v2283_v26 = vadd.f32 %v13724_v61, %v1893_v50  ;;  %v3451_v18 = vadd.f32 %v13725_v16, %v3061_v10  ;;  %v1895_v60 = vadd.f32 %v13730_v0, %v13729_v47  ;;  %v13732_v10 = vld [vmem:[#allocation35_spill] sm:$0xff]  ;;  %v13739_v61 = vld [vmem:[#allocation14_spill] sm:$0xff] }
 0x1ff   : > { %3995 = vst.msk [vmem:[#allocation3 + $0x39] sm:$0xff] %vm3935_vm3, %v3906_v33  ;;  %v3905_v37 = vmax.f32 %v3873_v57, 0.0  ;;  %v3876_v13 = vadd.f32 %v11600_v49, %v3837_v23  ;;  %v3836_v31 = vadd.f32 %v3693_v22, %v3446_v14  ;;  %v3063_v14 = vadd.f32 %v13726_v53, %v2672_v20  ;;  %v13727_v57 = vld [vmem:[#allocation7_spill] sm:$0xff]  ;;  %v13728_v23 = vld [vmem:[#allocation8_spill] sm:$0xff]  ;;  %v13735_v20 = vld [vmem:[#allocation38_spill] sm:$0xff] }
 0x200   : > { %v9447_v59 = vpop.f32.mrf.mxu0  ;;  %v11690_v29 = vadd.f32 %v13728_v23, %v13727_v57  ;;  %v2674_v22 = vadd.f32 %v13732_v10, %v13731_v41  ;;  %v3062_v62 = vadd.f32 %v13734_v51, %v2671_v52  ;;  %v2673_v38 = vadd.f32 %v13735_v20, %v2283_v26  ;;  %v13740_v26 = vld [vmem:[#allocation13_spill] sm:$0xff]  ;;  %v13742_v53 = vld [vmem:[#allocation40_spill] sm:$0xff] }
 0x201   : > { %3994 = vst.msk [vmem:[#allocation3 + $0x31] sm:$0xff] %vm3935_vm3, %v3905_v37  ;;  %v3908_v6 = vmax.f32 %v3876_v13, 0.0  ;;  %v3875_v15 = vadd.f32 %v11600_v49, %v3836_v31  ;;  %v3839_v8 = vadd.f32 %v9447_v59, %v3449_v43  ;;  %v3450_v43 = vadd.f32 %v13733_v4, %v3060_v35  ;;  %v13736_v35 = vld [vmem:[#allocation41_spill] sm:$0xff]  ;;  %v13745_v4 = vld [vmem:[#allocation42_spill] sm:$0xff] }
 0x202   : > { %v3703_v5 = vpop.f32.mrf.mxu0  ;;  %v11710_v45 = vld [vmem:[#allocation3 + $0x21] sm:$0xff]  ;;  %v2285_v59 = vadd.f32 %v13736_v35, %v1895_v60  ;;  %v1897_v16 = vadd.f32 %v13740_v26, %v13739_v61  ;;  %v3452_v60 = vadd.f32 %v11542_v1, %v3062_v62 }
 0x203   : > { %3997 = vst.msk [vmem:[#allocation3 + $0x51] sm:$0xff] %vm3935_vm3, %v3908_v6  ;;  %v3907_v48 = vmax.f32 %v3875_v15, 0.0  ;;  %v3878_v44 = vadd.f32 %v11600_v49, %v3839_v8  ;;  %v3838_v33 = vadd.f32 %v3703_v5, %v3448_v27  ;;  %v3065_v27 = vadd.f32 %v13737_v56, %v2674_v22  ;;  %v11715_v6 = vpop.f32.mrf.mxu1  ;;  %v13738_v8 = vld [vmem:[#allocation91_spill] sm:$0xff]  ;;  %v13749_v56 = vld [vmem:[#allocation16_spill] sm:$0xff] }
 0x204   : > { %v9450_v37 = vpop.f32.mrf.mxu0  ;;  %v11697_v13 = vld [vmem:[#allocation3 + $0x19] sm:$0xff]  ;;  %v3453_v36 = vadd.f32 %v13738_v8, %v3063_v14 }
 0x205   : > { %v11699_v31 = vld [vmem:[#allocation3 + $0x18] sm:$0xff]  ;;  %v11701_v55 = vld [vmem:[#allocation3 + $0x20] sm:$0xff]  ;;  %3996 = vst.msk [vmem:[#allocation3 + $0x49] sm:$0xff] %vm3935_vm3, %v3907_v48  ;;  %v3910_v46 = vmax.f32 %v3878_v44, 0.0  ;;  %v3877_v50 = vadd.f32 %v11600_v49, %v3838_v33  ;;  %v3841_v11 = vadd.f32 %v9450_v37, %v3451_v18  ;;  %9489 = vmatprep.mubr.msk.f32.mxu1 %vm3935_vm3, %v11697_v13  ;;  %v13741_v18 = vld [vmem:[#allocation15_spill] sm:$0xff]  ;;  %v11749_v62 = vpop.f32.mrf.mxu1 }
 0x206   : > { %9539 = vmatprep.mubr.msk.f32.mxu0 %vm3935_vm3, %v11699_v31  ;;  %v3713_v15 = vpop.f32.mrf.mxu0  ;;  %9490 = vmatmul.mubr.msk.f32.gmra.mxu1 %vm3935_vm3, %v11710_v45  ;;  %v1509_v5 = vadd.f32 %v13741_v18, %v11613_v3  ;;  %v13743_v48 = vld [vmem:[#allocation39_spill] sm:$0xff]  ;;  %v11744_v22 = vld [vmem:[#allocation3 + $0x39] sm:$0xff] }
 0x207   : > { %9540 = vmatmul.mubr.msk.f32.gmra.mxu0 %vm3935_vm3, %v11701_v55  ;;  %3999 = vst.msk [vmem:[#allocation3 + $0x69] sm:$0xff] %vm3935_vm3, %v3910_v46  ;;  %v3909_v30 = vmax.f32 %v3877_v50, 0.0  ;;  %v3880_v9 = vadd.f32 %v11600_v49, %v3841_v11  ;;  %v3840_v52 = vadd.f32 %v3713_v15, %v3450_v43  ;;  %v2676_v44 = vadd.f32 %v13743_v48, %v13742_v53  ;;  %v13744_v33 = vld [vmem:[#allocation83_spill] sm:$0xff]  ;;  %v13746_v37 = vld [vmem:[#allocation45_spill] sm:$0xff]  ;;  %v13747_v46 = vld [vmem:[#allocation96_spill] sm:$0xff] }
 0x208   : > { %v3064_v57 = vadd.f32 %v13744_v33, %v2673_v38  ;;  %v9453_v23 = vpop.f32.mrf.mxu0  ;;  %v11731_v47 = vld [vmem:[#allocation3 + $0x31] sm:$0xff]  ;;  %v2675_v43 = vadd.f32 %v13745_v4, %v2285_v59  ;;  %v2287_v51 = vadd.f32 %v13746_v37, %v1897_v16  ;;  %v3455_v1 = vadd.f32 %v13747_v46, %v3065_v27  ;;  %v13754_v53 = vld [vmem:[#allocation86_spill] sm:$0xff] }
 0x209   : > { %v11733_v14 = vld [vmem:[#allocation3 + $0x30] sm:$0xff]  ;;  %v11735_v0 = vld [vmem:[#allocation3 + $0x38] sm:$0xff]  ;;  %3998 = vst.msk [vmem:[#allocation3 + $0x61] sm:$0xff] %vm3935_vm3, %v3909_v30  ;;  %v3912_v41 = vmax.f32 %v3880_v9, 0.0  ;;  %v3879_v10 = vadd.f32 %v11600_v49, %v3840_v52  ;;  %v3843_v3 = vadd.f32 %v9453_v23, %v3453_v36  ;;  %9492 = vmatprep.mubr.msk.f32.mxu1 %vm3935_vm3, %v11731_v47  ;;  %v1899_v15 = vadd.f32 %v13749_v56, %v1509_v5  ;;  %v13752_v30 = vld [vmem:[#allocation43_spill] sm:$0xff] }
 0x20a   : > { %9542 = vmatprep.mubr.msk.f32.mxu0 %vm3935_vm3, %v11733_v14  ;;  %v3723_v50 = vpop.f32.mrf.mxu0  ;;  %9493 = vmatmul.mubr.msk.f32.gmra.mxu1 %vm3935_vm3, %v11744_v22  ;;  %v13748_v11 = vld [vmem:[#allocation84_spill] sm:$0xff]  ;;  %v13750_v27 = vld [vmem:[#allocation17_spill] sm:$0xff]  ;;  %v3454_v52 = vadd.f32 %v11554_v7, %v3064_v57  ;;  %v3066_v48 = vadd.f32 %v13754_v53, %v2675_v43  ;;  %v13755_v33 = vld [vmem:[#allocation46_spill] sm:$0xff] }
 0x20b   : > { %9543 = vmatmul.mubr.msk.f32.gmra.mxu0 %vm3935_vm3, %v11735_v0  ;;  %v3067_v20 = vadd.f32 %v13748_v11, %v2676_v44  ;;  %4001 = vst.msk [vmem:[#allocation3 + $0x81] sm:$0xff] %vm3935_vm3, %v3912_v41  ;;  %v3911_v38 = vmax.f32 %v3879_v10, 0.0  ;;  %v3882_v35 = vadd.f32 %v11600_v49, %v3843_v3  ;;  %v3842_v59 = vadd.f32 %v3723_v50, %v3452_v60  ;;  %v13751_v36 = vld [vmem:[#allocation44_spill] sm:$0xff]  ;;  %v13756_v23 = vld [vmem:[#allocation49_spill] sm:$0xff]  ;;  %v13757_v41 = vld [vmem:[#allocation87_spill] sm:$0xff]  ;;  %v11782_v3 = vpop.f32.mrf.mxu1 }
 0x20c   : > { %v1511_v8 = vadd.f32 %v13750_v27, %v11624_v32  ;;  %v2678_v9 = vadd.f32 %v13752_v30, %v13751_v36  ;;  %v9456_v61 = vpop.f32.mrf.mxu0  ;;  %v11764_v26 = vld [vmem:[#allocation3 + $0x49] sm:$0xff]  ;;  %v11777_v7 = vld [vmem:[#allocation3 + $0x51] sm:$0xff]  ;;  %v2677_v57 = vadd.f32 %v13755_v33, %v2287_v51  ;;  %v2289_v60 = vadd.f32 %v13756_v23, %v1899_v15  ;;  %v13759_v50 = vld [vmem:[#allocation18_spill] sm:$0xff] }
 0x20d   : > { %v11766_v16 = vld [vmem:[#allocation3 + $0x48] sm:$0xff]  ;;  %v11768_v18 = vld [vmem:[#allocation3 + $0x50] sm:$0xff]  ;;  %4000 = vst.msk [vmem:[#allocation3 + $0x79] sm:$0xff] %vm3935_vm3, %v3911_v38  ;;  %v3914_v5 = vmax.f32 %v3882_v35, 0.0  ;;  %v3881_v44 = vadd.f32 %v11600_v49, %v3842_v59  ;;  %v3845_v32 = vadd.f32 %v9456_v61, %v3455_v1  ;;  %9495 = vmatprep.mubr.msk.f32.mxu1 %vm3935_vm3, %v11764_v26  ;;  %v13758_v43 = vld [vmem:[#allocation101_spill] sm:$0xff]  ;;  %v3456_v53 = vadd.f32 %v11573_v58, %v3066_v48  ;;  %v11815_v48 = vpop.f32.mrf.mxu1 }
 0x20e   : > { %13753 = vst [vmem:[#allocation30_spill] sm:$0xff] %v11768_v18  ;;  %9545 = vmatprep.mubr.msk.f32.mxu0 %vm3935_vm3, %v11766_v16  ;;  %v3069_v10 = vadd.f32 %v13757_v41, %v2678_v9  ;;  %v3733_v4 = vpop.f32.mrf.mxu0  ;;  %9496 = vmatmul.mubr.msk.f32.gmra.mxu1 %vm3935_vm3, %v11777_v7  ;;  %v3457_v37 = vadd.f32 %v13758_v43, %v3067_v20  ;;  %v13760_v38 = vld [vmem:[#allocation19_spill] sm:$0xff]  ;;  %v13761_v59 = vld [vmem:[#allocation48_spill] sm:$0xff]  ;;  %v13763_v27 = vld [vmem:[#allocation89_spill] sm:$0xff] }
 0x20f   : > { %9546 = vmatmul.mubr.msk.f32.gmra.mxu0 %vm3935_vm3, %v11768_v18  ;;  %4003 = vst.msk [vmem:[#allocation3 + $0x99] sm:$0xff] %vm3935_vm3, %v3914_v5  ;;  %v3913_v46 = vmax.f32 %v3881_v44, 0.0  ;;  %v3884_v51 = vadd.f32 %v11600_v49, %v3845_v32  ;;  %v3844_v1 = vadd.f32 %v3733_v4, %v3454_v52  ;;  %v1901_v11 = vadd.f32 %v13759_v50, %v1511_v8  ;;  %v13762_v56 = vld [vmem:[#allocation47_spill] sm:$0xff]  ;;  %v13766_v44 = vld [vmem:[#allocation50_spill] sm:$0xff]  ;;  %v13767_v33 = vld [vmem:[#allocation53_spill] sm:$0xff] }
 0x210   : > { %v1513_v35 = vadd.f32 %v13760_v38, %v11636_v25  ;;  %v2680_v15 = vadd.f32 %v13762_v56, %v13761_v59  ;;  %v3068_v36 = vadd.f32 %v13763_v27, %v2677_v57  ;;  %v9459_v30 = vpop.f32.mrf.mxu0  ;;  %v11797_v9 = vld [vmem:[#allocation3 + $0x61] sm:$0xff]  ;;  %v11810_v5 = vld [vmem:[#allocation3 + $0x69] sm:$0xff]  ;;  %v2679_v32 = vadd.f32 %v13766_v44, %v2289_v60 }
 0x211   : > { %v11799_v20 = vld [vmem:[#allocation3 + $0x60] sm:$0xff]  ;;  %v11801_v61 = vld [vmem:[#allocation3 + $0x68] sm:$0xff]  ;;  %4002 = vst.msk [vmem:[#allocation3 + $0x91] sm:$0xff] %vm3935_vm3, %v3913_v46  ;;  %v3916_v8 = vmax.f32 %v3884_v51, 0.0  ;;  %v3883_v52 = vadd.f32 %v11600_v49, %v3844_v1  ;;  %v3847_v25 = vadd.f32 %v9459_v30, %v3457_v37  ;;  %9498 = vmatprep.mubr.msk.f32.mxu1 %vm3935_vm3, %v11797_v9  ;;  %v2291_v57 = vadd.f32 %v13767_v33, %v1901_v11  ;;  %v13769_v46 = vld [vmem:[#allocation20_spill] sm:$0xff] }
 0x212   : > { %13764 = vst [vmem:[#allocation33_spill] sm:$0xff] %v11799_v20  ;;  %13765 = vst [vmem:[#allocation76_spill] sm:$0xff] %v11801_v61  ;;  %9548 = vmatprep.mubr.msk.f32.mxu0 %vm3935_vm3, %v11799_v20  ;;  %v3459_v58 = vadd.f32 %v11586_v12, %v3069_v10  ;;  %v3743_v23 = vpop.f32.mrf.mxu0  ;;  %9499 = vmatmul.mubr.msk.f32.gmra.mxu1 %vm3935_vm3, %v11810_v5  ;;  %v13768_v41 = vld [vmem:[#allocation90_spill] sm:$0xff]  ;;  %v1903_v51 = vadd.f32 %v13769_v46, %v1513_v35  ;;  %v13770_v12 = vld [vmem:[#allocation21_spill] sm:$0xff] }
 0x213   : > { %9549 = vmatmul.mubr.msk.f32.gmra.mxu0 %vm3935_vm3, %v11801_v61  ;;  %v3071_v4 = vadd.f32 %v13768_v41, %v2680_v15  ;;  %4005 = vst.msk [vmem:[#allocation3 + $0xb1] sm:$0xff] %vm3935_vm3, %v3916_v8  ;;  %v3915_v43 = vmax.f32 %v3883_v52, 0.0  ;;  %v3886_v60 = vadd.f32 %v11600_v49, %v3847_v25  ;;  %v3846_v37 = vadd.f32 %v3743_v23, %v3456_v53  ;;  %v13771_v1 = vld [vmem:[#allocation52_spill] sm:$0xff]  ;;  %v13772_v50 = vld [vmem:[#allocation51_spill] sm:$0xff]  ;;  %v13777_v25 = vld [vmem:[#allocation57_spill] sm:$0xff]  ;;  %v11848_v23 = vpop.f32.mrf.mxu1 }
 0x214   : > { %v1515_v10 = vadd.f32 %v13770_v12, %v11648_v24  ;;  %v2682_v11 = vadd.f32 %v13772_v50, %v13771_v1  ;;  %v3458_v38 = vadd.f32 %v11607_v34, %v3068_v36  ;;  %v9462_v59 = vpop.f32.mrf.mxu0  ;;  %v11830_v56 = vld [vmem:[#allocation3 + $0x79] sm:$0xff]  ;;  %v13775_v30 = vld [vmem:[#allocation92_spill] sm:$0xff]  ;;  %v11843_v34 = vld [vmem:[#allocation3 + $0x81] sm:$0xff]  ;;  %v2293_v44 = vadd.f32 %v13777_v25, %v1903_v51 }
 0x215   : > { %v11832_v15 = vld [vmem:[#allocation3 + $0x78] sm:$0xff]  ;;  %v11834_v27 = vld [vmem:[#allocation3 + $0x80] sm:$0xff]  ;;  %v3070_v8 = vadd.f32 %v13775_v30, %v2679_v32  ;;  %4004 = vst.msk [vmem:[#allocation3 + $0xa9] sm:$0xff] %vm3935_vm3, %v3915_v43  ;;  %v3918_v35 = vmax.f32 %v3886_v60, 0.0  ;;  %v3885_v53 = vadd.f32 %v11600_v49, %v3846_v37  ;;  %v3849_v24 = vadd.f32 %v9462_v59, %v3459_v58  ;;  %9501 = vmatprep.mubr.msk.f32.mxu1 %vm3935_vm3, %v11830_v56  ;;  %v13780_v51 = vld [vmem:[#allocation23_spill] sm:$0xff] }
 0x216   : > { %13773 = vst [vmem:[#allocation79_spill] sm:$0xff] %v11832_v15  ;;  %13774 = vst [vmem:[#allocation31_spill] sm:$0xff] %v11834_v27  ;;  %9551 = vmatprep.mubr.msk.f32.mxu0 %vm3935_vm3, %v11832_v15  ;;  %v13776_v36 = vld [vmem:[#allocation54_spill] sm:$0xff]  ;;  %v13778_v33 = vld [vmem:[#allocation93_spill] sm:$0xff]  ;;  %v3753_v41 = vpop.f32.mrf.mxu0  ;;  %9502 = vmatmul.mubr.msk.f32.gmra.mxu1 %vm3935_vm3, %v11843_v34  ;;  %v3461_v58 = vadd.f32 %v11629_v17, %v3071_v4  ;;  %v1517_v12 = vadd.f32 %v13780_v51, %v11665_v39 }
 0x217   : > { %v2681_v52 = vadd.f32 %v13776_v36, %v2291_v57  ;;  %v3073_v32 = vadd.f32 %v13778_v33, %v2682_v11  ;;  %9552 = vmatmul.mubr.msk.f32.gmra.mxu0 %vm3935_vm3, %v11834_v27  ;;  %4007 = vst.msk [vmem:[#allocation3 + $0xc9] sm:$0xff] %vm3935_vm3, %v3918_v35  ;;  %v3917_v43 = vmax.f32 %v3885_v53, 0.0  ;;  %v3888_v57 = vadd.f32 %v11600_v49, %v3849_v24  ;;  %v13779_v37 = vld [vmem:[#allocation22_spill] sm:$0xff]  ;;  %v13781_v1 = vld [vmem:[#allocation56_spill] sm:$0xff]  ;;  %v13782_v50 = vld [vmem:[#allocation55_spill] sm:$0xff] }
 0x218   : > { %v3848_v60 = vadd.f32 %v3753_v41, %v3458_v38  ;;  %v1905_v46 = vadd.f32 %v13779_v37, %v1515_v10  ;;  %v2684_v11 = vadd.f32 %v13782_v50, %v13781_v1  ;;  %v13783_v59 = vld [vmem:[#allocation94_spill] sm:$0xff]  ;;  %v9465_v36 = vpop.f32.mrf.mxu0  ;;  %v11863_v25 = vld [vmem:[#allocation3 + $0x91] sm:$0xff]  ;;  %v3460_v35 = vadd.f32 %v11653_v2, %v3070_v8  ;;  %v11881_v8 = vpop.f32.mrf.mxu1  ;;  %v13793_v50 = vld [vmem:[#allocation59_spill] sm:$0xff] }
 0x219   : > { %v3072_v30 = vadd.f32 %v13783_v59, %v2681_v52  ;;  %v11865_v17 = vld [vmem:[#allocation3 + $0x90] sm:$0xff]  ;;  %v11867_v4 = vld [vmem:[#allocation3 + $0x98] sm:$0xff]  ;;  %4006 = vst.msk [vmem:[#allocation3 + $0xc1] sm:$0xff] %vm3935_vm3, %v3917_v43  ;;  %v3920_v10 = vmax.f32 %v3888_v57, 0.0  ;;  %v3851_v39 = vadd.f32 %v9465_v36, %v3461_v58  ;;  %9504 = vmatprep.mubr.msk.f32.mxu1 %vm3935_vm3, %v11863_v25  ;;  %v13787_v24 = vld [vmem:[#allocation58_spill] sm:$0xff]  ;;  %v3463_v2 = vadd.f32 %v11683_v42, %v3073_v32 }
 0x21a   : > { %13784 = vst [vmem:[#allocation4_spill] sm:$0xff] %v11865_v17  ;;  %13785 = vst [vmem:[#allocation10_spill] sm:$0xff] %v11867_v4  ;;  %v3887_v38 = vadd.f32 %v11600_v49, %v3848_v60  ;;  %9554 = vmatprep.mubr.msk.f32.mxu0 %vm3935_vm3, %v11865_v17  ;;  %v11876_v53 = vld [vmem:[#allocation3 + $0x99] sm:$0xff]  ;;  %v2683_v52 = vadd.f32 %v13787_v24, %v2293_v44  ;;  %v3763_v43 = vpop.f32.mrf.mxu0  ;;  %v13789_v58 = vld [vmem:[#allocation95_spill] sm:$0xff] }
 0x21b   : > { %13786 = vst [vmem:[#allocation9_spill] sm:$0xff] %v11876_v53  ;;  %v13788_v33 = vld [vmem:[#allocation61_spill] sm:$0xff]  ;;  %9505 = vmatmul.mubr.msk.f32.gmra.mxu1 %vm3935_vm3, %v11876_v53  ;;  %9555 = vmatmul.mubr.msk.f32.gmra.mxu0 %vm3935_vm3, %v11867_v4  ;;  %v3075_v57 = vadd.f32 %v13789_v58, %v2684_v11  ;;  %4009 = vst.msk [vmem:[#allocation3 + $0xe1] sm:$0xff] %vm3935_vm3, %v3920_v10  ;;  %v3890_v44 = vadd.f32 %v11600_v49, %v3851_v39  ;;  %v13792_v1 = vld [vmem:[#allocation60_spill] sm:$0xff] }
 0x21c   : > { %v2295_v41 = vadd.f32 %v13788_v33, %v1905_v46  ;;  %v3919_v60 = vmax.f32 %v3887_v38, 0.0  ;;  %v3850_v37 = vadd.f32 %v3763_v43, %v3460_v35  ;;  %v13790_v46 = vld [vmem:[#allocation24_spill] sm:$0xff]  ;;  %v13791_v42 = vld [vmem:[#allocation25_spill] sm:$0xff]  ;;  %v2686_v59 = vadd.f32 %v13793_v50, %v13792_v1  ;;  %v9468_v24 = vpop.f32.mrf.mxu0  ;;  %v11898_v11 = vld [vmem:[#allocation3 + $0xa8] sm:$0xff]  ;;  %v11914_v1 = vpop.f32.mrf.mxu1 }
 0x21d   : > { %v1907_v51 = vadd.f32 %v13790_v46, %v1517_v12  ;;  %v1519_v32 = vadd.f32 %v13791_v42, %v11678_v21  ;;  %v3462_v36 = vadd.f32 %v11715_v6, %v3072_v30  ;;  %v11896_v33 = vld [vmem:[#allocation3 + $0xa9] sm:$0xff]  ;;  %13795 = vst [vmem:[#allocation29_spill] sm:$0xff] %v11898_v11  ;;  %v13797_v38 = vld [vmem:[#allocation97_spill] sm:$0xff]  ;;  %v3922_v12 = vmax.f32 %v3890_v44, 0.0  ;;  %9557 = vmatprep.mubr.msk.f32.mxu0 %vm3935_vm3, %v11898_v11  ;;  %v13799_v30 = vld [vmem:[#allocation62_spill] sm:$0xff] }
 0x21e   : > { %13794 = vst [vmem:[#allocation32_spill] sm:$0xff] %v11896_v33  ;;  %v11900_v10 = vld [vmem:[#allocation3 + $0xb0] sm:$0xff]  ;;  %v3074_v39 = vadd.f32 %v13797_v38, %v2683_v52  ;;  %4008 = vst.msk [vmem:[#allocation3 + $0xd9] sm:$0xff] %vm3935_vm3, %v3919_v60  ;;  %v3889_v35 = vadd.f32 %v11600_v49, %v3850_v37  ;;  %v3853_v21 = vadd.f32 %v9468_v24, %v3463_v2  ;;  %9507 = vmatprep.mubr.msk.f32.mxu1 %vm3935_vm3, %v11896_v33  ;;  %v13800_v58 = vld [vmem:[#allocation65_spill] sm:$0xff]  ;;  %v3773_v60 = vpop.f32.mrf.mxu0 }
 0x21f   : > { %13796 = vst [vmem:[#allocation77_spill] sm:$0xff] %v11900_v10  ;;  %v11909_v6 = vld [vmem:[#allocation3 + $0xb1] sm:$0xff]  ;;  %v2685_v43 = vadd.f32 %v13799_v30, %v2295_v41  ;;  %v2297_v46 = vadd.f32 %v13800_v58, %v1907_v51  ;;  %v13801_v42 = vld [vmem:[#allocation98_spill] sm:$0xff]  ;;  %9558 = vmatmul.mubr.msk.f32.gmra.mxu0 %vm3935_vm3, %v11900_v10  ;;  %v3465_v2 = vadd.f32 %v11749_v62, %v3075_v57  ;;  %4011 = vst.msk [vmem:[#allocation3 + $0xf9] sm:$0xff] %vm3935_vm3, %v3922_v12 }
 0x220   : > { %13798 = vst [vmem:[#allocation82_spill] sm:$0xff] %v11909_v6  ;;  %v3077_v52 = vadd.f32 %v13801_v42, %v2686_v59  ;;  %9508 = vmatmul.mubr.msk.f32.gmra.mxu1 %vm3935_vm3, %v11909_v6  ;;  %v3921_v44 = vmax.f32 %v3889_v35, 0.0  ;;  %v3892_v41 = vadd.f32 %v11600_v49, %v3853_v21  ;;  %v3852_v37 = vadd.f32 %v3773_v60, %v3462_v36  ;;  %v13802_v51 = vld [vmem:[#allocation26_spill] sm:$0xff]  ;;  %v13803_v59 = vld [vmem:[#allocation27_spill] sm:$0xff]  ;;  %v13804_v38 = vld [vmem:[#allocation64_spill] sm:$0xff]  ;;  %v9471_v33 = vpop.f32.mrf.mxu0 }
 0x221   : > { %v1909_v50 = vadd.f32 %v13802_v51, %v1519_v32  ;;  %v1521_v24 = vadd.f32 %v13803_v59, %v11690_v29  ;;  %v13805_v30 = vld [vmem:[#allocation63_spill] sm:$0xff]  ;;  %v11931_v62 = vld [vmem:[#allocation3 + $0xc0] sm:$0xff]  ;;  %v3464_v12 = vadd.f32 %v11782_v3, %v3074_v39  ;;  %v3855_v29 = vadd.f32 %v9471_v33, %v3465_v2  ;;  %v13811_v60 = vld [vmem:[#allocation69_spill] sm:$0xff]  ;;  %v9430_v39 = vpop.f32.mrf.mxu1 }
 0x222   : > { %v2688_v58 = vadd.f32 %v13805_v30, %v13804_v38  ;;  %v13806_v42 = vld [vmem:[#allocation99_spill] sm:$0xff]  ;;  %13807 = vst [vmem:[#allocation5_spill] sm:$0xff] %v11931_v62  ;;  %4010 = vst.msk [vmem:[#allocation3 + $0xf1] sm:$0xff] %vm3935_vm3, %v3921_v44  ;;  %v3924_v32 = vmax.f32 %v3892_v41, 0.0  ;;  %v3891_v36 = vadd.f32 %v11600_v49, %v3852_v37  ;;  %9560 = vmatprep.mubr.msk.f32.mxu0 %vm3935_vm3, %v11931_v62  ;;  %v13810_v21 = vld [vmem:[#allocation66_spill] sm:$0xff]  ;;  %v3783_v44 = vpop.f32.mrf.mxu0 }
 0x223   : > { %v3076_v6 = vadd.f32 %v13806_v42, %v2685_v43  ;;  %v11929_v53 = vld [vmem:[#allocation3 + $0xc1] sm:$0xff]  ;;  %v11942_v35 = vld [vmem:[#allocation3 + $0xc9] sm:$0xff]  ;;  %v2687_v43 = vadd.f32 %v13810_v21, %v2297_v46  ;;  %v2299_v51 = vadd.f32 %v13811_v60, %v1909_v50  ;;  %v3467_v3 = vadd.f32 %v11815_v48, %v3077_v52 }
 0x224   : > { %v11933_v57 = vld [vmem:[#allocation3 + $0xc8] sm:$0xff]  ;;  %9510 = vmatprep.mubr.msk.f32.mxu1 %vm3935_vm3, %v11929_v53  ;;  %13809 = vst [vmem:[#allocation34_spill] sm:$0xff] %v11942_v35  ;;  %v13812_v33 = vld [vmem:[#allocation100_spill] sm:$0xff]  ;;  %4013 = vst.msk [vmem:[#allocation3 + $0x111] sm:$0xff] %vm3935_vm3, %v3924_v32  ;;  %v3923_v41 = vmax.f32 %v3891_v36, 0.0  ;;  %v3894_v37 = vadd.f32 %v11600_v49, %v3855_v29  ;;  %v3854_v46 = vadd.f32 %v3783_v44, %v3464_v12  ;;  %v9474_v42 = vpop.f32.mrf.mxu0 }
 0x225   : > { %13808 = vst [vmem:[#allocation6_spill] sm:$0xff] %v11933_v57  ;;  %9511 = vmatmul.mubr.msk.f32.gmra.mxu1 %vm3935_vm3, %v11942_v35  ;;  %9561 = vmatmul.mubr.msk.f32.gmra.mxu0 %vm3935_vm3, %v11933_v57  ;;  %v3079_v2 = vadd.f32 %v13812_v33, %v2688_v58  ;;  %v13813_v59 = vld [vmem:[#allocation28_spill] sm:$0xff]  ;;  %v13815_v48 = vld [vmem:[#allocation67_spill] sm:$0xff]  ;;  %v3466_v30 = vadd.f32 %v11848_v23, %v3076_v6  ;;  %v11958_v21 = vld [vmem:[#allocation3 + $0xd9] sm:$0xff] }
 0x226   : > { %v1911_v50 = vadd.f32 %v13813_v59, %v1521_v24  ;;  %v13814_v38 = vld [vmem:[#allocation68_spill] sm:$0xff]  ;;  %v11960_v60 = vld [vmem:[#allocation3 + $0xd8] sm:$0xff]  ;;  %v11962_v35 = vld [vmem:[#allocation3 + $0xe0] sm:$0xff]  ;;  %v3078_v58 = vadd.f32 %v11564_v40, %v2687_v43  ;;  %4012 = vst.msk [vmem:[#allocation3 + $0x109] sm:$0xff] %vm3935_vm3, %v3923_v41  ;;  %v3926_v32 = vmax.f32 %v3894_v37, 0.0  ;;  %v3893_v12 = vadd.f32 %v11600_v49, %v3854_v46  ;;  %9513 = vmatprep.mubr.msk.f32.mxu1 %vm3935_vm3, %v11958_v21  ;;  %v3423_v43 = vpop.f32.mrf.mxu1  ;;  %v3793_v41 = vpop.f32.mrf.mxu0 }
 0x227   : > { %v2690_v52 = vadd.f32 %v13815_v48, %v13814_v38  ;;  %13816 = vst [vmem:[#allocation37_spill] sm:$0xff] %v11960_v60  ;;  %13817 = vst [vmem:[#allocation85_spill] sm:$0xff] %v11962_v35  ;;  %v3857_v24 = vadd.f32 %v9474_v42, %v3467_v3  ;;  %9563 = vmatprep.mubr.msk.f32.mxu0 %vm3935_vm3, %v11960_v60  ;;  %v11971_v23 = vld [vmem:[#allocation3 + $0xe1] sm:$0xff]  ;;  %v13819_v29 = vld [vmem:[#allocation73_spill] sm:$0xff]  ;;  %v3469_v3 = vadd.f32 %v11881_v8, %v3079_v2 }
 0x228   : > { %v13818_v6 = vld [vmem:[#allocation70_spill] sm:$0xff]  ;;  %v2301_v44 = vadd.f32 %v13819_v29, %v1911_v50  ;;  %4015 = vst.msk [vmem:[#allocation3 + $0x129] sm:$0xff] %vm3935_vm3, %v3926_v32  ;;  %v3925_v37 = vmax.f32 %v3893_v12, 0.0  ;;  %v13821_v59 = vld [vmem:[#allocation72_spill] sm:$0xff]  ;;  %v13822_v50 = vld [vmem:[#allocation71_spill] sm:$0xff]  ;;  %v3468_v8 = vadd.f32 %v11914_v1, %v3078_v58 }
 0x229   : > { %v2689_v36 = vadd.f32 %v13818_v6, %v2299_v51  ;;  %v13820_v33 = vld [vmem:[#allocation102_spill] sm:$0xff]  ;;  %9514 = vmatmul.mubr.msk.f32.gmra.mxu1 %vm3935_vm3, %v11971_v23  ;;  %9564 = vmatmul.mubr.msk.f32.gmra.mxu0 %vm3935_vm3, %v11962_v35  ;;  %v3896_v46 = vadd.f32 %v11600_v49, %v3857_v24  ;;  %v3856_v51 = vadd.f32 %v3793_v41, %v3466_v30  ;;  %v11986_v42 = vld [vmem:[#allocation3 + $0xf1] sm:$0xff] }
 0x22a   : > { %v3081_v40 = vadd.f32 %v13820_v33, %v2690_v52  ;;  %v2692_v38 = vadd.f32 %v13822_v50, %v13821_v59  ;;  %v9477_v52 = vpop.f32.mrf.mxu0  ;;  %v11988_v6 = vld [vmem:[#allocation3 + $0xf0] sm:$0xff]  ;;  %v11990_v29 = vld [vmem:[#allocation3 + $0xf8] sm:$0xff]  ;;  %4014 = vst.msk [vmem:[#allocation3 + $0x121] sm:$0xff] %vm3935_vm3, %v3925_v37  ;;  %9516 = vmatprep.mubr.msk.f32.mxu1 %vm3935_vm3, %v11986_v42  ;;  %v13825_v12 = vld [vmem:[#allocation74_spill] sm:$0xff]  ;;  %v9433_v33 = vpop.f32.mrf.mxu1 }
 0x22b   : > { %v3080_v48 = vadd.f32 %v11575_v28, %v2689_v36  ;;  %13823 = vst [vmem:[#allocation78_spill] sm:$0xff] %v11988_v6  ;;  %13824 = vst [vmem:[#allocation7_spill] sm:$0xff] %v11990_v29  ;;  %v3928_v2 = vmax.f32 %v3896_v46, 0.0  ;;  %v3895_v32 = vadd.f32 %v11600_v49, %v3856_v51  ;;  %v3859_v30 = vadd.f32 %v9477_v52, %v3469_v3  ;;  %v11999_v28 = vld [vmem:[#allocation3 + $0xf9] sm:$0xff] }
 0x22c   : > { %9566 = vmatprep.mubr.msk.f32.mxu0 %vm3935_vm3, %v11988_v6  ;;  %v2691_v24 = vadd.f32 %v13825_v12, %v2301_v44  ;;  %v3471_v36 = vadd.f32 %v9430_v39, %v3081_v40  ;;  %v3803_v41 = vpop.f32.mrf.mxu0  ;;  %v3083_v1 = vadd.f32 %v11581_v63, %v2692_v38 }
 0x22d   : > { %9517 = vmatmul.mubr.msk.f32.gmra.mxu1 %vm3935_vm3, %v11999_v28  ;;  %9567 = vmatmul.mubr.msk.f32.gmra.mxu0 %vm3935_vm3, %v11990_v29  ;;  %4017 = vst.msk [vmem:[#allocation3 + $0x141] sm:$0xff] %vm3935_vm3, %v3928_v2  ;;  %v3927_v58 = vmax.f32 %v3895_v32, 0.0  ;;  %v3898_v3 = vadd.f32 %v11600_v49, %v3859_v30  ;;  %v3858_v37 = vadd.f32 %v3803_v41, %v3468_v8  ;;  %v12009_v44 = vld [vmem:[#allocation3 + $0x109] sm:$0xff] }
 0x22e   : > { %v3470_v46 = vadd.f32 %v3423_v43, %v3080_v48  ;;  %v9480_v51 = vpop.f32.mrf.mxu0  ;;  %v12011_v39 = vld [vmem:[#allocation3 + $0x108] sm:$0xff]  ;;  %v12013_v40 = vld [vmem:[#allocation3 + $0x110] sm:$0xff]  ;;  %v3082_v59 = vadd.f32 %v11588_v19, %v2691_v24  ;;  %9519 = vmatprep.mubr.msk.f32.mxu1 %vm3935_vm3, %v12009_v44  ;;  %v3433_v48 = vpop.f32.mrf.mxu1  ;;  %v3473_v19 = vadd.f32 %v9433_v33, %v3083_v1 }
 0x22f   : > { %13826 = vst [vmem:[#allocation8_spill] sm:$0xff] %v12011_v39  ;;  %13827 = vst [vmem:[#allocation12_spill] sm:$0xff] %v12013_v40  ;;  %v3930_v50 = vmax.f32 %v3898_v3, 0.0  ;;  %v3897_v63 = vadd.f32 %v11600_v49, %v3858_v37  ;;  %v3861_v38 = vadd.f32 %v9480_v51, %v3471_v36  ;;  %9569 = vmatprep.mubr.msk.f32.mxu0 %vm3935_vm3, %v12011_v39  ;;  %v12022_v43 = vld [vmem:[#allocation3 + $0x111] sm:$0xff]  ;;  %v12042_v1 = vld [vmem:[#allocation3 + $0x129] sm:$0xff] }
 0x230   : > { %4016 = vst.msk [vmem:[#allocation3 + $0x139] sm:$0xff] %vm3935_vm3, %v3927_v58  ;;  %v3813_v52 = vpop.f32.mrf.mxu0  ;;  %v3472_v41 = vadd.f32 %v3433_v48, %v3082_v59 }
 0x231   : > { %9520 = vmatmul.mubr.msk.f32.gmra.mxu1 %vm3935_vm3, %v12022_v43  ;;  %9570 = vmatmul.mubr.msk.f32.gmra.mxu0 %vm3935_vm3, %v12013_v40  ;;  %4019 = vst.msk [vmem:[#allocation3 + $0x159] sm:$0xff] %vm3935_vm3, %v3930_v50  ;;  %v3929_v8 = vmax.f32 %v3897_v63, 0.0  ;;  %v3900_v2 = vadd.f32 %v11600_v49, %v3861_v38  ;;  %v3860_v32 = vadd.f32 %v3813_v52, %v3470_v46  ;;  %v12030_v12 = vld [vmem:[#allocation3 + $0x121] sm:$0xff] }
 0x232   : > { %v9483_v30 = vpop.f32.mrf.mxu0  ;;  %v12032_v24 = vld [vmem:[#allocation3 + $0x120] sm:$0xff]  ;;  %v12034_v36 = vld [vmem:[#allocation3 + $0x128] sm:$0xff]  ;;  %9522 = vmatprep.mubr.msk.f32.mxu1 %vm3935_vm3, %v12030_v12 }
 0x233   : > { %13828 = vst [vmem:[#allocation11_spill] sm:$0xff] %v12032_v24  ;;  %13829 = vst [vmem:[#allocation36_spill] sm:$0xff] %v12034_v36  ;;  %v3932_v58 = vmax.f32 %v3900_v2, 0.0  ;;  %v3899_v3 = vadd.f32 %v11600_v49, %v3860_v32  ;;  %v3863_v33 = vadd.f32 %v9483_v30, %v3473_v19  ;;  %9572 = vmatprep.mubr.msk.f32.mxu0 %vm3935_vm3, %v12032_v24 }
 0x234   : > { %4018 = vst.msk [vmem:[#allocation3 + $0x151] sm:$0xff] %vm3935_vm3, %v3929_v8  ;;  %v3823_v37 = vpop.f32.mrf.mxu0  ;;  %v12062_v19 = vld [vmem:[#allocation3 + $0x141] sm:$0xff] }
 0x235   : > { %9523 = vmatmul.mubr.msk.f32.gmra.mxu1 %vm3935_vm3, %v12042_v1  ;;  %9573 = vmatmul.mubr.msk.f32.gmra.mxu0 %vm3935_vm3, %v12034_v36  ;;  %4021 = vst.msk [vmem:[#allocation3 + $0x171] sm:$0xff] %vm3935_vm3, %v3932_v58  ;;  %v3931_v46 = vmax.f32 %v3899_v3, 0.0  ;;  %v3902_v51 = vadd.f32 %v11600_v49, %v3863_v33  ;;  %v3862_v59 = vadd.f32 %v3823_v37, %v3472_v41  ;;  %v4733_v41 = vld [vmem:[#allocation3 + $0x2] sm:$0xff] }
 0x237   : > { %v12050_v50 = vld [vmem:[#allocation3 + $0x139] sm:$0xff]  ;;  %4020 = vst.msk [vmem:[#allocation3 + $0x169] sm:$0xff] %vm3935_vm3, %v3931_v46  ;;  %v3934_v48 = vmax.f32 %v3902_v51, 0.0  ;;  %v3901_v52 = vadd.f32 %v11600_v49, %v3862_v59  ;;  %v4734_v46 = vld [vmem:[#allocation3 + $0xa] sm:$0xff]  ;;  %v9538_v59 = vpop.f32.mrf.mxu0 }
 0x238   : > { %v12052_v63 = vld [vmem:[#allocation3 + $0x138] sm:$0xff]  ;;  %v12054_v38 = vld [vmem:[#allocation3 + $0x140] sm:$0xff]  ;;  %9525 = vmatprep.mubr.msk.f32.mxu1 %vm3935_vm3, %v12050_v50 }
 0x239   : > { %13830 = vst [vmem:[#allocation35_spill] sm:$0xff] %v12052_v63  ;;  %13831 = vst [vmem:[#allocation88_spill] sm:$0xff] %v12054_v38  ;;  %9575 = vmatprep.mubr.msk.f32.mxu0 %vm3935_vm3, %v12052_v63  ;;  %9526 = vmatmul.mubr.msk.f32.gmra.mxu1 %vm3935_vm3, %v12062_v19  ;;  %v3933_v8 = vmax.f32 %v3901_v52, 0.0  ;;  %v12080_v30 = vld [vmem:[#allocation3 + $0x159] sm:$0xff] }
 0x23a   : > { %9576 = vmatmul.mubr.msk.f32.gmra.mxu0 %vm3935_vm3, %v12054_v38  ;;  %4023 = vst.msk [vmem:[#allocation3 + $0x189] sm:$0xff] %vm3935_vm3, %v3934_v48  ;;  %v12108_v48 = vld [vmem:[#allocation3 + $0x1a] sm:$0xff] }
 0x23b   : > { %v12069_v2 = vld [vmem:[#allocation3 + $0x151] sm:$0xff]  ;;  %4022 = vst.msk [vmem:[#allocation3 + $0x181] sm:$0xff] %vm3935_vm3, %v3933_v8  ;;  %v12113_v52 = vld [vmem:[%s13478_s3 + $0x30] sm:$0xff] }
 0x23c   : > { %v12071_v49 = vld [vmem:[#allocation3 + $0x150] sm:$0xff]  ;;  %v12073_v32 = vld [vmem:[#allocation3 + $0x158] sm:$0xff]  ;;  %9528 = vmatprep.mubr.msk.f32.mxu1 %vm3935_vm3, %v12069_v2 }
 0x23d   : > { %13832 = vst [vmem:[#allocation80_spill] sm:$0xff] %v12071_v49  ;;  %13833 = vst [vmem:[#allocation38_spill] sm:$0xff] %v12073_v32  ;;  %9578 = vmatprep.mubr.msk.f32.mxu0 %vm3935_vm3, %v12071_v49  ;;  %9529 = vmatmul.mubr.msk.f32.gmra.mxu1 %vm3935_vm3, %v12080_v30  ;;  %v12096_v37 = vld [vmem:[#allocation3 + $0x171] sm:$0xff] }
 0x23e   : > { %9579 = vmatmul.mubr.msk.f32.gmra.mxu0 %vm3935_vm3, %v12073_v32  ;;  %v12086_v58 = vld [vmem:[#allocation3 + $0x169] sm:$0xff] }
 0x23f   : > { %v12088_v3 = vld [vmem:[#allocation3 + $0x168] sm:$0xff]  ;;  %v12090_v33 = vld [vmem:[#allocation3 + $0x170] sm:$0xff]  ;;  %9531 = vmatprep.mubr.msk.f32.mxu1 %vm3935_vm3, %v12086_v58 }
 0x240   : > { %13834 = vst [vmem:[#allocation41_spill] sm:$0xff] %v12088_v3  ;;  %9581 = vmatprep.mubr.msk.f32.mxu0 %vm3935_vm3, %v12088_v3 }
 0x241   : > { %9532 = vmatmul.mubr.msk.f32.gmra.mxu1 %vm3935_vm3, %v12096_v37 }
 0x242   : > { %9582 = vmatmul.mubr.msk.f32.gmra.mxu0 %vm3935_vm3, %v12090_v33  ;;  %9586 = vmatprep.mubr.msk.f32.mxu1 %vm3935_vm3, %v4733_v41  ;;  %v13836_v41 = vld [vmem:[#allocation75_spill] sm:$0xff] }
 0x243   : > { %9636 = vmatprep.mubr.msk.f32.mxu0 %vm3935_vm3, %v11699_v31  ;;  %v12118_v31 = vld [vmem:[%s13478_s3 + $0x38] sm:$0xff] }
 0x245   : > { %v9488_v51 = vpop.f32.mrf.mxu1  ;;  %9587 = vmatmul.mubr.msk.f32.vlgmr.msra.gmra.mxu1 %vm3935_vm3, %v4734_v46  ;;  %v12136_v46 = vld [vmem:[#allocation3 + $0x32] sm:$0xff] }
 0x246   : > { %9637 = vmatmul.mubr.msk.f32.vlgmr.msra.gmra.mxu0 %vm3935_vm3, %v11701_v55  ;;  %v12120_v8 = vadd.f32 %v9538_v59, %v9488_v51  ;;  %9685 = vmatpush3.msra.mxu1 %v13836_v41  ;;  %v12128_v55 = vld [vmem:[#allocation3 + $0x22] sm:$0xff]  ;;  %v12148_v51 = vld [vmem:[#allocation3 + $0x4a] sm:$0xff]  ;;  %v12154_v59 = vld [vmem:[#allocation3 + $0x52] sm:$0xff] }
 0x247   : > { %9589 = vmatprep.mubr.msk.f32.mxu1 %vm3935_vm3, %v12108_v48  ;;  %9639 = vmatprep.mubr.msk.f32.mxu0 %vm3935_vm3, %v11733_v14  ;;  %v12160_v41 = vld [vmem:[#allocation3 + $0x62] sm:$0xff] }
 0x248   : > { %13835 = vst [vmem:[#allocation81_spill] sm:$0xff] %v12120_v8  ;;  %9735 = vmatpush3.msra.mxu0 %v11661_v54  ;;  %9784 = vmatprep.subr.mxu1 %v12113_v52  ;;  %v12142_v54 = vld [vmem:[#allocation3 + $0x3a] sm:$0xff]  ;;  %v12166_v8 = vld [vmem:[#allocation3 + $0x6a] sm:$0xff] }
 0x249   : > { %9834 = vmatprep.subr.mxu0 %v12118_v31  ;;  %9590 = vmatmul.mubr.msk.f32.gmra.mxu1 %vm3935_vm3, %v12128_v55 }
 0x24a   : > { %9640 = vmatmul.mubr.msk.f32.gmra.mxu0 %vm3935_vm3, %v11735_v0  ;;  %9592 = vmatprep.mubr.msk.f32.mxu1 %vm3935_vm3, %v12136_v46 }
 0x24b   : > { %9642 = vmatprep.mubr.msk.f32.mxu0 %vm3935_vm3, %v11766_v16 }
 0x24d   : > { %9593 = vmatmul.mubr.msk.f32.gmra.mxu1 %vm3935_vm3, %v12142_v54 }
 0x24e   : > { %9643 = vmatmul.mubr.msk.f32.gmra.mxu0 %vm3935_vm3, %v11768_v18  ;;  %9595 = vmatprep.mubr.msk.f32.mxu1 %vm3935_vm3, %v12148_v51  ;;  %v12294_v18 = vld [vmem:[#allocation3 + $0x180] sm:$0xff] }
 0x24f   : > { %9645 = vmatprep.mubr.msk.f32.mxu0 %vm3935_vm3, %v11799_v20  ;;  %v12172_v20 = vld [vmem:[#allocation3 + $0x7a] sm:$0xff]  ;;  %13837 = vst [vmem:[#allocation91_spill] sm:$0xff] %v12294_v18 }
 0x251   : > { %9596 = vmatmul.mubr.msk.f32.gmra.mxu1 %vm3935_vm3, %v12154_v59 }
 0x252   : > { %9646 = vmatmul.mubr.msk.f32.gmra.mxu0 %vm3935_vm3, %v11801_v61  ;;  %9598 = vmatprep.mubr.msk.f32.mxu1 %vm3935_vm3, %v12160_v41  ;;  %v12178_v61 = vld [vmem:[#allocation3 + $0x82] sm:$0xff] }
 0x253   : > { %9648 = vmatprep.mubr.msk.f32.mxu0 %vm3935_vm3, %v11832_v15  ;;  %v12184_v15 = vld [vmem:[#allocation3 + $0x92] sm:$0xff] }
 0x255   : > { %9599 = vmatmul.mubr.msk.f32.gmra.mxu1 %vm3935_vm3, %v12166_v8 }
 0x256   : > { %9649 = vmatmul.mubr.msk.f32.gmra.mxu0 %vm3935_vm3, %v11834_v27  ;;  %9601 = vmatprep.mubr.msk.f32.mxu1 %vm3935_vm3, %v12172_v20  ;;  %v12190_v27 = vld [vmem:[#allocation3 + $0x9a] sm:$0xff] }
 0x257   : > { %9651 = vmatprep.mubr.msk.f32.mxu0 %vm3935_vm3, %v11865_v17  ;;  %v12196_v17 = vld [vmem:[#allocation3 + $0xaa] sm:$0xff] }
 0x259   : > { %9602 = vmatmul.mubr.msk.f32.gmra.mxu1 %vm3935_vm3, %v12178_v61 }
 0x25a   : > { %9652 = vmatmul.mubr.msk.f32.gmra.mxu0 %vm3935_vm3, %v11867_v4  ;;  %9604 = vmatprep.mubr.msk.f32.mxu1 %vm3935_vm3, %v12184_v15  ;;  %v12202_v4 = vld [vmem:[#allocation3 + $0xb2] sm:$0xff] }
 0x25b   : > { %9654 = vmatprep.mubr.msk.f32.mxu0 %vm3935_vm3, %v11898_v11  ;;  %v12208_v11 = vld [vmem:[#allocation3 + $0xc2] sm:$0xff] }
 0x25d   : > { %9605 = vmatmul.mubr.msk.f32.gmra.mxu1 %vm3935_vm3, %v12190_v27 }
 0x25e   : > { %9655 = vmatmul.mubr.msk.f32.gmra.mxu0 %vm3935_vm3, %v11900_v10  ;;  %9607 = vmatprep.mubr.msk.f32.mxu1 %vm3935_vm3, %v12196_v17  ;;  %v12214_v10 = vld [vmem:[#allocation3 + $0xca] sm:$0xff] }
 0x25f   : > { %9657 = vmatprep.mubr.msk.f32.mxu0 %vm3935_vm3, %v11931_v62  ;;  %v12220_v62 = vld [vmem:[#allocation3 + $0xda] sm:$0xff] }
 0x261   : > { %9608 = vmatmul.mubr.msk.f32.gmra.mxu1 %vm3935_vm3, %v12202_v4 }
 0x262   : > { %9658 = vmatmul.mubr.msk.f32.gmra.mxu0 %vm3935_vm3, %v11933_v57  ;;  %9610 = vmatprep.mubr.msk.f32.mxu1 %vm3935_vm3, %v12208_v11  ;;  %v12226_v57 = vld [vmem:[#allocation3 + $0xe2] sm:$0xff] }
 0x263   : > { %9660 = vmatprep.mubr.msk.f32.mxu0 %vm3935_vm3, %v11960_v60  ;;  %v12232_v60 = vld [vmem:[#allocation3 + $0xf2] sm:$0xff] }
 0x265   : > { %9611 = vmatmul.mubr.msk.f32.gmra.mxu1 %vm3935_vm3, %v12214_v10 }
 0x266   : > { %9661 = vmatmul.mubr.msk.f32.gmra.mxu0 %vm3935_vm3, %v11962_v35  ;;  %9613 = vmatprep.mubr.msk.f32.mxu1 %vm3935_vm3, %v12220_v62  ;;  %v12238_v35 = vld [vmem:[#allocation3 + $0xfa] sm:$0xff] }
 0x267   : > { %9663 = vmatprep.mubr.msk.f32.mxu0 %vm3935_vm3, %v11988_v6  ;;  %v12244_v6 = vld [vmem:[#allocation3 + $0x10a] sm:$0xff] }
 0x269   : > { %9614 = vmatmul.mubr.msk.f32.gmra.mxu1 %vm3935_vm3, %v12226_v57 }
 0x26a   : > { %9664 = vmatmul.mubr.msk.f32.gmra.mxu0 %vm3935_vm3, %v11990_v29  ;;  %9616 = vmatprep.mubr.msk.f32.mxu1 %vm3935_vm3, %v12232_v60  ;;  %v12250_v29 = vld [vmem:[#allocation3 + $0x112] sm:$0xff] }
 0x26b   : > { %9666 = vmatprep.mubr.msk.f32.mxu0 %vm3935_vm3, %v12011_v39  ;;  %v12256_v39 = vld [vmem:[#allocation3 + $0x122] sm:$0xff] }
 0x26d   : > { %9617 = vmatmul.mubr.msk.f32.gmra.mxu1 %vm3935_vm3, %v12238_v35 }
 0x26e   : > { %9667 = vmatmul.mubr.msk.f32.gmra.mxu0 %vm3935_vm3, %v12013_v40  ;;  %9619 = vmatprep.mubr.msk.f32.mxu1 %vm3935_vm3, %v12244_v6  ;;  %v12262_v40 = vld [vmem:[#allocation3 + $0x12a] sm:$0xff] }
 0x26f   : > { %9669 = vmatprep.mubr.msk.f32.mxu0 %vm3935_vm3, %v12032_v24  ;;  %v12268_v24 = vld [vmem:[#allocation3 + $0x13a] sm:$0xff] }
 0x271   : > { %9620 = vmatmul.mubr.msk.f32.gmra.mxu1 %vm3935_vm3, %v12250_v29 }
 0x272   : > { %9670 = vmatmul.mubr.msk.f32.gmra.mxu0 %vm3935_vm3, %v12034_v36  ;;  %9622 = vmatprep.mubr.msk.f32.mxu1 %vm3935_vm3, %v12256_v39  ;;  %v12274_v36 = vld [vmem:[#allocation3 + $0x142] sm:$0xff] }
 0x273   : > { %9672 = vmatprep.mubr.msk.f32.mxu0 %vm3935_vm3, %v12052_v63  ;;  %v12280_v63 = vld [vmem:[#allocation3 + $0x152] sm:$0xff] }
 0x275   : > { %9623 = vmatmul.mubr.msk.f32.gmra.mxu1 %vm3935_vm3, %v12262_v40 }
 0x276   : > { %9673 = vmatmul.mubr.msk.f32.gmra.mxu0 %vm3935_vm3, %v12054_v38  ;;  %9625 = vmatprep.mubr.msk.f32.mxu1 %vm3935_vm3, %v12268_v24  ;;  %v12286_v38 = vld [vmem:[#allocation3 + $0x15a] sm:$0xff] }
 0x277   : > { %9675 = vmatprep.mubr.msk.f32.mxu0 %vm3935_vm3, %v12071_v49  ;;  %v12292_v49 = vld [vmem:[#allocation3 + $0x16a] sm:$0xff] }
 0x279   : > { %9626 = vmatmul.mubr.msk.f32.gmra.mxu1 %vm3935_vm3, %v12274_v36 }
 0x27a   : > { %9676 = vmatmul.mubr.msk.f32.gmra.mxu0 %vm3935_vm3, %v12073_v32  ;;  %9628 = vmatprep.mubr.msk.f32.mxu1 %vm3935_vm3, %v12280_v63  ;;  %v12300_v32 = vld [vmem:[#allocation3 + $0x172] sm:$0xff] }
 0x27b   : > { %9678 = vmatprep.mubr.msk.f32.mxu0 %vm3935_vm3, %v12088_v3  ;;  %v12302_v3 = vld [vmem:[#allocation3 + $0x188] sm:$0xff] }
 0x27d   : > { %9629 = vmatmul.mubr.msk.f32.gmra.mxu1 %vm3935_vm3, %v12286_v38 }
 0x27e   : > { %9679 = vmatmul.mubr.msk.f32.gmra.mxu0 %vm3935_vm3, %v12090_v33  ;;  %9631 = vmatprep.mubr.msk.f32.mxu1 %vm3935_vm3, %v12292_v49 }
 0x27f   : > { %9681 = vmatprep.mubr.msk.f32.mxu0 %vm3935_vm3, %v12294_v18  ;;  %v12319_v18 = vld [vmem:[%s13478_s3 + $0x40] sm:$0xff] }
 0x281   : > { %9632 = vmatmul.mubr.msk.f32.gmra.mxu1 %vm3935_vm3, %v12300_v32 }
 0x282   : > { %9682 = vmatmul.mubr.msk.f32.gmra.mxu0 %vm3935_vm3, %v12302_v3  ;;  %9686 = vmatprep.mubr.msk.f32.mxu1 %vm3935_vm3, %v11697_v13  ;;  %v13838_v13 = vld [vmem:[#allocation9_spill] sm:$0xff] }
 0x283   : > { %9736 = vmatprep.mubr.msk.f32.mxu0 %vm3935_vm3, %v12108_v48  ;;  %v13840_v48 = vld [vmem:[#allocation82_spill] sm:$0xff] }
 0x285   : > { %9687 = vmatmul.mubr.msk.f32.vlgmr.msra.gmra.mxu1 %vm3935_vm3, %v11710_v45  ;;  %v13839_v45 = vld [vmem:[#allocation32_spill] sm:$0xff] }
 0x286   : > { %9737 = vmatmul.mubr.msk.f32.vlgmr.msra.gmra.mxu0 %vm3935_vm3, %v12128_v55  ;;  %9785 = vmatpush3.msra.mxu1 %v12113_v52  ;;  %v13841_v52 = vld [vmem:[#allocation34_spill] sm:$0xff]  ;;  %v13844_v55 = vld [vmem:[#allocation76_spill] sm:$0xff] }
 0x287   : > { %9689 = vmatprep.mubr.msk.f32.mxu1 %vm3935_vm3, %v11731_v47  ;;  %9739 = vmatprep.mubr.msk.f32.mxu0 %vm3935_vm3, %v12136_v46 }
 0x288   : > { %9835 = vmatpush3.msra.mxu0 %v12118_v31  ;;  %9884 = vmatprep.subr.mxu1 %v12319_v18 }
 0x289   : > { %9690 = vmatmul.mubr.msk.f32.gmra.mxu1 %vm3935_vm3, %v11744_v22 }
 0x28a   : > { %9740 = vmatmul.mubr.msk.f32.gmra.mxu0 %vm3935_vm3, %v12142_v54  ;;  %9692 = vmatprep.mubr.msk.f32.mxu1 %vm3935_vm3, %v11764_v26 }
 0x28b   : > { %9742 = vmatprep.mubr.msk.f32.mxu0 %vm3935_vm3, %v12148_v51 }
 0x28d   : > { %9693 = vmatmul.mubr.msk.f32.gmra.mxu1 %vm3935_vm3, %v11777_v7 }
 0x28e   : > { %9743 = vmatmul.mubr.msk.f32.gmra.mxu0 %vm3935_vm3, %v12154_v59  ;;  %9695 = vmatprep.mubr.msk.f32.mxu1 %vm3935_vm3, %v11797_v9 }
 0x28f   : > { %9745 = vmatprep.mubr.msk.f32.mxu0 %vm3935_vm3, %v12160_v41 }
 0x291   : > { %9696 = vmatmul.mubr.msk.f32.gmra.mxu1 %vm3935_vm3, %v11810_v5 }
 0x292   : > { %9746 = vmatmul.mubr.msk.f32.gmra.mxu0 %vm3935_vm3, %v12166_v8  ;;  %9698 = vmatprep.mubr.msk.f32.mxu1 %vm3935_vm3, %v11830_v56 }
 0x293   : > { %9748 = vmatprep.mubr.msk.f32.mxu0 %vm3935_vm3, %v12172_v20 }
 0x295   : > { %9699 = vmatmul.mubr.msk.f32.gmra.mxu1 %vm3935_vm3, %v11843_v34 }
 0x296   : > { %9749 = vmatmul.mubr.msk.f32.gmra.mxu0 %vm3935_vm3, %v12178_v61  ;;  %9701 = vmatprep.mubr.msk.f32.mxu1 %vm3935_vm3, %v11863_v25 }
 0x297   : > { %9751 = vmatprep.mubr.msk.f32.mxu0 %vm3935_vm3, %v12184_v15 }
 0x299   : > { %9702 = vmatmul.mubr.msk.f32.gmra.mxu1 %vm3935_vm3, %v13838_v13 }
 0x29a   : > { %9752 = vmatmul.mubr.msk.f32.gmra.mxu0 %vm3935_vm3, %v12190_v27  ;;  %9704 = vmatprep.mubr.msk.f32.mxu1 %vm3935_vm3, %v13839_v45 }
 0x29b   : > { %9754 = vmatprep.mubr.msk.f32.mxu0 %vm3935_vm3, %v12196_v17 }
 0x29d   : > { %9705 = vmatmul.mubr.msk.f32.gmra.mxu1 %vm3935_vm3, %v13840_v48 }
 0x29e   : > { %9755 = vmatmul.mubr.msk.f32.gmra.mxu0 %vm3935_vm3, %v12202_v4  ;;  %9707 = vmatprep.mubr.msk.f32.mxu1 %vm3935_vm3, %v11929_v53 }
 0x29f   : > { %9757 = vmatprep.mubr.msk.f32.mxu0 %vm3935_vm3, %v12208_v11 }
 0x2a1   : > { %9708 = vmatmul.mubr.msk.f32.gmra.mxu1 %vm3935_vm3, %v13841_v52 }
 0x2a2   : > { %9758 = vmatmul.mubr.msk.f32.gmra.mxu0 %vm3935_vm3, %v12214_v10  ;;  %9710 = vmatprep.mubr.msk.f32.mxu1 %vm3935_vm3, %v11958_v21 }
 0x2a3   : > { %9760 = vmatprep.mubr.msk.f32.mxu0 %vm3935_vm3, %v12220_v62 }
 0x2a5   : > { %9711 = vmatmul.mubr.msk.f32.gmra.mxu1 %vm3935_vm3, %v11971_v23 }
 0x2a6   : > { %9761 = vmatmul.mubr.msk.f32.gmra.mxu0 %vm3935_vm3, %v12226_v57  ;;  %9713 = vmatprep.mubr.msk.f32.mxu1 %vm3935_vm3, %v11986_v42 }
 0x2a7   : > { %9763 = vmatprep.mubr.msk.f32.mxu0 %vm3935_vm3, %v12232_v60 }
 0x2a9   : > { %9714 = vmatmul.mubr.msk.f32.gmra.mxu1 %vm3935_vm3, %v11999_v28 }
 0x2aa   : > { %9764 = vmatmul.mubr.msk.f32.gmra.mxu0 %vm3935_vm3, %v12238_v35  ;;  %9716 = vmatprep.mubr.msk.f32.mxu1 %vm3935_vm3, %v12009_v44 }
 0x2ab   : > { %9766 = vmatprep.mubr.msk.f32.mxu0 %vm3935_vm3, %v12244_v6 }
 0x2ad   : > { %9717 = vmatmul.mubr.msk.f32.gmra.mxu1 %vm3935_vm3, %v12022_v43 }
 0x2ae   : > { %9767 = vmatmul.mubr.msk.f32.gmra.mxu0 %vm3935_vm3, %v12250_v29  ;;  %9719 = vmatprep.mubr.msk.f32.mxu1 %vm3935_vm3, %v12030_v12  ;;  %v12436_v29 = vld [vmem:[#allocation3 + $0x181] sm:$0xff] }
 0x2af   : > { %9769 = vmatprep.mubr.msk.f32.mxu0 %vm3935_vm3, %v12256_v39 }
 0x2b1   : > { %9720 = vmatmul.mubr.msk.f32.gmra.mxu1 %vm3935_vm3, %v12042_v1 }
 0x2b2   : > { %9770 = vmatmul.mubr.msk.f32.gmra.mxu0 %vm3935_vm3, %v12262_v40  ;;  %9722 = vmatprep.mubr.msk.f32.mxu1 %vm3935_vm3, %v12050_v50  ;;  %v12438_v40 = vld [vmem:[#allocation3 + $0x182] sm:$0xff] }
 0x2b3   : > { %9772 = vmatprep.mubr.msk.f32.mxu0 %vm3935_vm3, %v12268_v24  ;;  %v12444_v24 = vld [vmem:[#allocation3 + $0x189] sm:$0xff] }
 0x2b5   : > { %9723 = vmatmul.mubr.msk.f32.gmra.mxu1 %vm3935_vm3, %v12062_v19 }
 0x2b6   : > { %9773 = vmatmul.mubr.msk.f32.gmra.mxu0 %vm3935_vm3, %v12274_v36  ;;  %9725 = vmatprep.mubr.msk.f32.mxu1 %vm3935_vm3, %v12069_v2  ;;  %v12446_v36 = vld [vmem:[#allocation3 + $0x18a] sm:$0xff] }
 0x2b7   : > { %9775 = vmatprep.mubr.msk.f32.mxu0 %vm3935_vm3, %v12280_v63  ;;  %v12463_v63 = vpop.f32.mrf.mxu1 }
 0x2b9   : > { %9726 = vmatmul.mubr.msk.f32.gmra.mxu1 %vm3935_vm3, %v12080_v30 }
 0x2ba   : > { %9776 = vmatmul.mubr.msk.f32.gmra.mxu0 %vm3935_vm3, %v12286_v38  ;;  %9728 = vmatprep.mubr.msk.f32.mxu1 %vm3935_vm3, %v12086_v58  ;;  %v12465_v38 = vpop.f32.mrf.mxu0 }
 0x2bb   : > { %9778 = vmatprep.mubr.msk.f32.mxu0 %vm3935_vm3, %v12292_v49  ;;  %v13842_v49 = vld [vmem:[#allocation30_spill] sm:$0xff] }
 0x2bd   : > { %9729 = vmatmul.mubr.msk.f32.gmra.mxu1 %vm3935_vm3, %v12096_v37 }
 0x2be   : > { %9779 = vmatmul.mubr.msk.f32.gmra.mxu0 %vm3935_vm3, %v12300_v32  ;;  %9731 = vmatprep.mubr.msk.f32.mxu1 %vm3935_vm3, %v12436_v29 }
 0x2bf   : > { %9781 = vmatprep.mubr.msk.f32.mxu0 %vm3935_vm3, %v12438_v40 }
 0x2c1   : > { %9732 = vmatmul.mubr.msk.f32.gmra.mxu1 %vm3935_vm3, %v12444_v24 }
 0x2c2   : > { %9782 = vmatmul.mubr.msk.f32.gmra.mxu0 %vm3935_vm3, %v12446_v36  ;;  %9786 = vmatprep.mubr.msk.f32.mxu1 %vm3935_vm3, %v11733_v14 }
 0x2c3   : > { %9836 = vmatprep.mubr.msk.f32.mxu0 %vm3935_vm3, %v11731_v47 }
 0x2c5   : > { %9787 = vmatmul.mubr.msk.f32.vlgmr.msra.gmra.mxu1 %vm3935_vm3, %v11735_v0 }
 0x2c6   : > { %9837 = vmatmul.mubr.msk.f32.vlgmr.msra.gmra.mxu0 %vm3935_vm3, %v11744_v22  ;;  %9885 = vmatpush3.msra.mxu1 %v12319_v18  ;;  %v9491_v14 = vpop.f32.mrf.mxu1  ;;  %v13843_v22 = vld [vmem:[#allocation33_spill] sm:$0xff] }
 0x2c7   : > { %9789 = vmatprep.mubr.msk.f32.mxu1 %vm3935_vm3, %v11766_v16  ;;  %9839 = vmatprep.mubr.msk.f32.mxu0 %vm3935_vm3, %v11764_v26  ;;  %v9541_v47 = vpop.f32.mrf.mxu0 }
 0x2c8   : > { %v12473_v0 = vadd.f32 %v9541_v47, %v9491_v14  ;;  %v4263_v16 = vpop.f32.mrf.mxu1  ;;  %v13845_v14 = vld [vmem:[#allocation79_spill] sm:$0xff] }
 0x2c9   : > { %9790 = vmatmul.mubr.msk.f32.gmra.mxu1 %vm3935_vm3, %v13842_v49  ;;  %v4584_v18 = vpop.f32.mrf.mxu0 }
 0x2ca   : > { %9840 = vmatmul.mubr.msk.f32.gmra.mxu0 %vm3935_vm3, %v11777_v7  ;;  %9792 = vmatprep.mubr.msk.f32.mxu1 %vm3935_vm3, %v13843_v22  ;;  %v12479_v32 = vadd.f32 %v4584_v18, %v4263_v16  ;;  %v9494_v26 = vpop.f32.mrf.mxu1  ;;  %v13846_v18 = vld [vmem:[#allocation31_spill] sm:$0xff] }
 0x2cb   : > { %9842 = vmatprep.mubr.msk.f32.mxu0 %vm3935_vm3, %v11797_v9  ;;  %v9544_v31 = vpop.f32.mrf.mxu0 }
 0x2cc   : > { %v12485_v7 = vadd.f32 %v9544_v31, %v9494_v26  ;;  %v4273_v9 = vpop.f32.mrf.mxu1  ;;  %v13847_v26 = vld [vmem:[#allocation4_spill] sm:$0xff] }
 0x2cd   : > { %9793 = vmatmul.mubr.msk.f32.gmra.mxu1 %vm3935_vm3, %v13844_v55  ;;  %v4594_v47 = vpop.f32.mrf.mxu0 }
 0x2ce   : > { %9843 = vmatmul.mubr.msk.f32.gmra.mxu0 %vm3935_vm3, %v11810_v5  ;;  %9795 = vmatprep.mubr.msk.f32.mxu1 %vm3935_vm3, %v13845_v14  ;;  %v12491_v49 = vadd.f32 %v4594_v47, %v4273_v9  ;;  %v9497_v22 = vpop.f32.mrf.mxu1  ;;  %v13848_v47 = vld [vmem:[#allocation10_spill] sm:$0xff] }
 0x2cf   : > { %9845 = vmatprep.mubr.msk.f32.mxu0 %vm3935_vm3, %v11830_v56  ;;  %v9547_v16 = vpop.f32.mrf.mxu0 }
 0x2d0   : > { %v12497_v5 = vadd.f32 %v9547_v16, %v9497_v22  ;;  %v4283_v56 = vpop.f32.mrf.mxu1  ;;  %v13849_v22 = vld [vmem:[#allocation29_spill] sm:$0xff] }
 0x2d1   : > { %9796 = vmatmul.mubr.msk.f32.gmra.mxu1 %vm3935_vm3, %v13846_v18  ;;  %v4604_v31 = vpop.f32.mrf.mxu0 }
 0x2d2   : > { %9846 = vmatmul.mubr.msk.f32.gmra.mxu0 %vm3935_vm3, %v11843_v34  ;;  %9798 = vmatprep.mubr.msk.f32.mxu1 %vm3935_vm3, %v13847_v26  ;;  %v12503_v55 = vadd.f32 %v4604_v31, %v4283_v56  ;;  %v9500_v14 = vpop.f32.mrf.mxu1  ;;  %v13850_v31 = vld [vmem:[#allocation77_spill] sm:$0xff] }
 0x2d3   : > { %9848 = vmatprep.mubr.msk.f32.mxu0 %vm3935_vm3, %v11863_v25  ;;  %v9550_v9 = vpop.f32.mrf.mxu0 }
 0x2d4   : > { %v12509_v34 = vadd.f32 %v9550_v9, %v9500_v14  ;;  %v4293_v25 = vpop.f32.mrf.mxu1  ;;  %v13851_v14 = vld [vmem:[#allocation5_spill] sm:$0xff] }
 0x2d5   : > { %9799 = vmatmul.mubr.msk.f32.gmra.mxu1 %vm3935_vm3, %v13848_v47  ;;  %v4614_v16 = vpop.f32.mrf.mxu0 }
 0x2d6   : > { %9849 = vmatmul.mubr.msk.f32.gmra.mxu0 %vm3935_vm3, %v13838_v13  ;;  %9801 = vmatprep.mubr.msk.f32.mxu1 %vm3935_vm3, %v13849_v22  ;;  %v12515_v18 = vadd.f32 %v4614_v16, %v4293_v25  ;;  %v9503_v26 = vpop.f32.mrf.mxu1  ;;  %v13852_v16 = vld [vmem:[#allocation6_spill] sm:$0xff] }
 0x2d7   : > { %9851 = vmatprep.mubr.msk.f32.mxu0 %vm3935_vm3, %v13839_v45  ;;  %v9553_v56 = vpop.f32.mrf.mxu0 }
 0x2d8   : > { %v12521_v13 = vadd.f32 %v9553_v56, %v9503_v26  ;;  %v4303_v45 = vpop.f32.mrf.mxu1  ;;  %v13853_v26 = vld [vmem:[#allocation37_spill] sm:$0xff] }
 0x2d9   : > { %9802 = vmatmul.mubr.msk.f32.gmra.mxu1 %vm3935_vm3, %v13850_v31  ;;  %v4624_v9 = vpop.f32.mrf.mxu0 }
 0x2da   : > { %9852 = vmatmul.mubr.msk.f32.gmra.mxu0 %vm3935_vm3, %v13840_v48  ;;  %9804 = vmatprep.mubr.msk.f32.mxu1 %vm3935_vm3, %v13851_v14  ;;  %v12527_v47 = vadd.f32 %v4624_v9, %v4303_v45  ;;  %v13854_v9 = vld [vmem:[#allocation85_spill] sm:$0xff] }
 0x2db   : > { %9854 = vmatprep.mubr.msk.f32.mxu0 %vm3935_vm3, %v11929_v53  ;;  %v9506_v22 = vpop.f32.mrf.mxu1  ;;  %v9556_v25 = vpop.f32.mrf.mxu0 }
 0x2dc   : > { %v12533_v48 = vadd.f32 %v9556_v25, %v9506_v22  ;;  %v13855_v22 = vld [vmem:[#allocation78_spill] sm:$0xff] }
 0x2dd   : > { %9805 = vmatmul.mubr.msk.f32.gmra.mxu1 %vm3935_vm3, %v13852_v16  ;;  %v4313_v53 = vpop.f32.mrf.mxu1  ;;  %v4634_v56 = vpop.f32.mrf.mxu0 }
 0x2de   : > { %9855 = vmatmul.mubr.msk.f32.gmra.mxu0 %vm3935_vm3, %v13841_v52  ;;  %9807 = vmatprep.mubr.msk.f32.mxu1 %vm3935_vm3, %v13853_v26  ;;  %v12539_v31 = vadd.f32 %v4634_v56, %v4313_v53  ;;  %v13856_v56 = vld [vmem:[#allocation7_spill] sm:$0xff] }
 0x2df   : > { %9857 = vmatprep.mubr.msk.f32.mxu0 %vm3935_vm3, %v11958_v21  ;;  %v9559_v45 = vpop.f32.mrf.mxu0 }
 0x2e0   : > { %v9509_v14 = vpop.f32.mrf.mxu1 }
 0x2e1   : > { %9808 = vmatmul.mubr.msk.f32.gmra.mxu1 %vm3935_vm3, %v13854_v9  ;;  %v12545_v52 = vadd.f32 %v9559_v45, %v9509_v14  ;;  %v4644_v25 = vpop.f32.mrf.mxu0  ;;  %v13857_v14 = vld [vmem:[#allocation8_spill] sm:$0xff] }
 0x2e2   : > { %9858 = vmatmul.mubr.msk.f32.gmra.mxu0 %vm3935_vm3, %v11971_v23  ;;  %9810 = vmatprep.mubr.msk.f32.mxu1 %vm3935_vm3, %v13855_v22  ;;  %v4323_v21 = vpop.f32.mrf.mxu1 }
 0x2e3   : > { %9860 = vmatprep.mubr.msk.f32.mxu0 %vm3935_vm3, %v11986_v42  ;;  %v12551_v16 = vadd.f32 %v4644_v25, %v4323_v21  ;;  %v13858_v25 = vld [vmem:[#allocation12_spill] sm:$0xff] }
 0x2e5   : > { %v9512_v26 = vpop.f32.mrf.mxu1  ;;  %v9562_v53 = vpop.f32.mrf.mxu0  ;;  %9811 = vmatmul.mubr.msk.f32.gmra.mxu1 %vm3935_vm3, %v13856_v56 }
 0x2e6   : > { %9861 = vmatmul.mubr.msk.f32.gmra.mxu0 %vm3935_vm3, %v11999_v28  ;;  %v12557_v23 = vadd.f32 %v9562_v53, %v9512_v26  ;;  %9813 = vmatprep.mubr.msk.f32.mxu1 %vm3935_vm3, %v13857_v14  ;;  %v13859_v26 = vld [vmem:[#allocation11_spill] sm:$0xff] }
 0x2e7   : > { %9863 = vmatprep.mubr.msk.f32.mxu0 %vm3935_vm3, %v12009_v44  ;;  %v4333_v42 = vpop.f32.mrf.mxu1  ;;  %v4654_v45 = vpop.f32.mrf.mxu0 }
 0x2e8   : > { %v12563_v9 = vadd.f32 %v4654_v45, %v4333_v42  ;;  %v13860_v45 = vld [vmem:[#allocation36_spill] sm:$0xff] }
 0x2e9   : > { %v9515_v22 = vpop.f32.mrf.mxu1  ;;  %v9565_v21 = vpop.f32.mrf.mxu0  ;;  %9814 = vmatmul.mubr.msk.f32.gmra.mxu1 %vm3935_vm3, %v13858_v25 }
 0x2ea   : > { %9864 = vmatmul.mubr.msk.f32.gmra.mxu0 %vm3935_vm3, %v12022_v43  ;;  %v12569_v28 = vadd.f32 %v9565_v21, %v9515_v22  ;;  %9816 = vmatprep.mubr.msk.f32.mxu1 %vm3935_vm3, %v13859_v26  ;;  %v13861_v22 = vld [vmem:[#allocation35_spill] sm:$0xff] }
 0x2eb   : > { %9866 = vmatprep.mubr.msk.f32.mxu0 %vm3935_vm3, %v12030_v12  ;;  %v4343_v44 = vpop.f32.mrf.mxu1  ;;  %v4664_v53 = vpop.f32.mrf.mxu0 }
 0x2ec   : > { %v12575_v56 = vadd.f32 %v4664_v53, %v4343_v44  ;;  %v13862_v53 = vld [vmem:[#allocation88_spill] sm:$0xff] }
 0x2ed   : > { %v9518_v14 = vpop.f32.mrf.mxu1  ;;  %v9568_v42 = vpop.f32.mrf.mxu0  ;;  %9817 = vmatmul.mubr.msk.f32.gmra.mxu1 %vm3935_vm3, %v13860_v45 }
 0x2ee   : > { %9867 = vmatmul.mubr.msk.f32.gmra.mxu0 %vm3935_vm3, %v12042_v1  ;;  %v12581_v43 = vadd.f32 %v9568_v42, %v9518_v14  ;;  %9819 = vmatprep.mubr.msk.f32.mxu1 %vm3935_vm3, %v13861_v22  ;;  %v13863_v14 = vld [vmem:[#allocation80_spill] sm:$0xff] }
 0x2ef   : > { %9869 = vmatprep.mubr.msk.f32.mxu0 %vm3935_vm3, %v12050_v50  ;;  %v4353_v12 = vpop.f32.mrf.mxu1  ;;  %v4674_v21 = vpop.f32.mrf.mxu0 }
 0x2f0   : > { %v12587_v25 = vadd.f32 %v4674_v21, %v4353_v12  ;;  %v13864_v21 = vld [vmem:[#allocation38_spill] sm:$0xff] }
 0x2f1   : > { %v9521_v26 = vpop.f32.mrf.mxu1  ;;  %v9571_v44 = vpop.f32.mrf.mxu0  ;;  %9820 = vmatmul.mubr.msk.f32.gmra.mxu1 %vm3935_vm3, %v13862_v53 }
 0x2f2   : > { %9870 = vmatmul.mubr.msk.f32.gmra.mxu0 %vm3935_vm3, %v12062_v19  ;;  %v12593_v1 = vadd.f32 %v9571_v44, %v9521_v26  ;;  %9822 = vmatprep.mubr.msk.f32.mxu1 %vm3935_vm3, %v13863_v14  ;;  %v13865_v26 = vld [vmem:[#allocation41_spill] sm:$0xff] }
 0x2f3   : > { %9872 = vmatprep.mubr.msk.f32.mxu0 %vm3935_vm3, %v12069_v2  ;;  %v4363_v50 = vpop.f32.mrf.mxu1  ;;  %v4684_v42 = vpop.f32.mrf.mxu0 }
 0x2f4   : > { %v12599_v45 = vadd.f32 %v4684_v42, %v4363_v50  ;;  %v13866_v42 = vld [vmem:[#allocation91_spill] sm:$0xff] }
 0x2f5   : > { %v9524_v22 = vpop.f32.mrf.mxu1  ;;  %v9574_v12 = vpop.f32.mrf.mxu0  ;;  %9823 = vmatmul.mubr.msk.f32.gmra.mxu1 %vm3935_vm3, %v13864_v21  ;;  %v6699_v21 = vld [vmem:[#allocation3 + $0x199] sm:$0xff] }
 0x2f6   : > { %9873 = vmatmul.mubr.msk.f32.gmra.mxu0 %vm3935_vm3, %v12080_v30  ;;  %v12605_v19 = vadd.f32 %v9574_v12, %v9524_v22  ;;  %9825 = vmatprep.mubr.msk.f32.mxu1 %vm3935_vm3, %v13865_v26  ;;  %v6312_v12 = vld [vmem:[#allocation3 + $0x198] sm:$0xff] }
 0x2f7   : > { %9875 = vmatprep.mubr.msk.f32.mxu0 %vm3935_vm3, %v12086_v58  ;;  %v4373_v2 = vpop.f32.mrf.mxu1  ;;  %v4694_v44 = vpop.f32.mrf.mxu0 }
 0x2f8   : > { %v12611_v53 = vadd.f32 %v4694_v44, %v4373_v2 }
 0x2f9   : > { %v9527_v14 = vpop.f32.mrf.mxu1  ;;  %9826 = vmatmul.mubr.msk.f32.gmra.mxu1 %vm3935_vm3, %v12090_v33 }
 0x2fa   : > { %v9577_v50 = vpop.f32.mrf.mxu0  ;;  %9876 = vmatmul.mubr.msk.f32.gmra.mxu0 %vm3935_vm3, %v12096_v37  ;;  %9828 = vmatprep.mubr.msk.f32.mxu1 %vm3935_vm3, %v13866_v42  ;;  %v6313_v37 = vld [vmem:[#allocation3 + $0x1a0] sm:$0xff] }
 0x2fb   : > { %v12617_v30 = vadd.f32 %v9577_v50, %v9527_v14  ;;  %9878 = vmatprep.mubr.msk.f32.mxu0 %vm3935_vm3, %v12436_v29  ;;  %v4383_v58 = vpop.f32.mrf.mxu1  ;;  %v6700_v29 = vld [vmem:[#allocation3 + $0x1a1] sm:$0xff] }
 0x2fc   : > { %v4704_v22 = vpop.f32.mrf.mxu0 }
 0x2fd   : > { %v12623_v26 = vadd.f32 %v4704_v22, %v4383_v58  ;;  %v9530_v2 = vpop.f32.mrf.mxu1  ;;  %9829 = vmatmul.mubr.msk.f32.gmra.mxu1 %vm3935_vm3, %v12302_v3 }
 0x2fe   : > { %v9580_v44 = vpop.f32.mrf.mxu0  ;;  %9879 = vmatmul.mubr.msk.f32.gmra.mxu0 %vm3935_vm3, %v12444_v24  ;;  %9831 = vmatprep.mubr.msk.f32.mxu1 %vm3935_vm3, %v6312_v12 }
 0x2ff   : > { %v12629_v33 = vadd.f32 %v9580_v44, %v9530_v2  ;;  %9881 = vmatprep.mubr.msk.f32.mxu0 %vm3935_vm3, %v6699_v21  ;;  %v4393_v14 = vpop.f32.mrf.mxu1 }
 0x300   : > { %v4714_v50 = vpop.f32.mrf.mxu0 }
 0x301   : > { %v12633_v42 = vadd.f32 %v4714_v50, %v4393_v14  ;;  %v9533_v58 = vpop.f32.mrf.mxu1  ;;  %9832 = vmatmul.mubr.msk.f32.gmra.mxu1 %vm3935_vm3, %v6313_v37  ;;  %v4575_v14 = vadd.f32 %v12465_v38, %v12463_v63  ;;  %v13868_v37 = vld [vmem:[#allocation81_spill] sm:$0xff] }
 0x302   : > { %v9583_v22 = vpop.f32.mrf.mxu0  ;;  %9882 = vmatmul.mubr.msk.f32.gmra.mxu0 %vm3935_vm3, %v6700_v29  ;;  %9886 = vmatprep.mubr.msk.f32.mxu1 %vm3935_vm3, %v12136_v46 }
 0x303   : > { %v12637_v3 = vadd.f32 %v9583_v22, %v9533_v58  ;;  %v4403_v24 = vpop.f32.mrf.mxu1 }
 0x304   : > { %v4724_v12 = vpop.f32.mrf.mxu0 }
 0x305   : > { %v12641_v2 = vadd.f32 %v4724_v12, %v4403_v24  ;;  %v9588_v21 = vpop.f32.mrf.mxu1  ;;  %9887 = vmatmul.mubr.msk.f32.vlgmr.msra.gmra.mxu1 %vm3935_vm3, %v12142_v54 }
 0x306   : > { %v9638_v44 = vpop.f32.mrf.mxu0  ;;  %v5089_v50 = vadd.f32 %v9588_v21, %v13868_v37  ;;  %9889 = vmatprep.mubr.msk.f32.mxu1 %vm3935_vm3, %v12148_v51 }
 0x307   : > { %13867 = vst [vmem:[#allocation14_spill] sm:$0xff] %v12641_v2  ;;  %v4929_v29 = vpop.f32.mrf.mxu1 }
 0x308   : > { %v5316_v58 = vpop.f32.mrf.mxu0  ;;  %v12650_v46 = vadd.f32 %v9638_v44, %v5089_v50  ;;  %v5088_v22 = vadd.f32 %v4929_v29, %v4575_v14 }
 0x309   : > { %v9591_v24 = vpop.f32.mrf.mxu1  ;;  %9890 = vmatmul.mubr.msk.f32.gmra.mxu1 %vm3935_vm3, %v12154_v59 }
 0x30a   : > { %v9641_v12 = vpop.f32.mrf.mxu0  ;;  %v12654_v2 = vadd.f32 %v5316_v58, %v5088_v22  ;;  %v5091_v54 = vadd.f32 %v9591_v24, %v12473_v0  ;;  %9892 = vmatprep.mubr.msk.f32.mxu1 %vm3935_vm3, %v12160_v41 }
 0x30b   : > { %v4939_v63 = vpop.f32.mrf.mxu1 }
 0x30c   : > { %v5326_v38 = vpop.f32.mrf.mxu0  ;;  %v12659_v51 = vadd.f32 %v9641_v12, %v5091_v54  ;;  %v5090_v21 = vadd.f32 %v4939_v63, %v12479_v32 }
 0x30d   : > { %v9594_v44 = vpop.f32.mrf.mxu1  ;;  %9893 = vmatmul.mubr.msk.f32.gmra.mxu1 %vm3935_vm3, %v12166_v8 }
 0x30e   : > { %v9644_v14 = vpop.f32.mrf.mxu0  ;;  %v12664_v37 = vadd.f32 %v5326_v38, %v5090_v21  ;;  %v5093_v59 = vadd.f32 %v9594_v44, %v12485_v7  ;;  %9895 = vmatprep.mubr.msk.f32.mxu1 %vm3935_vm3, %v12172_v20 }
 0x30f   : > { %v4949_v0 = vpop.f32.mrf.mxu1 }
 0x310   : > { %v5336_v41 = vpop.f32.mrf.mxu0  ;;  %v12669_v50 = vadd.f32 %v9644_v14, %v5093_v59  ;;  %v5092_v29 = vadd.f32 %v4949_v0, %v12491_v49 }
 0x311   : > { %v9597_v58 = vpop.f32.mrf.mxu1  ;;  %9896 = vmatmul.mubr.msk.f32.gmra.mxu1 %vm3935_vm3, %v12178_v61 }
 0x312   : > { %v9647_v32 = vpop.f32.mrf.mxu0  ;;  %v12674_v22 = vadd.f32 %v5336_v41, %v5092_v29  ;;  %v5095_v8 = vadd.f32 %v9597_v58, %v12497_v5  ;;  %9898 = vmatprep.mubr.msk.f32.mxu1 %vm3935_vm3, %v12184_v15 }
 0x313   : > { %v4959_v7 = vpop.f32.mrf.mxu1 }
 0x314   : > { %v5346_v20 = vpop.f32.mrf.mxu0  ;;  %v12679_v24 = vadd.f32 %v9647_v32, %v5095_v8  ;;  %v5094_v12 = vadd.f32 %v4959_v7, %v12503_v55 }
 0x315   : > { %v9600_v54 = vpop.f32.mrf.mxu1  ;;  %9899 = vmatmul.mubr.msk.f32.gmra.mxu1 %vm3935_vm3, %v12190_v27 }
 0x316   : > { %v9650_v49 = vpop.f32.mrf.mxu0  ;;  %v12684_v63 = vadd.f32 %v5346_v20, %v5094_v12  ;;  %v5097_v61 = vadd.f32 %v9600_v54, %v12509_v34  ;;  %9901 = vmatprep.mubr.msk.f32.mxu1 %vm3935_vm3, %v12196_v17 }
 0x317   : > { %v4969_v5 = vpop.f32.mrf.mxu1 }
 0x318   : > { %v5356_v15 = vpop.f32.mrf.mxu0  ;;  %v12689_v38 = vadd.f32 %v9650_v49, %v5097_v61  ;;  %v5096_v21 = vadd.f32 %v4969_v5, %v12515_v18 }
 0x319   : > { %v9603_v44 = vpop.f32.mrf.mxu1  ;;  %9902 = vmatmul.mubr.msk.f32.gmra.mxu1 %vm3935_vm3, %v12202_v4 }
 0x31a   : > { %v9653_v55 = vpop.f32.mrf.mxu0  ;;  %v12694_v14 = vadd.f32 %v5356_v15, %v5096_v21  ;;  %v5099_v27 = vadd.f32 %v9603_v44, %v12521_v13  ;;  %9904 = vmatprep.mubr.msk.f32.mxu1 %vm3935_vm3, %v12208_v11  ;;  %v7075_v15 = vld [vmem:[#allocation3 + $0x112] sm:$0xff] }
 0x31b   : > { %v4979_v34 = vpop.f32.mrf.mxu1 }
 0x31c   : > { %v5366_v17 = vpop.f32.mrf.mxu0  ;;  %v12699_v59 = vadd.f32 %v9653_v55, %v5099_v27  ;;  %v5098_v0 = vadd.f32 %v4979_v34, %v12527_v47  ;;  %v7077_v34 = vld [vmem:[#allocation3 + $0x12a] sm:$0xff] }
 0x31d   : > { %v9606_v41 = vpop.f32.mrf.mxu1  ;;  %9905 = vmatmul.mubr.msk.f32.gmra.mxu1 %vm3935_vm3, %v12214_v10 }
 0x31e   : > { %v9656_v18 = vpop.f32.mrf.mxu0  ;;  %v12704_v29 = vadd.f32 %v5366_v17, %v5098_v0  ;;  %v5101_v4 = vadd.f32 %v9606_v41, %v12533_v48  ;;  %9907 = vmatprep.mubr.msk.f32.mxu1 %vm3935_vm3, %v12220_v62  ;;  %v7078_v0 = vld [vmem:[#allocation3 + $0x13a] sm:$0xff] }
 0x31f   : > { %v4989_v13 = vpop.f32.mrf.mxu1 }
 0x320   : > { %v5376_v11 = vpop.f32.mrf.mxu0  ;;  %v12709_v58 = vadd.f32 %v9656_v18, %v5101_v4  ;;  %v5100_v32 = vadd.f32 %v4989_v13, %v12539_v31 }
 0x321   : > { %v9609_v8 = vpop.f32.mrf.mxu1  ;;  %9908 = vmatmul.mubr.msk.f32.gmra.mxu1 %vm3935_vm3, %v12226_v57 }
 0x322   : > { %v9659_v47 = vpop.f32.mrf.mxu0  ;;  %v12714_v7 = vadd.f32 %v5376_v11, %v5100_v32  ;;  %v5103_v10 = vadd.f32 %v9609_v8, %v12545_v52  ;;  %9910 = vmatprep.mubr.msk.f32.mxu1 %vm3935_vm3, %v12232_v60  ;;  %v7079_v11 = vld [vmem:[#allocation3 + $0x142] sm:$0xff]  ;;  %v7080_v8 = vld [vmem:[#allocation3 + $0x152] sm:$0xff] }
 0x323   : > { %v4999_v48 = vpop.f32.mrf.mxu1 }
 0x324   : > { %v5386_v62 = vpop.f32.mrf.mxu0  ;;  %v12719_v20 = vadd.f32 %v9659_v47, %v5103_v10  ;;  %v5102_v12 = vadd.f32 %v4999_v48, %v12551_v16 }
 0x325   : > { %v9612_v54 = vpop.f32.mrf.mxu1  ;;  %9911 = vmatmul.mubr.msk.f32.gmra.mxu1 %vm3935_vm3, %v12238_v35 }
 0x326   : > { %v9662_v31 = vpop.f32.mrf.mxu0  ;;  %v12724_v49 = vadd.f32 %v5386_v62, %v5102_v12  ;;  %v5105_v57 = vadd.f32 %v9612_v54, %v12557_v23  ;;  %9913 = vmatprep.mubr.msk.f32.mxu1 %vm3935_vm3, %v12244_v6  ;;  %v7081_v54 = vld [vmem:[#allocation3 + $0x15a] sm:$0xff] }
 0x327   : > { %v5009_v52 = vpop.f32.mrf.mxu1 }
 0x328   : > { %v5396_v60 = vpop.f32.mrf.mxu0  ;;  %v12729_v61 = vadd.f32 %v9662_v31, %v5105_v57  ;;  %v5104_v5 = vadd.f32 %v5009_v52, %v12563_v9  ;;  %v7082_v57 = vld [vmem:[#allocation3 + $0x16a] sm:$0xff] }
 0x329   : > { %v9615_v16 = vpop.f32.mrf.mxu1  ;;  %9914 = vmatmul.mubr.msk.f32.gmra.mxu1 %vm3935_vm3, %v7075_v15 }
 0x32a   : > { %v9665_v21 = vpop.f32.mrf.mxu0  ;;  %v12733_v44 = vadd.f32 %v5396_v60, %v5104_v5  ;;  %v5107_v35 = vadd.f32 %v9615_v16, %v12569_v28  ;;  %9916 = vmatprep.mubr.msk.f32.mxu1 %vm3935_vm3, %v12256_v39 }
 0x32b   : > { %v5019_v23 = vpop.f32.mrf.mxu1 }
 0x32c   : > { %v5406_v6 = vpop.f32.mrf.mxu0  ;;  %v12738_v55 = vadd.f32 %v9665_v21, %v5107_v35  ;;  %v5106_v27 = vadd.f32 %v5019_v23, %v12575_v56  ;;  %v7083_v21 = vld [vmem:[#allocation3 + $0x172] sm:$0xff] }
 0x32d   : > { %v9618_v9 = vpop.f32.mrf.mxu1  ;;  %9917 = vmatmul.mubr.msk.f32.gmra.mxu1 %vm3935_vm3, %v7077_v34  ;;  %v7086_v34 = vld [vmem:[#allocation3 + $0x19a] sm:$0xff] }
 0x32e   : > { %v9668_v17 = vpop.f32.mrf.mxu0  ;;  %v12742_v41 = vadd.f32 %v5406_v6, %v5106_v27  ;;  %v5109_v18 = vadd.f32 %v9618_v9, %v12581_v43  ;;  %9919 = vmatprep.mubr.msk.f32.mxu1 %vm3935_vm3, %v7078_v0 }
 0x32f   : > { %v5029_v28 = vpop.f32.mrf.mxu1 }
 0x330   : > { %v5416_v39 = vpop.f32.mrf.mxu0  ;;  %v12746_v4 = vadd.f32 %v9668_v17, %v5109_v18  ;;  %v5108_v13 = vadd.f32 %v5029_v28, %v12587_v25 }
 0x331   : > { %v9621_v56 = vpop.f32.mrf.mxu1  ;;  %9920 = vmatmul.mubr.msk.f32.gmra.mxu1 %vm3935_vm3, %v7079_v11 }
 0x332   : > { %v9671_v32 = vpop.f32.mrf.mxu0  ;;  %v12750_v47 = vadd.f32 %v5416_v39, %v5108_v13  ;;  %v5111_v10 = vadd.f32 %v9621_v56, %v12593_v1  ;;  %9922 = vmatprep.mubr.msk.f32.mxu1 %vm3935_vm3, %v7080_v8 }
 0x333   : > { %v5039_v43 = vpop.f32.mrf.mxu1 }
 0x334   : > { %v5426_v48 = vpop.f32.mrf.mxu0  ;;  %v12754_v62 = vadd.f32 %v9671_v32, %v5111_v10  ;;  %v5110_v12 = vadd.f32 %v5039_v43, %v12599_v45  ;;  %v13869_v43 = vld [vmem:[#allocation14_spill] sm:$0xff] }
 0x335   : > { %v9624_v25 = vpop.f32.mrf.mxu1  ;;  %9923 = vmatmul.mubr.msk.f32.gmra.mxu1 %vm3935_vm3, %v7081_v54 }
 0x336   : > { %v9674_v31 = vpop.f32.mrf.mxu0  ;;  %v12758_v52 = vadd.f32 %v5426_v48, %v5110_v12  ;;  %v5113_v60 = vadd.f32 %v9624_v25, %v12605_v19  ;;  %9925 = vmatprep.mubr.msk.f32.mxu1 %vm3935_vm3, %v7082_v57 }
 0x337   : > { %v5049_v1 = vpop.f32.mrf.mxu1 }
 0x338   : > { %v5436_v5 = vpop.f32.mrf.mxu0  ;;  %v12762_v15 = vadd.f32 %v9674_v31, %v5113_v60  ;;  %v5112_v16 = vadd.f32 %v5049_v1, %v12611_v53 }
 0x339   : > { %v9627_v45 = vpop.f32.mrf.mxu1  ;;  %9926 = vmatmul.mubr.msk.f32.gmra.mxu1 %vm3935_vm3, %v7083_v21 }
 0x33a   : > { %v9677_v35 = vpop.f32.mrf.mxu0  ;;  %v12766_v23 = vadd.f32 %v5436_v5, %v5112_v16  ;;  %v5115_v6 = vadd.f32 %v9627_v45, %v12617_v30  ;;  %9928 = vmatprep.mubr.msk.f32.mxu1 %vm3935_vm3, %v12438_v40  ;;  %v7087_v30 = vld [vmem:[#allocation3 + $0x1a2] sm:$0xff] }
 0x33b   : > { %v5059_v19 = vpop.f32.mrf.mxu1 }
 0x33c   : > { %v5446_v27 = vpop.f32.mrf.mxu0  ;;  %v12771_v9 = vadd.f32 %v9677_v35, %v5115_v6  ;;  %v5114_v17 = vadd.f32 %v5059_v19, %v12623_v26 }
 0x33d   : > { %v9630_v53 = vpop.f32.mrf.mxu1  ;;  %9929 = vmatmul.mubr.msk.f32.gmra.mxu1 %vm3935_vm3, %v12446_v36 }
 0x33e   : > { %v9680_v0 = vpop.f32.mrf.mxu0  ;;  %v12776_v18 = vadd.f32 %v5446_v27, %v5114_v17  ;;  %v5117_v28 = vadd.f32 %v9630_v53, %v12629_v33  ;;  %9931 = vmatprep.mubr.msk.f32.mxu1 %vm3935_vm3, %v7086_v34 }
 0x33f   : > { %v5069_v40 = vpop.f32.mrf.mxu1 }
 0x340   : > { %v5456_v39 = vpop.f32.mrf.mxu0  ;;  %v12780_v13 = vadd.f32 %v9680_v0, %v5117_v28  ;;  %v5116_v11 = vadd.f32 %v5069_v40, %v12633_v42 }
 0x341   : > { %v9633_v56 = vpop.f32.mrf.mxu1  ;;  %9932 = vmatmul.mubr.msk.f32.gmra.mxu1 %vm3935_vm3, %v7087_v30 }
 0x342   : > { %v9683_v26 = vpop.f32.mrf.mxu0  ;;  %v12784_v32 = vadd.f32 %v5456_v39, %v5116_v11  ;;  %v5119_v36 = vadd.f32 %v9633_v56, %v12637_v3 }
 0x343   : > { %v5079_v8 = vpop.f32.mrf.mxu1 }
 0x344   : > { %v5466_v10 = vpop.f32.mrf.mxu0  ;;  %v12787_v33 = vadd.f32 %v9683_v26, %v5119_v36  ;;  %v5118_v48 = vadd.f32 %v5079_v8, %v13869_v43 }
 0x345   : > { %v9688_v12 = vpop.f32.mrf.mxu1 }
 0x346   : > { %v12790_v54 = vpop.f32.mrf.mxu0  ;;  %v12792_v25 = vadd.f32 %v5466_v10, %v5118_v48  ;;  %v12795_v42 = vadd.f32 %v9688_v12, %v12650_v46 }
 0x347   : > { %v5703_v31 = vpop.f32.mrf.mxu1 }
 0x348   : > { %v12797_v57 = vpop.f32.mrf.mxu0  ;;  %v12800_v60 = vadd.f32 %v5703_v31, %v12654_v2 }
 0x349   : > { %v9691_v3 = vpop.f32.mrf.mxu1 }
 0x34a   : > { %v12802_v1 = vpop.f32.mrf.mxu0  ;;  %v12805_v5 = vadd.f32 %v9691_v3, %v12659_v51 }
 0x34b   : > { %v5713_v16 = vpop.f32.mrf.mxu1 }
 0x34c   : > { %v12807_v21 = vpop.f32.mrf.mxu0  ;;  %v12810_v45 = vadd.f32 %v5713_v16, %v12664_v37 }
 0x34d   : > { %v9694_v46 = vpop.f32.mrf.mxu1 }
 0x34e   : > { %v12812_v35 = vpop.f32.mrf.mxu0  ;;  %v12815_v6 = vadd.f32 %v9694_v46, %v12669_v50 }
 0x34f   : > { %v5723_v2 = vpop.f32.mrf.mxu1 }
 0x350   : > { %v12817_v19 = vpop.f32.mrf.mxu0  ;;  %v12820_v27 = vadd.f32 %v5723_v2, %v12674_v22 }
 0x351   : > { %v9697_v51 = vpop.f32.mrf.mxu1 }
 0x352   : > { %v12822_v34 = vpop.f32.mrf.mxu0  ;;  %v12825_v17 = vadd.f32 %v9697_v51, %v12679_v24 }
 0x353   : > { %v5733_v37 = vpop.f32.mrf.mxu1 }
 0x354   : > { %v12827_v53 = vpop.f32.mrf.mxu0  ;;  %v12830_v0 = vadd.f32 %v5733_v37, %v12684_v63 }
 0x355   : > { %v9700_v50 = vpop.f32.mrf.mxu1 }
 0x356   : > { %v12832_v28 = vpop.f32.mrf.mxu0  ;;  %v12835_v30 = vadd.f32 %v9700_v50, %v12689_v38 }
 0x357   : > { %v5743_v22 = vpop.f32.mrf.mxu1 }
 0x358   : > { %v12837_v40 = vpop.f32.mrf.mxu0  ;;  %v12840_v39 = vadd.f32 %v5743_v22, %v12694_v14 }
 0x359   : > { %v9703_v24 = vpop.f32.mrf.mxu1 }
 0x35a   : > { %v12842_v11 = vpop.f32.mrf.mxu0  ;;  %v12845_v56 = vadd.f32 %v9703_v24, %v12699_v59 }
 0x35b   : > { %v5753_v63 = vpop.f32.mrf.mxu1 }
 0x35c   : > { %v12847_v26 = vpop.f32.mrf.mxu0  ;;  %v12850_v36 = vadd.f32 %v5753_v63, %v12704_v29 }
 0x35d   : > { %v9706_v38 = vpop.f32.mrf.mxu1 }
 0x35e   : > { %v12852_v8 = vpop.f32.mrf.mxu0  ;;  %v12855_v10 = vadd.f32 %v9706_v38, %v12709_v58 }
 0x35f   : > { %v5763_v14 = vpop.f32.mrf.mxu1 }
 0x360   : > { %v12857_v43 = vpop.f32.mrf.mxu0  ;;  %v12860_v48 = vadd.f32 %v5763_v14, %v12714_v7 }
 0x361   : > { %v9709_v59 = vpop.f32.mrf.mxu1 }
 0x362   : > { %v12862_v12 = vpop.f32.mrf.mxu0  ;;  %v12865_v31 = vadd.f32 %v9709_v59, %v12719_v20 }
 0x363   : > { %v5773_v29 = vpop.f32.mrf.mxu1 }
 0x364   : > { %v12867_v3 = vpop.f32.mrf.mxu0  ;;  %v12870_v16 = vadd.f32 %v5773_v29, %v12724_v49 }
 0x365   : > { %v9712_v58 = vpop.f32.mrf.mxu1 }
 0x366   : > { %v12872_v46 = vpop.f32.mrf.mxu0  ;;  %v12875_v2 = vadd.f32 %v9712_v58, %v12729_v61 }
 0x367   : > { %v5783_v7 = vpop.f32.mrf.mxu1 }
 0x368   : > { %v12877_v51 = vpop.f32.mrf.mxu0  ;;  %v12880_v37 = vadd.f32 %v5783_v7, %v12733_v44 }
 0x369   : > { %v9715_v20 = vpop.f32.mrf.mxu1 }
 0x36a   : > { %v12882_v50 = vpop.f32.mrf.mxu0  ;;  %v12885_v22 = vadd.f32 %v9715_v20, %v12738_v55 }
 0x36b   : > { %v5793_v49 = vpop.f32.mrf.mxu1 }
 0x36c   : > { %v12887_v24 = vpop.f32.mrf.mxu0  ;;  %v12890_v63 = vadd.f32 %v5793_v49, %v12742_v41 }
 0x36d   : > { %v9718_v61 = vpop.f32.mrf.mxu1 }
 0x36e   : > { %v12892_v38 = vpop.f32.mrf.mxu0  ;;  %v12895_v14 = vadd.f32 %v9718_v61, %v12746_v4 }
 0x36f   : > { %v5803_v44 = vpop.f32.mrf.mxu1 }
 0x370   : > { %v12897_v59 = vpop.f32.mrf.mxu0  ;;  %v12900_v29 = vadd.f32 %v5803_v44, %v12750_v47 }
 0x371   : > { %13870 = vst [vmem:[#allocation13_spill] sm:$0xff] %v12897_v59  ;;  %v9721_v55 = vpop.f32.mrf.mxu1 }
 0x372   : > { %v12902_v58 = vpop.f32.mrf.mxu0  ;;  %v12905_v7 = vadd.f32 %v9721_v55, %v12754_v62 }
 0x373   : > { %13871 = vst [vmem:[#allocation15_spill] sm:$0xff] %v12902_v58  ;;  %v5813_v41 = vpop.f32.mrf.mxu1 }
 0x374   : > { %v12907_v20 = vpop.f32.mrf.mxu0  ;;  %v12910_v49 = vadd.f32 %v5813_v41, %v12758_v52 }
 0x375   : > { %13872 = vst [vmem:[#allocation40_spill] sm:$0xff] %v12907_v20  ;;  %v9724_v4 = vpop.f32.mrf.mxu1 }
 0x376   : > { %v12912_v61 = vpop.f32.mrf.mxu0  ;;  %v12915_v59 = vadd.f32 %v9724_v4, %v12762_v15 }
 0x377   : > { %13873 = vst [vmem:[#allocation39_spill] sm:$0xff] %v12912_v61  ;;  %v5823_v47 = vpop.f32.mrf.mxu1 }
 0x378   : > { %v12917_v44 = vpop.f32.mrf.mxu0  ;;  %v12920_v58 = vadd.f32 %v5823_v47, %v12766_v23 }
 0x379   : > { %13874 = vst [vmem:[#allocation83_spill] sm:$0xff] %v12917_v44  ;;  %v9727_v62 = vpop.f32.mrf.mxu1 }
 0x37a   : > { %v12922_v55 = vpop.f32.mrf.mxu0  ;;  %v12925_v20 = vadd.f32 %v9727_v62, %v12771_v9 }
 0x37b   : > { %13875 = vst [vmem:[#allocation42_spill] sm:$0xff] %v12922_v55  ;;  %v5833_v52 = vpop.f32.mrf.mxu1 }
 0x37c   : > { %v12927_v41 = vpop.f32.mrf.mxu0  ;;  %v12930_v61 = vadd.f32 %v5833_v52, %v12776_v18 }
 0x37d   : > { %13876 = vst [vmem:[#allocation45_spill] sm:$0xff] %v12927_v41  ;;  %v9730_v15 = vpop.f32.mrf.mxu1 }
 0x37e   : > { %v12932_v4 = vpop.f32.mrf.mxu0  ;;  %v12935_v44 = vadd.f32 %v9730_v15, %v12780_v13 }
 0x37f   : > { %13877 = vst [vmem:[#allocation96_spill] sm:$0xff] %v12932_v4  ;;  %v5843_v23 = vpop.f32.mrf.mxu1 }
 0x380   : > { %v12937_v47 = vpop.f32.mrf.mxu0  ;;  %v12940_v55 = vadd.f32 %v5843_v23, %v12784_v32 }
 0x381   : > { %13878 = vst [vmem:[#allocation84_spill] sm:$0xff] %v12937_v47  ;;  %v9733_v9 = vpop.f32.mrf.mxu1 }
 0x382   : > { %13879 = vst [vmem:[#allocation16_spill] sm:$0xff] %v12940_v55  ;;  %v12942_v62 = vpop.f32.mrf.mxu0  ;;  %v12945_v41 = vadd.f32 %v9733_v9, %v12787_v33 }
 0x383   : > { %13880 = vst [vmem:[#allocation17_spill] sm:$0xff] %v12942_v62  ;;  %v5853_v18 = vpop.f32.mrf.mxu1 }
 0x384   : > { %13881 = vst [vmem:[#allocation44_spill] sm:$0xff] %v12945_v41  ;;  %v12947_v52 = vpop.f32.mrf.mxu0  ;;  %v12950_v4 = vadd.f32 %v5853_v18, %v12792_v25 }
 0x385   : > { %13882 = vst [vmem:[#allocation43_spill] sm:$0xff] %v12947_v52  ;;  %v12952_v13 = vpop.f32.mrf.mxu1 }
 0x386   : > { %13883 = vst [vmem:[#allocation86_spill] sm:$0xff] %v12950_v4  ;;  %v12954_v15 = vpop.f32.mrf.mxu0 }
 0x387   : > { %13884 = vst [vmem:[#allocation46_spill] sm:$0xff] %v12954_v15  ;;  %v12956_v47 = vpop.f32.mrf.mxu1 }
 0x388   : > { %v12958_v32 = vpop.f32.mrf.mxu0 }
 0x389   : > { %13885 = vst [vmem:[#allocation49_spill] sm:$0xff] %v12958_v32  ;;  %v12960_v23 = vpop.f32.mrf.mxu1 }
 0x38a   : > { %v12962_v62 = vpop.f32.mrf.mxu0 }
 0x38b   : > { %13886 = vst [vmem:[#allocation87_spill] sm:$0xff] %v12962_v62  ;;  %v12964_v33 = vpop.f32.mrf.mxu1 }
 0x38c   : > { %13887 = vst [vmem:[#allocation101_spill] sm:$0xff] %v12964_v33  ;;  %v12966_v9 = vpop.f32.mrf.mxu0 }
 0x38d   : > { %13888 = vst [vmem:[#allocation18_spill] sm:$0xff] %v12966_v9  ;;  %v12968_v52 = vpop.f32.mrf.mxu1 }
 0x38e   : > { %13889 = vst [vmem:[#allocation19_spill] sm:$0xff] %v12968_v52  ;;  %v12970_v25 = vpop.f32.mrf.mxu0 }
 0x38f   : > { %13890 = vst [vmem:[#allocation48_spill] sm:$0xff] %v12970_v25  ;;  %v12972_v18 = vpop.f32.mrf.mxu1 }
 0x390   : > { %13891 = vst [vmem:[#allocation47_spill] sm:$0xff] %v12972_v18  ;;  %v12974_v4 = vpop.f32.mrf.mxu0 }
 0x391   : > { %13892 = vst [vmem:[#allocation89_spill] sm:$0xff] %v12974_v4  ;;  %v12976_v15 = vpop.f32.mrf.mxu1 }
 0x392   : > { %13893 = vst [vmem:[#allocation50_spill] sm:$0xff] %v12976_v15  ;;  %v12978_v41 = vpop.f32.mrf.mxu0 }
 0x393   : > { %13894 = vst [vmem:[#allocation53_spill] sm:$0xff] %v12978_v41  ;;  %v12980_v32 = vpop.f32.mrf.mxu1 }
 0x394   : > { %13895 = vst [vmem:[#allocation90_spill] sm:$0xff] %v12980_v32  ;;  %v12982_v55 = vpop.f32.mrf.mxu0 }
 0x395   : > { %13896 = vst [vmem:[#allocation20_spill] sm:$0xff] %v12982_v55  ;;  %v12984_v62 = vpop.f32.mrf.mxu1 }
 0x396   : > { %13897 = vst [vmem:[#allocation21_spill] sm:$0xff] %v12984_v62  ;;  %v12986_v33 = vpop.f32.mrf.mxu0 }
 0x397   : > { %13898 = vst [vmem:[#allocation52_spill] sm:$0xff] %v12986_v33  ;;  %v12988_v9 = vpop.f32.mrf.mxu1 }
 0x398   : > { %13899 = vst [vmem:[#allocation51_spill] sm:$0xff] %v12988_v9  ;;  %v12990_v52 = vpop.f32.mrf.mxu0 }
 0x399   : > { %13900 = vst [vmem:[#allocation92_spill] sm:$0xff] %v12990_v52  ;;  %v12992_v25 = vpop.f32.mrf.mxu1 }
 0x39a   : > { %13901 = vst [vmem:[#allocation54_spill] sm:$0xff] %v12992_v25  ;;  %v12994_v18 = vpop.f32.mrf.mxu0 }
 0x39b   : > { %13902 = vst [vmem:[#allocation57_spill] sm:$0xff] %v12994_v18  ;;  %v12996_v4 = vpop.f32.mrf.mxu1 }
 0x39c   : > { %13903 = vst [vmem:[#allocation93_spill] sm:$0xff] %v12996_v4  ;;  %v12998_v15 = vpop.f32.mrf.mxu0 }
 0x39d   : > { %13904 = vst [vmem:[#allocation22_spill] sm:$0xff] %v12998_v15  ;;  %v13000_v41 = vpop.f32.mrf.mxu1 }
 0x39e   : > { %13905 = vst [vmem:[#allocation23_spill] sm:$0xff] %v13000_v41  ;;  %v13002_v32 = vpop.f32.mrf.mxu0 }
 0x39f   : > { %13906 = vst [vmem:[#allocation56_spill] sm:$0xff] %v13002_v32  ;;  %v13004_v55 = vpop.f32.mrf.mxu1 }
 0x3a0   : > { %13907 = vst [vmem:[#allocation55_spill] sm:$0xff] %v13004_v55  ;;  %v13006_v62 = vpop.f32.mrf.mxu0 }
 0x3a1   : > { %13908 = vst [vmem:[#allocation94_spill] sm:$0xff] %v13006_v62  ;;  %v13008_v33 = vpop.f32.mrf.mxu1 }
 0x3a2   : > { %13909 = vst [vmem:[#allocation58_spill] sm:$0xff] %v13008_v33  ;;  %v13010_v9 = vpop.f32.mrf.mxu0 }
 0x3a3   : > { %13910 = vst [vmem:[#allocation61_spill] sm:$0xff] %v13010_v9  ;;  %v13012_v52 = vpop.f32.mrf.mxu1 }
 0x3a4   : > { %13911 = vst [vmem:[#allocation95_spill] sm:$0xff] %v13012_v52  ;;  %v13014_v25 = vpop.f32.mrf.mxu0 }
 0x3a5   : > { %13912 = vst [vmem:[#allocation24_spill] sm:$0xff] %v13014_v25  ;;  %v13016_v18 = vpop.f32.mrf.mxu1 }
 0x3a6   : > { %13913 = vst [vmem:[#allocation25_spill] sm:$0xff] %v13016_v18  ;;  %v13018_v4 = vpop.f32.mrf.mxu0 }
 0x3a7   : > { %13914 = vst [vmem:[#allocation60_spill] sm:$0xff] %v13018_v4  ;;  %v13020_v15 = vpop.f32.mrf.mxu1 }
 0x3a8   : > { %13915 = vst [vmem:[#allocation59_spill] sm:$0xff] %v13020_v15  ;;  %v13022_v41 = vpop.f32.mrf.mxu0 }
 0x3a9   : > { %13916 = vst [vmem:[#allocation97_spill] sm:$0xff] %v13022_v41  ;;  %v13024_v32 = vpop.f32.mrf.mxu1 }
 0x3aa   : > { %13917 = vst [vmem:[#allocation62_spill] sm:$0xff] %v13024_v32  ;;  %v13026_v55 = vpop.f32.mrf.mxu0 }
 0x3ab   : > { %13918 = vst [vmem:[#allocation65_spill] sm:$0xff] %v13026_v55  ;;  %v13028_v62 = vpop.f32.mrf.mxu1  ;;  %v6250_v55 = vadd.f32 %v12790_v54, %v12795_v42  ;;  %v6256_v54 = vadd.f32 %v12822_v34, %v12825_v17  ;;  %v6255_v42 = vadd.f32 %v12827_v53, %v12830_v0  ;;  %v6266_v34 = vadd.f32 %v12872_v46, %v12875_v2  ;;  %v13931_v46 = vld [vmem:[#allocation45_spill] sm:$0xff] }
 0x3ac   : > { %v13030_v33 = vpop.f32.mrf.mxu0  ;;  %v6265_v17 = vadd.f32 %v12877_v51, %v12880_v37  ;;  %v6268_v53 = vadd.f32 %v12882_v50, %v12885_v22  ;;  %v6267_v0 = vadd.f32 %v12887_v24, %v12890_v63  ;;  %v13117_v2 = vadd.f32 %v13931_v46, %v12930_v61  ;;  %v13932_v51 = vld [vmem:[#allocation96_spill] sm:$0xff]  ;;  %v13947_v46 = vld [vmem:[#allocation54_spill] sm:$0xff] }
 0x3ad   : > { %13919 = vst [vmem:[#allocation98_spill] sm:$0xff] %v13030_v33  ;;  %v13032_v9 = vpop.f32.mrf.mxu1  ;;  %v6249_v33 = vadd.f32 %v12797_v57, %v12800_v60  ;;  %v6258_v57 = vadd.f32 %v12832_v28, %v12835_v30  ;;  %v6257_v60 = vadd.f32 %v12837_v40, %v12840_v39  ;;  %v6270_v30 = vadd.f32 %v12892_v38, %v12895_v14  ;;  %v13925_v40 = vld [vmem:[#allocation13_spill] sm:$0xff]  ;;  %v13933_v63 = vld [vmem:[#allocation16_spill] sm:$0xff] }
 0x3ae   : > { %v13034_v52 = vpop.f32.mrf.mxu0  ;;  %v6269_v39 = vadd.f32 %v13925_v40, %v12900_v29  ;;  %v13121_v37 = vadd.f32 %v13932_v51, %v12935_v44  ;;  %v13934_v38 = vld [vmem:[#allocation84_spill] sm:$0xff] }
 0x3af   : > { %13920 = vst [vmem:[#allocation26_spill] sm:$0xff] %v13034_v52  ;;  %v13036_v25 = vpop.f32.mrf.mxu1  ;;  %v6252_v52 = vadd.f32 %v12802_v1, %v12805_v5  ;;  %v6260_v1 = vadd.f32 %v12842_v11, %v12845_v56  ;;  %v6259_v5 = vadd.f32 %v12847_v26, %v12850_v36  ;;  %v13926_v11 = vld [vmem:[#allocation15_spill] sm:$0xff]  ;;  %v13927_v26 = vld [vmem:[#allocation40_spill] sm:$0xff]  ;;  %v6637_v50 = vadd.f32 %v12956_v47, %v6249_v33  ;;  %v13940_v47 = vld [vmem:[#allocation86_spill] sm:$0xff] }
 0x3b0   : > { %13921 = vst [vmem:[#allocation27_spill] sm:$0xff] %v13036_v25  ;;  %v13038_v18 = vpop.f32.mrf.mxu0  ;;  %v6272_v56 = vadd.f32 %v13926_v11, %v12905_v7  ;;  %v6271_v36 = vadd.f32 %v13927_v26, %v12910_v49  ;;  %v13129_v14 = vadd.f32 %v13934_v38, %v13933_v63  ;;  %v13938_v44 = vld [vmem:[#allocation44_spill] sm:$0xff]  ;;  %v13942_v33 = vld [vmem:[#allocation50_spill] sm:$0xff]  ;;  %v13948_v38 = vld [vmem:[#allocation49_spill] sm:$0xff] }
 0x3b1   : > { %13922 = vst [vmem:[#allocation64_spill] sm:$0xff] %v13038_v18  ;;  %v13040_v4 = vpop.f32.mrf.mxu1  ;;  %v6251_v18 = vadd.f32 %v12807_v21, %v12810_v45  ;;  %v6262_v45 = vadd.f32 %v12852_v8, %v12855_v10  ;;  %v13928_v8 = vld [vmem:[#allocation39_spill] sm:$0xff]  ;;  %v6640_v22 = vadd.f32 %v12960_v23, %v6252_v52  ;;  %v6644_v40 = vadd.f32 %v13942_v33, %v6256_v54  ;;  %v13943_v11 = vld [vmem:[#allocation90_spill] sm:$0xff] }
 0x3b2   : > { %v13042_v15 = vpop.f32.mrf.mxu0  ;;  %v6274_v10 = vadd.f32 %v13928_v8, %v12915_v59  ;;  %v13935_v59 = vld [vmem:[#allocation101_spill] sm:$0xff]  ;;  %v13941_v52 = vld [vmem:[#allocation43_spill] sm:$0xff]  ;;  %v6643_v26 = vadd.f32 %v13943_v11, %v6255_v42  ;;  %v13944_v8 = vld [vmem:[#allocation46_spill] sm:$0xff]  ;;  %v6648_v51 = vadd.f32 %v13947_v46, %v6260_v1 }
 0x3b3   : > { %13923 = vst [vmem:[#allocation63_spill] sm:$0xff] %v13042_v15  ;;  %v13044_v41 = vpop.f32.mrf.mxu1  ;;  %v6254_v15 = vadd.f32 %v12812_v35, %v12815_v6  ;;  %v6261_v35 = vadd.f32 %v12857_v43, %v12860_v48  ;;  %v6264_v6 = vadd.f32 %v12862_v12, %v12865_v31  ;;  %v13929_v43 = vld [vmem:[#allocation83_spill] sm:$0xff]  ;;  %v13930_v12 = vld [vmem:[#allocation42_spill] sm:$0xff]  ;;  %v6639_v29 = vadd.f32 %v13935_v59, %v6251_v18 }
 0x3b4   : > { %v13046_v32 = vpop.f32.mrf.mxu0  ;;  %v6273_v48 = vadd.f32 %v13929_v43, %v12920_v58  ;;  %v13110_v31 = vadd.f32 %v13930_v12, %v12925_v20  ;;  %v13936_v58 = vld [vmem:[#allocation19_spill] sm:$0xff]  ;;  %v13142_v23 = vadd.f32 %v13941_v52, %v13940_v47  ;;  %v13945_v43 = vld [vmem:[#allocation21_spill] sm:$0xff]  ;;  %v7024_v59 = vadd.f32 %v13948_v38, %v6637_v50  ;;  %v13952_v42 = vld [vmem:[#allocation18_spill] sm:$0xff] }
 0x3b5   : > { %13924 = vst [vmem:[#allocation99_spill] sm:$0xff] %v13046_v32  ;;  %v13056_v25 = vpop.f32.mrf.mxu1  ;;  %v6253_v32 = vadd.f32 %v12817_v19, %v12820_v27  ;;  %v6263_v19 = vadd.f32 %v12867_v3, %v12870_v16  ;;  %v6638_v3 = vadd.f32 %v12952_v13, %v6250_v55  ;;  %v6642_v7 = vadd.f32 %v13936_v58, %v6254_v15  ;;  %v13937_v20 = vld [vmem:[#allocation47_spill] sm:$0xff]  ;;  %v13939_v55 = vld [vmem:[#allocation17_spill] sm:$0xff] }
 0x3b6   : > { %v13084_v27 = vpop.f32.mrf.mxu0  ;;  %v13138_v13 = vadd.f32 %v13939_v55, %v13938_v44  ;;  %v6646_v15 = vadd.f32 %v13945_v43, %v6258_v57  ;;  %v13946_v12 = vld [vmem:[#allocation51_spill] sm:$0xff]  ;;  %v13950_v44 = vld [vmem:[#allocation93_spill] sm:$0xff]  ;;  %v13157_v33 = vadd.f32 %v13952_v42, %v6639_v29 }
 0x3b7   : > { %v13074_v21 = vpop.f32.mrf.mxu1  ;;  %v6641_v49 = vadd.f32 %v13937_v20, %v6253_v32  ;;  %v7025_v18 = vadd.f32 %v13944_v8, %v6638_v3  ;;  %v6645_v32 = vadd.f32 %v13946_v12, %v6257_v60  ;;  %v13949_v58 = vld [vmem:[#allocation87_spill] sm:$0xff]  ;;  %v6647_v55 = vadd.f32 %v13950_v44, %v6259_v5  ;;  %v13953_v3 = vld [vmem:[#allocation48_spill] sm:$0xff]  ;;  %v13954_v60 = vld [vmem:[#allocation89_spill] sm:$0xff] }
 0x3b8   : > { %v13125_v24 = vpop.f32.mrf.mxu0  ;;  %v7027_v20 = vadd.f32 %v13949_v58, %v6640_v22  ;;  %v13951_v47 = vld [vmem:[#allocation23_spill] sm:$0xff]  ;;  %v13160_v57 = vadd.f32 %v13953_v3, %v6642_v7  ;;  %v13956_v50 = vld [vmem:[#allocation53_spill] sm:$0xff]  ;;  %v13957_v22 = vld [vmem:[#allocation20_spill] sm:$0xff] }
 0x3b9   : > { %v13094_v28 = vpop.f32.mrf.mxu1  ;;  %v6650_v54 = vadd.f32 %v13951_v47, %v6262_v45  ;;  %v13163_v11 = vadd.f32 %v13954_v60, %v6641_v49  ;;  %v13955_v1 = vld [vmem:[#allocation55_spill] sm:$0xff]  ;;  %v13167_v12 = vadd.f32 %v13956_v50, %v6644_v40  ;;  %v13170_v5 = vadd.f32 %v13957_v22, %v6643_v26  ;;  %v13958_v45 = vld [vmem:[#allocation58_spill] sm:$0xff]  ;;  %v13960_v58 = vld [vmem:[#allocation52_spill] sm:$0xff] }
 0x3ba   : > { %v9877_v52 = vpop.f32.mrf.mxu0  ;;  %v6649_v8 = vadd.f32 %v13955_v1, %v6261_v35  ;;  %v6652_v46 = vadd.f32 %v13958_v45, %v6264_v6  ;;  %v13959_v38 = vld [vmem:[#allocation95_spill] sm:$0xff]  ;;  %v13175_v44 = vadd.f32 %v13960_v58, %v6646_v15  ;;  %v13961_v7 = vld [vmem:[#allocation92_spill] sm:$0xff]  ;;  %v13962_v49 = vld [vmem:[#allocation57_spill] sm:$0xff] }
 0x3bb   : > { %v13113_v16 = vpop.f32.mrf.mxu1  ;;  %v6651_v29 = vadd.f32 %v13959_v38, %v6263_v19  ;;  %v13178_v47 = vadd.f32 %v13961_v7, %v6645_v32  ;;  %v13181_v42 = vadd.f32 %v13962_v49, %v6648_v51  ;;  %v13963_v35 = vld [vmem:[#allocation25_spill] sm:$0xff]  ;;  %v13964_v60 = vld [vmem:[#allocation22_spill] sm:$0xff]  ;;  %v13965_v1 = vld [vmem:[#allocation56_spill] sm:$0xff]  ;;  %v6655_v51 = vadd.f32 %v13028_v62, %v6267_v0 }
 0x3bc   : > { %v6654_v3 = vadd.f32 %v13963_v35, %v6266_v34  ;;  %v13187_v26 = vadd.f32 %v13964_v60, %v6647_v55  ;;  %v13190_v6 = vadd.f32 %v13965_v1, %v6650_v54  ;;  %v13966_v19 = vld [vmem:[#allocation59_spill] sm:$0xff]  ;;  %v13967_v15 = vld [vmem:[#allocation62_spill] sm:$0xff]  ;;  %v6995_v45 = vpop.f32.mrf.mxu0  ;;  %v6658_v34 = vadd.f32 %v13032_v9, %v6270_v30  ;;  %v13203_v55 = vld [vmem:[%s13479_s4] ss:$0 sm:$0xff] }
 0x3bd   : > { %v13134_v61 = vpop.f32.mrf.mxu1  ;;  %v6653_v50 = vadd.f32 %v13966_v19, %v6265_v17  ;;  %v6656_v22 = vadd.f32 %v13967_v15, %v6268_v53  ;;  %v13968_v32 = vld [vmem:[#allocation94_spill] sm:$0xff]  ;;  %v13969_v58 = vld [vmem:[#allocation27_spill] sm:$0xff]  ;;  %v13970_v54 = vld [vmem:[#allocation61_spill] sm:$0xff]  ;;  %v6659_v30 = vadd.f32 %v13044_v41, %v6271_v36  ;;  %v6661_v60 = vadd.f32 %v13074_v21, %v6273_v48 }
 0x3be   : > { %v13195_v38 = vadd.f32 %v13968_v32, %v6649_v8  ;;  %v6657_v7 = vadd.f32 %v13969_v58, %v6269_v39  ;;  %v13206_v17 = vadd.f32 %v13970_v54, %v6652_v46  ;;  %v13971_v53 = vld [vmem:[#allocation24_spill] sm:$0xff]  ;;  %v6660_v8 = vadd.f32 %v13040_v4, %v6272_v56  ;;  %v13973_v19 = vld [vmem:[#allocation97_spill] sm:$0xff]  ;;  %v9880_v32 = vpop.f32.mrf.mxu0  ;;  %v13976_v58 = vld [vmem:[#allocation26_spill] sm:$0xff] }
 0x3bf   : > { %v13150_v63 = vpop.f32.mrf.mxu1  ;;  %v13209_v35 = vadd.f32 %v13971_v53, %v6651_v29  ;;  %v13972_v0 = vld [vmem:[#allocation60_spill] sm:$0xff]  ;;  %v6662_v39 = vadd.f32 %v13056_v25, %v6274_v10  ;;  %v13219_v46 = vadd.f32 %v13973_v19, %v6653_v50  ;;  %v13974_v15 = vld [vmem:[#allocation65_spill] sm:$0xff]  ;;  %v13229_v41 = vadd.f32 %v13976_v58, %v6658_v34  ;;  %v13978_v48 = vld [vmem:[#allocation63_spill] sm:$0xff] }
 0x3c0   : > { %v13213_v9 = vadd.f32 %v13972_v0, %v6654_v3  ;;  %v13222_v29 = vadd.f32 %v13974_v15, %v6656_v22  ;;  %v13977_v25 = vld [vmem:[#allocation64_spill] sm:$0xff]  ;;  %v6664_v21 = vadd.f32 %v13094_v28, %v13110_v31  ;;  %v13979_v34 = vld [vmem:[#allocation99_spill] sm:$0xff]  ;;  %v13254_v31 = vadd.f32 %v13125_v24, %v6661_v60 }
 0x3c1   : > { %v9833_v43 = vpop.f32.mrf.mxu1  ;;  %v13232_v36 = vadd.f32 %v13977_v25, %v6657_v7  ;;  %v13248_v7 = vadd.f32 %v13979_v34, %v6659_v30  ;;  %v13251_v28 = vadd.f32 %v13084_v27, %v6662_v39  ;;  %v6666_v53 = vadd.f32 %v13134_v61, %v13121_v37 }
 0x3c2   : > { %v13263_v27 = vadd.f32 %v9877_v52, %v6664_v21  ;;  %v6665_v24 = vadd.f32 %v13150_v63, %v13129_v14  ;;  %v6668_v30 = vadd.f32 %v9833_v43, %v13138_v13 }
 0x3c3   : > { %v13184_v40 = vpop.f32.mrf.mxu1 }
 0x3c5   : > { %v9888_v49 = vpop.f32.mrf.mxu1 }
 0x3c6   : > { %v7412_v62 = vadd.f32 %v9888_v49, %v7025_v18  ;;  %v13975_v18 = vld [vmem:[#allocation98_spill] sm:$0xff]  ;;  %v6663_v49 = vadd.f32 %v13113_v16, %v13117_v2 }
 0x3c7   : > { %v7252_v1 = vpop.f32.mrf.mxu1  ;;  %v13226_v3 = vadd.f32 %v13975_v18, %v6655_v51 }
 0x3c8   : > { %v7451_v4 = vadd.f32 %v13203_v55, %v7412_v62  ;;  %v7411_v56 = vadd.f32 %v7252_v1, %v7024_v59  ;;  %v13244_v59 = vadd.f32 %v13978_v48, %v6660_v8  ;;  %v7005_v8 = vpop.f32.mrf.mxu0  ;;  %v13273_v52 = vadd.f32 %v6995_v45, %v6663_v49 }
 0x3c9   : > { %v9891_v10 = vpop.f32.mrf.mxu1  ;;  %v6667_v45 = vadd.f32 %v13184_v40, %v13142_v23  ;;  %v13287_v25 = vadd.f32 %v7005_v8, %v6665_v24 }
 0x3ca   : > { %v7483_v50 = vmax.f32 %v7451_v4, 0.0  ;;  %v7450_v22 = vadd.f32 %v13203_v55, %v7411_v56  ;;  %v7414_v51 = vadd.f32 %v9891_v10, %v7027_v20  ;;  %v9883_v39 = vpop.f32.mrf.mxu0 }
 0x3cb   : > { %v7262_v54 = vpop.f32.mrf.mxu1 }
 0x3cc   : > { %7515 = vst.msk [vmem:[%s13241_s9 + $0x8] sm:$0xff] %vm3935_vm3, %v7483_v50  ;;  %v7618_v20 = vmul.f32 %v7483_v50, %v7483_v50  ;;  %v7482_v62 = vmax.f32 %v7450_v22, 0.0  ;;  %v7453_v0 = vadd.f32 %v13203_v55, %v7414_v51  ;;  %v7413_v16 = vadd.f32 %v7262_v54, %v13157_v33  ;;  %v7015_v21 = vpop.f32.mrf.mxu0 }
 0x3cd   : > { %v9894_v2 = vpop.f32.mrf.mxu1  ;;  %v7547_v37 = vsel %vm3935_vm3, %v7483_v50, 0.0  ;;  %v13277_v33 = vadd.f32 %v9880_v32, %v6666_v53  ;;  %v13289_v32 = vadd.f32 %v9883_v39, %v6668_v30  ;;  %v13298_v53 = vadd.f32 %v7015_v21, %v6667_v45 }
 0x3ce   : > { %7514 = vst.msk [vmem:[%s13241_s9] sm:$0xff] %vm3935_vm3, %v7482_v62  ;;  %v7546_v61 = vsel %vm3935_vm3, %v7482_v62, 0.0  ;;  %v7617_v60 = vmul.f32 %v7482_v62, %v7482_v62  ;;  %v7485_v1 = vmax.f32 %v7453_v0, 0.0  ;;  %v7452_v14 = vadd.f32 %v13203_v55, %v7413_v16 }
 0x3cf   : > { %v7548_v19 = vadd.f32 %v7547_v37, %v7546_v61  ;;  %v7416_v13 = vadd.f32 %v9894_v2, %v13160_v57  ;;  %v7272_v63 = vpop.f32.mrf.mxu1  ;;  %v7650_v43 = vsel %vm3935_vm3, %v7618_v20, 0.0 }
 0x3d0   : > { %v7649_v15 = vsel %vm3935_vm3, %v7617_v60, 0.0  ;;  %7517 = vst.msk [vmem:[%s13241_s9 + $0x18] sm:$0xff] %vm3935_vm3, %v7485_v1  ;;  %v7415_v4 = vadd.f32 %v7272_v63, %v13163_v11  ;;  %v7484_v18 = vmax.f32 %v7452_v14, 0.0  ;;  %v7620_v50 = vmul.f32 %v7485_v1, %v7485_v1 }
 0x3d1   : > { %v7651_v56 = vadd.f32 %v7650_v43, %v7649_v15  ;;  %v7455_v58 = vadd.f32 %v13203_v55, %v7416_v13  ;;  %v9897_v57 = vpop.f32.mrf.mxu1  ;;  %v7551_v8 = vsel %vm3935_vm3, %v7485_v1, 0.0 }
 0x3d2   : > { %v7454_v10 = vadd.f32 %v13203_v55, %v7415_v4  ;;  %v7418_v48 = vadd.f32 %v9897_v57, %v13167_v12  ;;  %7516 = vst.msk [vmem:[%s13241_s9 + $0x10] sm:$0xff] %vm3935_vm3, %v7484_v18  ;;  %v7549_v23 = vsel %vm3935_vm3, %v7484_v18, 0.0  ;;  %v7619_v11 = vmul.f32 %v7484_v18, %v7484_v18 }
 0x3d3   : > { %v7487_v40 = vmax.f32 %v7455_v58, 0.0  ;;  %v7282_v22 = vpop.f32.mrf.mxu1  ;;  %v7550_v51 = vadd.f32 %v7549_v23, %v7548_v19 }
 0x3d4   : > { %v7486_v34 = vmax.f32 %v7454_v10, 0.0  ;;  %v7457_v49 = vadd.f32 %v13203_v55, %v7418_v48  ;;  %v7417_v54 = vadd.f32 %v7282_v22, %v13170_v5  ;;  %v7652_v12 = vsel %vm3935_vm3, %v7619_v11, 0.0 }
 0x3d5   : > { %7519 = vst.msk [vmem:[%s13241_s9 + $0x28] sm:$0xff] %vm3935_vm3, %v7487_v40  ;;  %v7622_v20 = vmul.f32 %v7487_v40, %v7487_v40  ;;  %v9900_v62 = vpop.f32.mrf.mxu1  ;;  %v7653_v0 = vadd.f32 %v7652_v12, %v7651_v56  ;;  %v7552_v24 = vadd.f32 %v7551_v8, %v7550_v51  ;;  %v7654_v5 = vsel %vm3935_vm3, %v7620_v50, 0.0 }
 0x3d6   : > { %7518 = vst.msk [vmem:[%s13241_s9 + $0x20] sm:$0xff] %vm3935_vm3, %v7486_v34  ;;  %v7553_v30 = vsel %vm3935_vm3, %v7486_v34, 0.0  ;;  %v7621_v16 = vmul.f32 %v7486_v34, %v7486_v34  ;;  %v7489_v2 = vmax.f32 %v7457_v49, 0.0  ;;  %v7456_v39 = vadd.f32 %v13203_v55, %v7417_v54 }
 0x3d7   : > { %v7420_v37 = vadd.f32 %v9900_v62, %v13175_v44  ;;  %v7292_v61 = vpop.f32.mrf.mxu1  ;;  %v7554_v60 = vadd.f32 %v7553_v30, %v7552_v24  ;;  %v7655_v1 = vadd.f32 %v7654_v5, %v7653_v0  ;;  %v7555_v13 = vsel %vm3935_vm3, %v7487_v40, 0.0 }
 0x3d8   : > { %v7656_v19 = vsel %vm3935_vm3, %v7621_v16, 0.0  ;;  %v7419_v14 = vadd.f32 %v7292_v61, %v13178_v47  ;;  %v7658_v63 = vsel %vm3935_vm3, %v7622_v20, 0.0  ;;  %7521 = vst.msk [vmem:[%s13241_s9 + $0x38] sm:$0xff] %vm3935_vm3, %v7489_v2  ;;  %v7488_v43 = vmax.f32 %v7456_v39, 0.0 }
 0x3d9   : > { %v7459_v15 = vadd.f32 %v13203_v55, %v7420_v37  ;;  %v9903_v4 = vpop.f32.mrf.mxu1  ;;  %v7657_v45 = vadd.f32 %v7656_v19, %v7655_v1  ;;  %v7556_v44 = vadd.f32 %v7555_v13, %v7554_v60  ;;  %v7624_v58 = vmul.f32 %v7489_v2, %v7489_v2 }
 0x3da   : > { %v7458_v56 = vadd.f32 %v13203_v55, %v7419_v14  ;;  %v7422_v18 = vadd.f32 %v9903_v4, %v13181_v42  ;;  %7520 = vst.msk [vmem:[%s13241_s9 + $0x30] sm:$0xff] %vm3935_vm3, %v7488_v43  ;;  %v7557_v47 = vsel %vm3935_vm3, %v7488_v43, 0.0  ;;  %v7623_v57 = vmul.f32 %v7488_v43, %v7488_v43 }
 0x3db   : > { %v7491_v21 = vmax.f32 %v7459_v15, 0.0  ;;  %v7302_v10 = vpop.f32.mrf.mxu1  ;;  %v7558_v48 = vadd.f32 %v7557_v47, %v7556_v44  ;;  %v7659_v50 = vadd.f32 %v7658_v63, %v7657_v45  ;;  %v7559_v40 = vsel %vm3935_vm3, %v7489_v2, 0.0 }
 0x3dc   : > { %v7490_v23 = vmax.f32 %v7458_v56, 0.0  ;;  %v7461_v11 = vadd.f32 %v13203_v55, %v7422_v18  ;;  %v7660_v22 = vsel %vm3935_vm3, %v7623_v57, 0.0  ;;  %v7421_v51 = vadd.f32 %v7302_v10, %v13187_v26 }
 0x3dd   : > { %7523 = vst.msk [vmem:[%s13241_s9 + $0x48] sm:$0xff] %vm3935_vm3, %v7491_v21  ;;  %v7626_v42 = vmul.f32 %v7491_v21, %v7491_v21  ;;  %v9906_v34 = vpop.f32.mrf.mxu1  ;;  %v7661_v49 = vadd.f32 %v7660_v22, %v7659_v50  ;;  %v7560_v54 = vadd.f32 %v7559_v40, %v7558_v48  ;;  %v7662_v20 = vsel %vm3935_vm3, %v7624_v58, 0.0 }
 0x3de   : > { %7522 = vst.msk [vmem:[%s13241_s9 + $0x40] sm:$0xff] %vm3935_vm3, %v7490_v23  ;;  %v7561_v8 = vsel %vm3935_vm3, %v7490_v23, 0.0  ;;  %v7625_v12 = vmul.f32 %v7490_v23, %v7490_v23  ;;  %v7493_v62 = vmax.f32 %v7461_v11, 0.0  ;;  %v7460_v0 = vadd.f32 %v13203_v55, %v7421_v51 }
 0x3df   : > { %v7424_v24 = vadd.f32 %v9906_v34, %v13190_v6  ;;  %v7312_v30 = vpop.f32.mrf.mxu1  ;;  %v7562_v16 = vadd.f32 %v7561_v8, %v7560_v54  ;;  %v7663_v26 = vadd.f32 %v7662_v20, %v7661_v49  ;;  %v7563_v39 = vsel %vm3935_vm3, %v7491_v21, 0.0 }
 0x3e0   : > { %v7664_v5 = vsel %vm3935_vm3, %v7625_v12, 0.0  ;;  %v7423_v2 = vadd.f32 %v7312_v30, %v13195_v38  ;;  %v7666_v37 = vsel %vm3935_vm3, %v7626_v42, 0.0  ;;  %7525 = vst.msk [vmem:[%s13241_s9 + $0x58] sm:$0xff] %vm3935_vm3, %v7493_v62  ;;  %v7492_v61 = vmax.f32 %v7460_v0, 0.0 }
 0x3e1   : > { %v7463_v60 = vadd.f32 %v13203_v55, %v7424_v24  ;;  %v9909_v1 = vpop.f32.mrf.mxu1  ;;  %v7665_v19 = vadd.f32 %v7664_v5, %v7663_v26  ;;  %v7564_v6 = vadd.f32 %v7563_v39, %v7562_v16  ;;  %v7628_v63 = vmul.f32 %v7493_v62, %v7493_v62 }
 0x3e2   : > { %v7462_v14 = vadd.f32 %v13203_v55, %v7423_v2  ;;  %v7426_v13 = vadd.f32 %v9909_v1, %v13206_v17  ;;  %7524 = vst.msk [vmem:[%s13241_s9 + $0x50] sm:$0xff] %vm3935_vm3, %v7492_v61  ;;  %v7565_v38 = vsel %vm3935_vm3, %v7492_v61, 0.0  ;;  %v7627_v43 = vmul.f32 %v7492_v61, %v7492_v61 }
 0x3e3   : > { %v7495_v15 = vmax.f32 %v7463_v60, 0.0  ;;  %v7322_v4 = vpop.f32.mrf.mxu1  ;;  %v7566_v45 = vadd.f32 %v7565_v38, %v7564_v6  ;;  %v7667_v44 = vadd.f32 %v7666_v37, %v7665_v19  ;;  %v7567_v58 = vsel %vm3935_vm3, %v7493_v62, 0.0 }
 0x3e4   : > { %v7494_v56 = vmax.f32 %v7462_v14, 0.0  ;;  %v7465_v18 = vadd.f32 %v13203_v55, %v7426_v13  ;;  %v7668_v47 = vsel %vm3935_vm3, %v7627_v43, 0.0  ;;  %v7425_v57 = vadd.f32 %v7322_v4, %v13209_v35 }
 0x3e5   : > { %7527 = vst.msk [vmem:[%s13241_s9 + $0x68] sm:$0xff] %vm3935_vm3, %v7495_v15  ;;  %v7630_v17 = vmul.f32 %v7495_v15, %v7495_v15  ;;  %v9912_v21 = vpop.f32.mrf.mxu1  ;;  %v7669_v10 = vadd.f32 %v7668_v47, %v7667_v44  ;;  %v7568_v48 = vadd.f32 %v7567_v58, %v7566_v45  ;;  %v7670_v11 = vsel %vm3935_vm3, %v7628_v63, 0.0 }
 0x3e6   : > { %7526 = vst.msk [vmem:[%s13241_s9 + $0x60] sm:$0xff] %vm3935_vm3, %v7494_v56  ;;  %v7569_v50 = vsel %vm3935_vm3, %v7494_v56, 0.0  ;;  %v7629_v23 = vmul.f32 %v7494_v56, %v7494_v56  ;;  %v7497_v40 = vmax.f32 %v7465_v18, 0.0  ;;  %v7464_v22 = vadd.f32 %v13203_v55, %v7425_v57 }
 0x3e7   : > { %v7428_v42 = vadd.f32 %v9912_v21, %v13213_v9  ;;  %v7332_v51 = vpop.f32.mrf.mxu1  ;;  %v7570_v34 = vadd.f32 %v7569_v50, %v7568_v48  ;;  %v7671_v35 = vadd.f32 %v7670_v11, %v7669_v10  ;;  %v7571_v8 = vsel %vm3935_vm3, %v7495_v15, 0.0 }
 0x3e8   : > { %v7672_v49 = vsel %vm3935_vm3, %v7629_v23, 0.0  ;;  %v7427_v54 = vadd.f32 %v7332_v51, %v13219_v46  ;;  %v7674_v12 = vsel %vm3935_vm3, %v7630_v17, 0.0  ;;  %7529 = vst.msk [vmem:[%s13241_s9 + $0x78] sm:$0xff] %vm3935_vm3, %v7497_v40  ;;  %v7496_v20 = vmax.f32 %v7464_v22, 0.0 }
 0x3e9   : > { %v7467_v62 = vadd.f32 %v13203_v55, %v7428_v42  ;;  %v9915_v0 = vpop.f32.mrf.mxu1  ;;  %v7673_v24 = vadd.f32 %v7672_v49, %v7671_v35  ;;  %v7572_v9 = vadd.f32 %v7571_v8, %v7570_v34  ;;  %v7632_v26 = vmul.f32 %v7497_v40, %v7497_v40 }
 0x3ea   : > { %v7466_v30 = vadd.f32 %v13203_v55, %v7427_v54  ;;  %v7430_v16 = vadd.f32 %v9915_v0, %v13222_v29  ;;  %7528 = vst.msk [vmem:[%s13241_s9 + $0x70] sm:$0xff] %vm3935_vm3, %v7496_v20  ;;  %v7573_v46 = vsel %vm3935_vm3, %v7496_v20, 0.0  ;;  %v7631_v5 = vmul.f32 %v7496_v20, %v7496_v20 }
 0x3eb   : > { %v7499_v2 = vmax.f32 %v7467_v62, 0.0  ;;  %v7342_v39 = vpop.f32.mrf.mxu1  ;;  %v7574_v37 = vadd.f32 %v7573_v46, %v7572_v9  ;;  %v7675_v61 = vadd.f32 %v7674_v12, %v7673_v24  ;;  %v7575_v19 = vsel %vm3935_vm3, %v7497_v40, 0.0 }
 0x3ec   : > { %v7498_v60 = vmax.f32 %v7466_v30, 0.0  ;;  %v7469_v1 = vadd.f32 %v13203_v55, %v7430_v16  ;;  %v7676_v6 = vsel %vm3935_vm3, %v7631_v5, 0.0  ;;  %v7429_v14 = vadd.f32 %v7342_v39, %v13226_v3 }
 0x3ed   : > { %7531 = vst.msk [vmem:[%s13241_s9 + $0x88] sm:$0xff] %vm3935_vm3, %v7499_v2  ;;  %v7634_v29 = vmul.f32 %v7499_v2, %v7499_v2  ;;  %v9918_v13 = vpop.f32.mrf.mxu1  ;;  %v7677_v63 = vadd.f32 %v7676_v6, %v7675_v61  ;;  %v7576_v38 = vadd.f32 %v7575_v19, %v7574_v37  ;;  %v7678_v4 = vsel %vm3935_vm3, %v7632_v26, 0.0 }
 0x3ee   : > { %7530 = vst.msk [vmem:[%s13241_s9 + $0x80] sm:$0xff] %vm3935_vm3, %v7498_v60  ;;  %v7577_v43 = vsel %vm3935_vm3, %v7498_v60, 0.0  ;;  %v7633_v15 = vmul.f32 %v7498_v60, %v7498_v60  ;;  %v7501_v45 = vmax.f32 %v7469_v1, 0.0  ;;  %v7468_v44 = vadd.f32 %v13203_v55, %v7429_v14 }
 0x3ef   : > { %v7432_v56 = vadd.f32 %v9918_v13, %v13229_v41  ;;  %v7352_v18 = vpop.f32.mrf.mxu1  ;;  %v7578_v58 = vadd.f32 %v7577_v43, %v7576_v38  ;;  %v7679_v3 = vadd.f32 %v7678_v4, %v7677_v63  ;;  %v7579_v57 = vsel %vm3935_vm3, %v7499_v2, 0.0 }
 0x3f0   : > { %v7680_v47 = vsel %vm3935_vm3, %v7633_v15, 0.0  ;;  %v7431_v17 = vadd.f32 %v7352_v18, %v13232_v36  ;;  %v7682_v21 = vsel %vm3935_vm3, %v7634_v29, 0.0  ;;  %7533 = vst.msk [vmem:[%s13241_s9 + $0x98] sm:$0xff] %vm3935_vm3, %v7501_v45  ;;  %v7500_v10 = vmax.f32 %v7468_v44, 0.0 }
 0x3f1   : > { %v7471_v48 = vadd.f32 %v13203_v55, %v7432_v56  ;;  %v9921_v50 = vpop.f32.mrf.mxu1  ;;  %v7681_v23 = vadd.f32 %v7680_v47, %v7679_v3  ;;  %v7580_v41 = vadd.f32 %v7579_v57, %v7578_v58  ;;  %v7636_v22 = vmul.f32 %v7501_v45, %v7501_v45 }
 0x3f2   : > { %v7470_v11 = vadd.f32 %v13203_v55, %v7431_v17  ;;  %v7434_v40 = vadd.f32 %v9921_v50, %v13244_v59  ;;  %7532 = vst.msk [vmem:[%s13241_s9 + $0x90] sm:$0xff] %vm3935_vm3, %v7500_v10  ;;  %v7581_v36 = vsel %vm3935_vm3, %v7500_v10, 0.0  ;;  %v7635_v42 = vmul.f32 %v7500_v10, %v7500_v10 }
 0x3f3   : > { %v7503_v51 = vmax.f32 %v7471_v48, 0.0  ;;  %v7362_v34 = vpop.f32.mrf.mxu1  ;;  %v7582_v35 = vadd.f32 %v7581_v36, %v7580_v41  ;;  %v7683_v49 = vadd.f32 %v7682_v21, %v7681_v23  ;;  %v7583_v12 = vsel %vm3935_vm3, %v7501_v45, 0.0 }
 0x3f4   : > { %v7502_v54 = vmax.f32 %v7470_v11, 0.0  ;;  %v7473_v8 = vadd.f32 %v13203_v55, %v7434_v40  ;;  %v7684_v20 = vsel %vm3935_vm3, %v7635_v42, 0.0  ;;  %v7433_v62 = vadd.f32 %v7362_v34, %v13248_v7 }
 0x3f5   : > { %7535 = vst.msk [vmem:[%s13241_s9 + $0xa8] sm:$0xff] %vm3935_vm3, %v7503_v51  ;;  %v7638_v59 = vmul.f32 %v7503_v51, %v7503_v51  ;;  %v9924_v0 = vpop.f32.mrf.mxu1  ;;  %v7685_v24 = vadd.f32 %v7684_v20, %v7683_v49  ;;  %v7584_v9 = vadd.f32 %v7583_v12, %v7582_v35  ;;  %v7686_v26 = vsel %vm3935_vm3, %v7636_v22, 0.0 }
 0x3f6   : > { %7534 = vst.msk [vmem:[%s13241_s9 + $0xa0] sm:$0xff] %vm3935_vm3, %v7502_v54  ;;  %v7585_v30 = vsel %vm3935_vm3, %v7502_v54, 0.0  ;;  %v7637_v16 = vmul.f32 %v7502_v54, %v7502_v54  ;;  %v7505_v46 = vmax.f32 %v7473_v8, 0.0  ;;  %v7472_v5 = vadd.f32 %v13203_v55, %v7433_v62 }
 0x3f7   : > { %v7436_v2 = vadd.f32 %v9924_v0, %v13251_v28  ;;  %v7372_v39 = vpop.f32.mrf.mxu1  ;;  %v7586_v37 = vadd.f32 %v7585_v30, %v7584_v9  ;;  %v7687_v7 = vadd.f32 %v7686_v26, %v7685_v24  ;;  %v7587_v1 = vsel %vm3935_vm3, %v7503_v51, 0.0 }
 0x3f8   : > { %v7688_v61 = vsel %vm3935_vm3, %v7637_v16, 0.0  ;;  %v7435_v60 = vadd.f32 %v7372_v39, %v13254_v31  ;;  %v7690_v19 = vsel %vm3935_vm3, %v7638_v59, 0.0  ;;  %7537 = vst.msk [vmem:[%s13241_s9 + $0xb8] sm:$0xff] %vm3935_vm3, %v7505_v46  ;;  %v7504_v6 = vmax.f32 %v7472_v5, 0.0 }
 0x3f9   : > { %v7475_v29 = vadd.f32 %v13203_v55, %v7436_v2  ;;  %v9927_v14 = vpop.f32.mrf.mxu1  ;;  %v7689_v13 = vadd.f32 %v7688_v61, %v7687_v7  ;;  %v7588_v28 = vadd.f32 %v7587_v1, %v7586_v37  ;;  %v7640_v43 = vmul.f32 %v7505_v46, %v7505_v46 }
 0x3fa   : > { %v7474_v63 = vadd.f32 %v13203_v55, %v7435_v60  ;;  %v7438_v38 = vadd.f32 %v9927_v14, %v13263_v27  ;;  %7536 = vst.msk [vmem:[%s13241_s9 + $0xb0] sm:$0xff] %vm3935_vm3, %v7504_v6  ;;  %v7589_v31 = vsel %vm3935_vm3, %v7504_v6, 0.0  ;;  %v7639_v15 = vmul.f32 %v7504_v6, %v7504_v6 }
 0x3fb   : > { %v7507_v4 = vmax.f32 %v7475_v29, 0.0  ;;  %v7382_v45 = vpop.f32.mrf.mxu1  ;;  %v7590_v44 = vadd.f32 %v7589_v31, %v7588_v28  ;;  %v7691_v56 = vadd.f32 %v7690_v19, %v7689_v13  ;;  %v7591_v3 = vsel %vm3935_vm3, %v7505_v46, 0.0 }
 0x3fc   : > { %v7506_v18 = vmax.f32 %v7474_v63, 0.0  ;;  %v7477_v58 = vadd.f32 %v13203_v55, %v7438_v38  ;;  %v7692_v47 = vsel %vm3935_vm3, %v7639_v15, 0.0  ;;  %v7437_v17 = vadd.f32 %v7382_v45, %v13273_v52 }
 0x3fd   : > { %7539 = vst.msk [vmem:[%s13241_s9 + $0xc8] sm:$0xff] %vm3935_vm3, %v7507_v4  ;;  %v7642_v27 = vmul.f32 %v7507_v4, %v7507_v4  ;;  %v9930_v57 = vpop.f32.mrf.mxu1  ;;  %v7693_v21 = vadd.f32 %v7692_v47, %v7691_v56  ;;  %v7592_v10 = vadd.f32 %v7591_v3, %v7590_v44  ;;  %v7694_v23 = vsel %vm3935_vm3, %v7640_v43, 0.0 }
 0x3fe   : > { %7538 = vst.msk [vmem:[%s13241_s9 + $0xc0] sm:$0xff] %vm3935_vm3, %v7506_v18  ;;  %v7593_v48 = vsel %vm3935_vm3, %v7506_v18, 0.0  ;;  %v7641_v50 = vmul.f32 %v7506_v18, %v7506_v18  ;;  %v7509_v41 = vmax.f32 %v7477_v58, 0.0  ;;  %v7476_v11 = vadd.f32 %v13203_v55, %v7437_v17 }
 0x3ff   : > { %v7440_v40 = vadd.f32 %v9930_v57, %v13277_v33  ;;  %v7392_v22 = vpop.f32.mrf.mxu1  ;;  %v7594_v36 = vadd.f32 %v7593_v48, %v7592_v10  ;;  %v7695_v52 = vadd.f32 %v7694_v23, %v7693_v21  ;;  %v7595_v34 = vsel %vm3935_vm3, %v7507_v4, 0.0 }
 0x400   : > { %v7696_v42 = vsel %vm3935_vm3, %v7641_v50, 0.0  ;;  %v7439_v51 = vadd.f32 %v7392_v22, %v13287_v25  ;;  %v7698_v35 = vsel %vm3935_vm3, %v7642_v27, 0.0  ;;  %7541 = vst.msk [vmem:[%s13241_s9 + $0xd8] sm:$0xff] %vm3935_vm3, %v7509_v41  ;;  %v7508_v49 = vmax.f32 %v7476_v11, 0.0 }
 0x401   : > { %v7479_v54 = vadd.f32 %v13203_v55, %v7440_v40  ;;  %v9933_v8 = vpop.f32.mrf.mxu1  ;;  %v7697_v12 = vadd.f32 %v7696_v42, %v7695_v52  ;;  %v7596_v33 = vadd.f32 %v7595_v34, %v7594_v36  ;;  %v7644_v62 = vmul.f32 %v7509_v41, %v7509_v41 }
 0x402   : > { %v7478_v20 = vadd.f32 %v13203_v55, %v7439_v51  ;;  %v7442_v59 = vadd.f32 %v9933_v8, %v13289_v32  ;;  %7540 = vst.msk [vmem:[%s13241_s9 + $0xd0] sm:$0xff] %vm3935_vm3, %v7508_v49  ;;  %v7597_v25 = vsel %vm3935_vm3, %v7508_v49, 0.0  ;;  %v7643_v0 = vmul.f32 %v7508_v49, %v7508_v49 }
 0x403   : > { %v7511_v24 = vmax.f32 %v7479_v54, 0.0  ;;  %v7402_v9 = vpop.f32.mrf.mxu1  ;;  %v7598_v30 = vadd.f32 %v7597_v25, %v7596_v33  ;;  %v7699_v16 = vadd.f32 %v7698_v35, %v7697_v12  ;;  %v7599_v5 = vsel %vm3935_vm3, %v7509_v41, 0.0 }
 0x404   : > { %v7510_v26 = vmax.f32 %v7478_v20, 0.0  ;;  %v7481_v46 = vadd.f32 %v13203_v55, %v7442_v59  ;;  %v7700_v2 = vsel %vm3935_vm3, %v7643_v0, 0.0  ;;  %v7441_v32 = vadd.f32 %v7402_v9, %v13298_v53 }
 0x405   : > { %7543 = vst.msk [vmem:[%s13241_s9 + $0xe8] sm:$0xff] %vm3935_vm3, %v7511_v24  ;;  %v7701_v39 = vadd.f32 %v7700_v2, %v7699_v16  ;;  %v7600_v37 = vadd.f32 %v7599_v5, %v7598_v30  ;;  %v7702_v60 = vsel %vm3935_vm3, %v7644_v62, 0.0  ;;  %v7646_v1 = vmul.f32 %v7511_v24, %v7511_v24 }
 0x406   : > { %7542 = vst.msk [vmem:[%s13241_s9 + $0xe0] sm:$0xff] %vm3935_vm3, %v7510_v26  ;;  %v7601_v7 = vsel %vm3935_vm3, %v7510_v26, 0.0  ;;  %v7645_v61 = vmul.f32 %v7510_v26, %v7510_v26  ;;  %v7513_v19 = vmax.f32 %v7481_v46, 0.0  ;;  %v7480_v6 = vadd.f32 %v13203_v55, %v7441_v32 }
 0x407   : > { %v7602_v29 = vadd.f32 %v7601_v7, %v7600_v37  ;;  %v7703_v14 = vadd.f32 %v7702_v60, %v7701_v39  ;;  %v7603_v53 = vsel %vm3935_vm3, %v7511_v24, 0.0  ;;  %v7706_v43 = vsel %vm3935_vm3, %v7646_v1, 0.0 }
 0x408   : > { %v7704_v13 = vsel %vm3935_vm3, %v7645_v61, 0.0  ;;  %7545 = vst.msk [vmem:[%s13241_s9 + $0xf8] sm:$0xff] %vm3935_vm3, %v7513_v19  ;;  %v7512_v28 = vmax.f32 %v7480_v6, 0.0  ;;  %v7648_v31 = vmul.f32 %v7513_v19, %v7513_v19  ;;  %v7607_v44 = vsel %vm3935_vm3, %v7513_v19, 0.0 }
 0x409   : > { %v7705_v63 = vadd.f32 %v7704_v13, %v7703_v14  ;;  %v7604_v38 = vadd.f32 %v7603_v53, %v7602_v29 }
 0x40a   : > { %7544 = vst.msk [vmem:[%s13241_s9 + $0xf0] sm:$0xff] %vm3935_vm3, %v7512_v28  ;;  %v7605_v15 = vsel %vm3935_vm3, %v7512_v28, 0.0  ;;  %v7647_v4 = vmul.f32 %v7512_v28, %v7512_v28  ;;  %v7710_v3 = vsel %vm3935_vm3, %v7648_v31, 0.0 }
 0x40b   : > { %v7606_v55 = vadd.f32 %v7605_v15, %v7604_v38  ;;  %v7707_v45 = vadd.f32 %v7706_v43, %v7705_v63 }
 0x40c   : > { %v7708_v56 = vsel %vm3935_vm3, %v7647_v4, 0.0 }
 0x40d   : > { %v7608_v18 = vadd.f32 %v7607_v44, %v7606_v55  ;;  %v7709_v58 = vadd.f32 %v7708_v56, %v7707_v45 }
 0x40f   : > { %v7609_v47 = vrot.slane %v7608_v18, 4  ;;  %v7711_v27 = vadd.f32 %v7710_v3, %v7709_v58 }
 0x411   : > { %v7610_v17 = vadd.f32 %v7609_v47, %v7608_v18  ;;  %v7712_v57 = vrot.slane %v7711_v27, 4 }
 0x413   : > { %v7611_v21 = vrot.slane %v7610_v17, 2  ;;  %v7713_v10 = vadd.f32 %v7712_v57, %v7711_v27 }
 0x415   : > { %v7612_v48 = vadd.f32 %v7611_v21, %v7610_v17  ;;  %v7714_v50 = vrot.slane %v7713_v10, 2 }
 0x417   : > { %v7613_v23 = vrot.slane %v7612_v48, 1  ;;  %v7715_v41 = vadd.f32 %v7714_v50, %v7713_v10 }
 0x419   : > { %v7614_v11 = vadd.f32 %v7613_v23, %v7612_v48  ;;  %v7716_v40 = vrot.slane %v7715_v41, 1 }
 0x41b   : > { %7616 = vst.msk [vmem:[%s292_s11] sm:$0x1] %vm7615_vm5, %v7614_v11  ;;  %v7717_v22 = vadd.f32 %v7716_v40, %v7715_v41 }
 0x41d   : > { %7718 = vst.msk [vmem:[%s295_s15] sm:$0x1] %vm7615_vm5, %v7717_v22 }
 0x41e PF: > { %s18_s24 = sadd.s32 1, %s9949_s24  }
 0x41f   : > { %p15_p4 = scmp.ge.s32.totalorder %s18_s24, 4  }
 0x421   :  { %17 = sbr.rel (!%p15_p4) target bundleno = 1 (0x1), region = 114 }

</bundles_post_ra>
